<compile_context>
chip_gen: v7x
topology: tpu7x:2x2x1
jax: 0.10.0
libtpu: 0.0.40
codegen_flags: <defaults>
</compile_context>

<pallas_src>
import functools

import jax
import jax.numpy as jnp
from jax import lax
from jax.experimental import pallas as pl
from jax.experimental.pallas import tpu as pltpu

HP = 128        # hidden padded to one full vreg lane width
GP = 3 * HP     # gate-packed width: r, z, n at lane offsets 0 / 128 / 256


def _round_up(x, m):
    return (x + m - 1) // m * m


# ------------------------------------------------------------- fused kernel
def command_scorer_kernel(ids_ref, dyn_ref, embgi_ref, whh_ref, aux_ref,
                          out_ref, *, L, Lc, C, OBS_PAD):
    f32, bf16 = jnp.float32, jnp.bfloat16
    NT = ids_ref.shape[0]
    VP = embgi_ref.shape[0]

    # ---- dynamic per-step inputs -------------------------------------------
    h0_state = dyn_ref[0:1, :]                       # (1, HP), lanes H.. are 0
    u = dyn_ref[1:2, 0:1]                            # (1, 1) uniform sample

    # ---- hoisted: state-GRU hidden-side product (depends only on h0_state) --
    st_whh = whh_ref[2 * HP:3 * HP, :]
    gh_st = jnp.dot(h0_state.astype(bf16), st_whh,
                    preferred_element_type=f32)       # (1, GP)

    # ---- fused embedding gather + input projections (one-hot matmuls) ------
    ids = ids_ref[...]                                # (NT, 1) int32
    vocab_iota = lax.broadcasted_iota(jnp.int32, (NT, VP), 1)
    onehot = (vocab_iota == ids).astype(bf16)         # (NT, VP)
    gi_obs = jnp.dot(onehot[0:OBS_PAD, :], embgi_ref[:, 0:GP],
                     preferred_element_type=f32)      # (OBS_PAD, GP)
    gi_cmd = jnp.dot(onehot[OBS_PAD:, :], embgi_ref[:, GP:2 * GP],
                     preferred_element_type=f32)      # (CMD_ROWS, GP)

    # ---- loop-invariant weights / biases (loaded once) ---------------------
    enc_whh = whh_ref[0:HP, :]
    cmd_whh = whh_ref[HP:2 * HP, :]
    st_wih = whh_ref[3 * HP:4 * HP, :]
    enc_bhn = aux_ref[0:1, 0:HP]
    cmd_bhn = aux_ref[0:1, HP:2 * HP]
    st_bhn = aux_ref[0:1, 2 * HP:3 * HP]
    st_gib = aux_ref[5:6, :]                          # (1, GP) state-GRU gi bias
    head_rows = aux_ref[1:3, 0:HP].astype(bf16)       # (2, HP): critic_w ; att_ws
    att_wc = aux_ref[3:4, 0:HP].astype(bf16)          # (1, HP): att cmd-half
    head_b = aux_ref[4:5, 0:2]                        # (1, 2):  critic_b, att_b

    def gru_step(h, gi, whh_b, bhn):
        # PyTorch GRU gate math; b_ih (+ b_hh for r/z) is pre-folded into gi,
        # only b_hn is applied per step (inside the reset gate).
        gh = jnp.dot(h.astype(bf16), whh_b, preferred_element_type=f32)
        r = jax.nn.sigmoid(gi[:, 0:HP] + gh[:, 0:HP])
        z = jax.nn.sigmoid(gi[:, HP:2 * HP] + gh[:, HP:2 * HP])
        n = jnp.tanh(gi[:, 2 * HP:3 * HP] + r * (gh[:, 2 * HP:3 * HP] + bhn))
        return (1.0 - z) * n + z * h

    # ---- two independent recurrences, interleaved step-by-step -------------
    # TODO(synk): merge them into one block-diagonal (256 -> 768) step with the
    # two hiddens lane-packed to halve the serial MXU issue count; kept as two
    # interleaved chains for shape generality.
    h_enc = jnp.zeros((1, HP), f32)
    h_cmd = jnp.zeros((C, HP), f32)
    c_full = None
    for t in range(max(L, Lc)):                       # static, fully unrolled
        if t < L:
            h_enc = gru_step(h_enc, gi_obs[t:t + 1, :], enc_whh, enc_bhn)
        if t < Lc:
            h_cmd = gru_step(h_cmd, gi_cmd[t * C:(t + 1) * C, :],
                             cmd_whh, cmd_bhn)
        if t == Lc - 1:
            # cmd-side attention projection as soon as the cmd chain is done;
            # pad rows to HP so the result is a lane-dense (1, HP) vector.
            h_cmd_pad = jnp.concatenate(
                [h_cmd, jnp.zeros((HP - C, HP), f32)], axis=0)       # (HP, HP)
            c_full = lax.dot_general(att_wc, h_cmd_pad.astype(bf16),
                                     (((1,), (1,)), ((), ())),
                                     preferred_element_type=f32)     # (1, HP)

    # ---- state GRU: single step (gh_st was hoisted to the top) -------------
    gi_st = jnp.dot(h_enc.astype(bf16), st_wih,
                    preferred_element_type=f32) + st_gib             # (1, GP)
    r = jax.nn.sigmoid(gi_st[:, 0:HP] + gh_st[:, 0:HP])
    z = jax.nn.sigmoid(gi_st[:, HP:2 * HP] + gh_st[:, HP:2 * HP])
    n = jnp.tanh(gi_st[:, 2 * HP:3 * HP] + r * (gh_st[:, 2 * HP:3 * HP] + st_bhn))
    h_state = (1.0 - z) * n + z * h0_state                           # (1, HP)

    # ---- heads: critic + att_cmd(state half) in one tiny matmul ------------
    sp = lax.dot_general(h_state.astype(bf16), head_rows,
                         (((1,), (1,)), ((), ())),
                         preferred_element_type=f32) + head_b        # (1, 2)
    value = sp[:, 0:1]
    s_att = sp[:, 1:2]

    lane = lax.broadcasted_iota(jnp.int32, (1, HP), 1)
    valid = lane < C
    scores = jnp.where(valid, jnp.maximum(c_full + s_att, 0.0), 0.0)  # (1, HP)

    # ---- softmax + multinomial sampling (inverse CDF), fully in-kernel ------
    # Sampling works on the unnormalized exp/CDF (u is scaled by the total), so
    # no reciprocal is needed and no approximately-normalized probs leak out.
    m = jnp.max(scores, axis=-1, keepdims=True)
    e = jnp.where(valid, jnp.exp(scores - m), 0.0)
    total = jnp.sum(e, axis=-1, keepdims=True)
    ii = lax.broadcasted_iota(jnp.int32, (HP, HP), 0)
    jj = lax.broadcasted_iota(jnp.int32, (HP, HP), 1)
    tri = (ii <= jj).astype(f32)
    cdf = jnp.dot(e, tri, preferred_element_type=f32)                # (1, HP)
    target = u * total
    idx = jnp.sum((cdf <= target).astype(f32), axis=-1, keepdims=True)
    idx = jnp.minimum(idx, jnp.float32(C - 1))                       # (1, 1)

    # ---- one lane-dense output slab, single unmasked full-width store ------
    # row 0: scores (lanes 0:C) ; row 1: lane0=value, lane1=sampled index ;
    # row 2: new state hidden (lanes 0:H) ; rows 3-7: zero.
    row_misc = jnp.where(lane == 0, value, jnp.where(lane == 1, idx, 0.0))
    slab = jnp.concatenate(
        [scores, row_misc, h_state, jnp.zeros((5, HP), f32)], axis=0)
    out_ref[...] = slab


# ----------------------------------------------------- parameter preparation
def prepare_params(params):
    """One-time repack of PyTorch-layout params into the padded kernel slabs."""
    emb = jnp.asarray(params["embedding"], jnp.float32)
    V, H = emb.shape
    assert H <= HP
    VP = _round_up(max(V, 8), 128)
    emb_pad = jnp.zeros((VP, H), jnp.float32).at[0:V, :].set(emb)

    def gate_pad_cols(m):                       # (rows, 3H) -> (rows, GP)
        out = jnp.zeros((m.shape[0], GP), jnp.float32)
        out = out.at[:, 0:H].set(m[:, 0:H])
        out = out.at[:, HP:HP + H].set(m[:, H:2 * H])
        out = out.at[:, 2 * HP:2 * HP + H].set(m[:, 2 * H:3 * H])
        return out

    def pad_rows(m, rows):                      # (r, c) -> (rows, c)
        return jnp.zeros((rows, m.shape[1]),
                         jnp.float32).at[0:m.shape[0], :].set(m)

    def gi_bias(b_ih, b_hh):
        # fold b_hh's r/z parts into the input-side bias (PyTorch keeps only
        # b_hn under the reset gate)
        return jnp.concatenate([b_ih[0:H] + b_hh[0:H],
                                b_ih[H:2 * H] + b_hh[H:2 * H],
                                b_ih[2 * H:3 * H]])

    def gi_table(pp):                           # emb @ W_ih^T + folded bias
        w_ih, _, b_ih, b_hh = pp
        g = emb_pad @ w_ih.T + gi_bias(b_ih, b_hh)[None, :]    # (VP, 3H)
        return gate_pad_cols(g)                                # (VP, GP)

    def whh_block(w):                           # (3H, H) -> (HP, GP)
        return pad_rows(gate_pad_cols(jnp.transpose(w)), HP)

    enc = params["encoder_gru"]
    cmd = params["cmd_encoder_gru"]
    st = params["state_gru"]

    emb_gi = jnp.concatenate([gi_table(enc), gi_table(cmd)], axis=1)  # (VP,2GP)

    whh_slab = jnp.concatenate([
        whh_block(enc[1]),          # encoder W_hh
        whh_block(cmd[1]),          # cmd-encoder W_hh
        whh_block(st[1]),           # state W_hh
        whh_block(st[0]),           # state W_ih (its input is the padded h_enc)
    ], axis=0)                      # (4*HP, GP)

    aux = jnp.zeros((8, GP), jnp.float32)
    aux = aux.at[0, 0:H].set(enc[3][2 * H:3 * H])               # enc b_hn
    aux = aux.at[0, HP:HP + H].set(cmd[3][2 * H:3 * H])         # cmd b_hn
    aux = aux.at[0, 2 * HP:2 * HP + H].set(st[3][2 * H:3 * H])  # state b_hn
    aux = aux.at[1, 0:H].set(params["critic_w"][0])
    aux = aux.at[2, 0:H].set(params["att_w"][0, 0:H])           # att state-half
    aux = aux.at[3, 0:H].set(params["att_w"][0, H:2 * H])       # att cmd-half
    aux = aux.at[4, 0].set(params["critic_b"][0])
    aux = aux.at[4, 1].set(params["att_b"][0])
    aux = aux.at[5, :].set(gate_pad_cols(gi_bias(st[2], st[3])[None, :])[0])

    return {
        "emb_gi": emb_gi.astype(jnp.bfloat16),
        "whh": whh_slab.astype(jnp.bfloat16),
        "aux": aux,                              # small; kept f32 (biases/heads)
        "hidden_size": H,
    }


# ---------------------------------------------------------------- forward
def command_scorer_forward(prep, obs, commands, state_hidden, sample_key):
    """Mirrors CommandScorer.forward.

    obs:          (L, B) int32 (B must be 1)
    commands:     (Lc, C) int32
    state_hidden: (1, 1, H) float32 (persistent module state, passed in/out)
    Returns (scores (1,1,C), index (1,1,1) int32, value (1,1,1), new_state_hidden).
    """
    H = prep["hidden_size"]
    L, B = obs.shape
    Lc, C = commands.shape
    assert B == 1, "CommandScorer keeps a (1,1,H) persistent state -> batch must be 1"
    assert C <= HP

    OBS_PAD = _round_up(max(L, 1), 8)
    CMD_ROWS = _round_up(Lc * C, 8)
    NT = OBS_PAD + CMD_ROWS

    # Tiny per-step dynamic inputs: token ids + (state hidden, uniform sample).
    ids = jnp.zeros((NT, 1), jnp.int32)
    ids = ids.at[0:L, 0].set(obs[:, 0])
    ids = ids.at[OBS_PAD:OBS_PAD + Lc * C, 0].set(commands.reshape(-1))

    u = jax.random.uniform(sample_key, (), jnp.float32)
    dyn = jnp.zeros((2, HP), jnp.float32)
    dyn = dyn.at[0, 0:H].set(state_hidden.reshape(-1))
    dyn = dyn.at[1, 0].set(u)

    vmem = pl.BlockSpec(memory_space=pltpu.MemorySpace.VMEM)
    out = pl.pallas_call(
        functools.partial(command_scorer_kernel,
                          L=L, Lc=Lc, C=C, OBS_PAD=OBS_PAD),
        out_shape=jax.ShapeDtypeStruct((8, HP), jnp.float32),
        in_specs=[vmem] * 5,
        out_specs=vmem,
    )(ids, dyn, prep["emb_gi"], prep["whh"], prep["aux"])

    scores = out[0, 0:C].reshape(1, 1, C)
    value = out[1, 0].reshape(1, 1, 1)
    index = out[1, 1].astype(jnp.int32).reshape(1, 1, 1)
    new_state_hidden = out[2, 0:H].reshape(1, 1, H)
    return scores, index, value, new_state_hidden


# ----------------------------------------------------------- parameter init
def init_params(vocab_size, hidden_size, key):
    """Deterministic synthetic init matching the PyTorch module's shapes."""
    H = hidden_size
    keys = jax.random.split(key, 20)
    k_gru = 1.0 / float(H) ** 0.5
    k_att = 1.0 / float(2 * H) ** 0.5

    def uni(k, shape, bound):
        return jax.random.uniform(k, shape, jnp.float32, -bound, bound)

    def gru_params(k1, k2, k3, k4):
        return (uni(k1, (3 * H, H), k_gru),   # weight_ih_l0 (gate order r,z,n)
                uni(k2, (3 * H, H), k_gru),   # weight_hh_l0
                uni(k3, (3 * H,), k_gru),     # bias_ih_l0
                uni(k4, (3 * H,), k_gru))     # bias_hh_l0

    return {
        "embedding": jax.random.normal(keys[0], (vocab_size, H), jnp.float32),
        "encoder_gru": gru_params(keys[1], keys[2], keys[3], keys[4]),
        "cmd_encoder_gru": gru_params(keys[5], keys[6], keys[7], keys[8]),
        "state_gru": gru_params(keys[9], keys[10], keys[11], keys[12]),
        "critic_w": uni(keys[13], (1, H), k_gru),
        "critic_b": uni(keys[14], (1,), k_gru),
        "att_w": uni(keys[15], (1, 2 * H), k_att),
        "att_b": uni(keys[16], (1,), k_att),
    }


# ---------------------------------------------------------- pure-JAX reference
def _gru_ref(x_seq, h0, w_ih, w_hh, b_ih, b_hh):
    Hd = h0.shape[-1]
    h = h0
    for t in range(x_seq.shape[0]):
        x = x_seq[t]
        gi = x @ w_ih.T + b_ih
        gh = h @ w_hh.T + b_hh
        r = jax.nn.sigmoid(gi[:, :Hd] + gh[:, :Hd])
        z = jax.nn.sigmoid(gi[:, Hd:2 * Hd] + gh[:, Hd:2 * Hd])
        n = jnp.tanh(gi[:, 2 * Hd:] + r * gh[:, 2 * Hd:])
        h = (1.0 - z) * n + z * h
    return h


if __name__ == "__main__":
    vocab_size, hidden_size = 50, 32
    L, B = 8, 1          # obs: (seq_len=8, batch=1)
    Lc, C = 6, 8         # commands: (cmd_len=6, nb_cmds=8)

    params = init_params(vocab_size, hidden_size, jax.random.PRNGKey(42))
    prep = prepare_params(params)

    key = jax.random.PRNGKey(0)
    okey, ckey, skey = jax.random.split(key, 3)
    obs = jax.random.randint(okey, (L, B), 0, vocab_size, jnp.int32)
    commands = jax.random.randint(ckey, (Lc, C), 0, vocab_size, jnp.int32)
    state_hidden = jnp.zeros((1, 1, hidden_size), jnp.float32)

    scores, index, value, new_state_hidden = command_scorer_forward(
        prep, obs, commands, state_hidden, skey)
    jax.block_until_ready((scores, index, value, new_state_hidden))

    assert scores.shape == (1, 1, C)
    assert index.shape == (1, 1, 1)
    assert value.shape == (1, 1, 1)
    assert new_state_hidden.shape == (1, 1, hidden_size)

    # Unfused pure-JAX (f32) reference.  Tolerance 3e-2 absorbs the bf16
    # weight quantization inside the kernel (expected drift ~1e-3).
    emb = params["embedding"]
    e_obs = jnp.take(emb, obs[:, 0], axis=0)[:, None, :]     # (L,1,H)
    e_cmd = jnp.take(emb, commands, axis=0)                  # (Lc,C,H)
    h_enc_r = _gru_ref(e_obs, jnp.zeros((1, hidden_size), jnp.float32),
                       *params["encoder_gru"])
    h_st_r = _gru_ref(h_enc_r[None], state_hidden.reshape(1, hidden_size),
                      *params["state_gru"])
    h_cm_r = _gru_ref(e_cmd, jnp.zeros((C, hidden_size), jnp.float32),
                      *params["cmd_encoder_gru"])
    val_r = (h_st_r @ params["critic_w"].T + params["critic_b"]).reshape(())
    sc_r = jnp.maximum(h_st_r @ params["att_w"][:, :hidden_size].T
                       + h_cm_r @ params["att_w"][:, hidden_size:].T
                       + params["att_b"], 0.0)[:, 0]

    assert jnp.allclose(scores.reshape(C), sc_r, rtol=3e-2, atol=3e-2)
    assert jnp.allclose(value.reshape(()), val_r, rtol=3e-2, atol=3e-2)
    assert jnp.allclose(new_state_hidden.reshape(hidden_size),
                        h_st_r.reshape(hidden_size), rtol=3e-2, atol=3e-2)
    assert bool(jnp.all(jnp.isfinite(scores)))
    idx = int(index.reshape(()))
    assert 0 <= idx < C

    print("KERNEL_OK")
</pallas_src>

<mosaic_0001>
module attributes {stable_mosaic.version = 11 : i64} {
  func.func @command_scorer_kernel(%arg0: memref<56x1xi32, #tpu.memory_space<vmem>>, %arg1: memref<2x128xf32, #tpu.memory_space<vmem>>, %arg2: memref<128x768xbf16, #tpu.memory_space<vmem>>, %arg3: memref<512x384xbf16, #tpu.memory_space<vmem>>, %arg4: memref<8x384xf32, #tpu.memory_space<vmem>>, %arg5: memref<8x128xf32, #tpu.memory_space<vmem>>) attributes {dimension_semantics = [], scalar_prefetch = 0 : i64, scratch_operands = 0 : i64, tpu.core_type = #tpu.core_type<tc>} {
    %c0 = arith.constant 0 : index
    %c0_0 = arith.constant 0 : index
    %0 = vector.load %arg1[%c0, %c0_0] : memref<2x128xf32, #tpu.memory_space<vmem>>, vector<1x128xf32>
    %c1 = arith.constant 1 : index
    %c0_1 = arith.constant 0 : index
    %1 = vector.load %arg1[%c1, %c0_1] : memref<2x128xf32, #tpu.memory_space<vmem>>, vector<1x1xf32>
    %c256 = arith.constant 256 : index
    %c0_2 = arith.constant 0 : index
    %2 = vector.load %arg3[%c256, %c0_2] : memref<512x384xbf16, #tpu.memory_space<vmem>>, vector<128x384xbf16>
    %3 = arith.truncf %0 : vector<1x128xf32> to vector<1x128xbf16>
    %cst = arith.constant dense<0.000000e+00> : vector<1x384xf32>
    %4 = tpu.matmul %3, %2, %cst {dimension_numbers = #tpu.dot_dimension_numbers<[1], [0], [0], [1], [0, 0, 1, 1], [], []>} : vector<1x128xbf16>, vector<128x384xbf16>, vector<1x384xf32> -> vector<1x384xf32>
    %c0_3 = arith.constant 0 : index
    %c0_4 = arith.constant 0 : index
    %5 = vector.load %arg0[%c0_3, %c0_4] : memref<56x1xi32, #tpu.memory_space<vmem>>, vector<56x1xi32>
    %6 = tpu.iota {dimensions = array<i32: 1>} : vector<56x128xi32>
    %7 = vector.broadcast %5 : vector<56x1xi32> to vector<56x128xi32>
    %8 = arith.cmpi eq, %6, %7 : vector<56x128xi32>
    %9 = arith.extui %8 : vector<56x128xi1> to vector<56x128xi32>
    %10 = arith.sitofp %9 : vector<56x128xi32> to vector<56x128xf32>
    %11 = arith.truncf %10 : vector<56x128xf32> to vector<56x128xbf16>
    %12 = vector.extract_strided_slice %11 {offsets = [0, 0], sizes = [8, 128], strides = [1, 1]} : vector<56x128xbf16> to vector<8x128xbf16>
    %c0_5 = arith.constant 0 : index
    %c0_6 = arith.constant 0 : index
    %13 = vector.load %arg2[%c0_5, %c0_6] : memref<128x768xbf16, #tpu.memory_space<vmem>>, vector<128x384xbf16>
    %cst_7 = arith.constant dense<0.000000e+00> : vector<8x384xf32>
    %14 = tpu.matmul %12, %13, %cst_7 {dimension_numbers = #tpu.dot_dimension_numbers<[1], [0], [0], [1], [0, 0, 1, 1], [], []>} : vector<8x128xbf16>, vector<128x384xbf16>, vector<8x384xf32> -> vector<8x384xf32>
    %15 = vector.extract_strided_slice %11 {offsets = [8, 0], sizes = [48, 128], strides = [1, 1]} : vector<56x128xbf16> to vector<48x128xbf16>
    %c0_8 = arith.constant 0 : index
    %c384 = arith.constant 384 : index
    %16 = vector.load %arg2[%c0_8, %c384] : memref<128x768xbf16, #tpu.memory_space<vmem>>, vector<128x384xbf16>
    %cst_9 = arith.constant dense<0.000000e+00> : vector<48x384xf32>
    %17 = tpu.matmul %15, %16, %cst_9 {dimension_numbers = #tpu.dot_dimension_numbers<[1], [0], [0], [1], [0, 0, 1, 1], [], []>} : vector<48x128xbf16>, vector<128x384xbf16>, vector<48x384xf32> -> vector<48x384xf32>
    %c0_10 = arith.constant 0 : index
    %c0_11 = arith.constant 0 : index
    %18 = vector.load %arg3[%c0_10, %c0_11] : memref<512x384xbf16, #tpu.memory_space<vmem>>, vector<128x384xbf16>
    %c128 = arith.constant 128 : index
    %c0_12 = arith.constant 0 : index
    %19 = vector.load %arg3[%c128, %c0_12] : memref<512x384xbf16, #tpu.memory_space<vmem>>, vector<128x384xbf16>
    %c384_13 = arith.constant 384 : index
    %c0_14 = arith.constant 0 : index
    %20 = vector.load %arg3[%c384_13, %c0_14] : memref<512x384xbf16, #tpu.memory_space<vmem>>, vector<128x384xbf16>
    %c0_15 = arith.constant 0 : index
    %c0_16 = arith.constant 0 : index
    %21 = vector.load %arg4[%c0_15, %c0_16] : memref<8x384xf32, #tpu.memory_space<vmem>>, vector<1x128xf32>
    %c0_17 = arith.constant 0 : index
    %c128_18 = arith.constant 128 : index
    %22 = vector.load %arg4[%c0_17, %c128_18] : memref<8x384xf32, #tpu.memory_space<vmem>>, vector<1x128xf32>
    %c0_19 = arith.constant 0 : index
    %c256_20 = arith.constant 256 : index
    %23 = vector.load %arg4[%c0_19, %c256_20] : memref<8x384xf32, #tpu.memory_space<vmem>>, vector<1x128xf32>
    %c5 = arith.constant 5 : index
    %c0_21 = arith.constant 0 : index
    %24 = vector.load %arg4[%c5, %c0_21] : memref<8x384xf32, #tpu.memory_space<vmem>>, vector<1x384xf32>
    %c1_22 = arith.constant 1 : index
    %c0_23 = arith.constant 0 : index
    %25 = vector.load %arg4[%c1_22, %c0_23] : memref<8x384xf32, #tpu.memory_space<vmem>>, vector<2x128xf32>
    %26 = arith.truncf %25 : vector<2x128xf32> to vector<2x128xbf16>
    %c3 = arith.constant 3 : index
    %c0_24 = arith.constant 0 : index
    %27 = vector.load %arg4[%c3, %c0_24] : memref<8x384xf32, #tpu.memory_space<vmem>>, vector<1x128xf32>
    %28 = arith.truncf %27 : vector<1x128xf32> to vector<1x128xbf16>
    %c4 = arith.constant 4 : index
    %c0_25 = arith.constant 0 : index
    %29 = vector.load %arg4[%c4, %c0_25] : memref<8x384xf32, #tpu.memory_space<vmem>>, vector<1x2xf32>
    %cst_26 = arith.constant 0.000000e+00 : f32
    %30 = vector.broadcast %cst_26 : f32 to vector<1x128xf32>
    %cst_27 = arith.constant 0.000000e+00 : f32
    %31 = vector.broadcast %cst_27 : f32 to vector<8x128xf32>
    %32 = vector.extract_strided_slice %14 {offsets = [0, 0], sizes = [1, 384], strides = [1, 1]} : vector<8x384xf32> to vector<1x384xf32>
    %33 = arith.truncf %30 : vector<1x128xf32> to vector<1x128xbf16>
    %cst_28 = arith.constant dense<0.000000e+00> : vector<1x384xf32>
    %34 = tpu.matmul %33, %18, %cst_28 {dimension_numbers = #tpu.dot_dimension_numbers<[1], [0], [0], [1], [0, 0, 1, 1], [], []>} : vector<1x128xbf16>, vector<128x384xbf16>, vector<1x384xf32> -> vector<1x384xf32>
    %35 = vector.extract_strided_slice %32 {offsets = [0, 0], sizes = [1, 128], strides = [1, 1]} : vector<1x384xf32> to vector<1x128xf32>
    %36 = vector.extract_strided_slice %34 {offsets = [0, 0], sizes = [1, 128], strides = [1, 1]} : vector<1x384xf32> to vector<1x128xf32>
    %37 = arith.addf %35, %36 : vector<1x128xf32>
    %38 = arith.negf %37 : vector<1x128xf32>
    %39 = math.exp %38 : vector<1x128xf32>
    %cst_29 = arith.constant 1.000000e+00 : f32
    %40 = vector.broadcast %cst_29 : f32 to vector<1x128xf32>
    %41 = arith.addf %40, %39 : vector<1x128xf32>
    %42 = arith.divf %40, %41 : vector<1x128xf32>
    %43 = vector.extract_strided_slice %32 {offsets = [0, 128], sizes = [1, 128], strides = [1, 1]} : vector<1x384xf32> to vector<1x128xf32>
    %44 = vector.extract_strided_slice %34 {offsets = [0, 128], sizes = [1, 128], strides = [1, 1]} : vector<1x384xf32> to vector<1x128xf32>
    %45 = arith.addf %43, %44 : vector<1x128xf32>
    %46 = arith.negf %45 : vector<1x128xf32>
    %47 = math.exp %46 : vector<1x128xf32>
    %cst_30 = arith.constant 1.000000e+00 : f32
    %48 = vector.broadcast %cst_30 : f32 to vector<1x128xf32>
    %49 = arith.addf %48, %47 : vector<1x128xf32>
    %50 = arith.divf %48, %49 : vector<1x128xf32>
    %51 = vector.extract_strided_slice %32 {offsets = [0, 256], sizes = [1, 128], strides = [1, 1]} : vector<1x384xf32> to vector<1x128xf32>
    %52 = vector.extract_strided_slice %34 {offsets = [0, 256], sizes = [1, 128], strides = [1, 1]} : vector<1x384xf32> to vector<1x128xf32>
    %53 = arith.addf %52, %21 : vector<1x128xf32>
    %54 = arith.mulf %42, %53 : vector<1x128xf32>
    %55 = arith.addf %51, %54 : vector<1x128xf32>
    %56 = math.tanh %55 : vector<1x128xf32>
    %cst_31 = arith.constant 1.000000e+00 : f32
    %57 = vector.broadcast %cst_31 : f32 to vector<1x128xf32>
    %58 = arith.subf %57, %50 : vector<1x128xf32>
    %59 = arith.mulf %58, %56 : vector<1x128xf32>
    %60 = arith.mulf %50, %30 : vector<1x128xf32>
    %61 = arith.addf %59, %60 : vector<1x128xf32>
    %62 = vector.extract_strided_slice %17 {offsets = [0, 0], sizes = [8, 384], strides = [1, 1]} : vector<48x384xf32> to vector<8x384xf32>
    %63 = arith.truncf %31 : vector<8x128xf32> to vector<8x128xbf16>
    %cst_32 = arith.constant dense<0.000000e+00> : vector<8x384xf32>
    %64 = tpu.matmul %63, %19, %cst_32 {dimension_numbers = #tpu.dot_dimension_numbers<[1], [0], [0], [1], [0, 0, 1, 1], [], []>} : vector<8x128xbf16>, vector<128x384xbf16>, vector<8x384xf32> -> vector<8x384xf32>
    %65 = vector.extract_strided_slice %62 {offsets = [0, 0], sizes = [8, 128], strides = [1, 1]} : vector<8x384xf32> to vector<8x128xf32>
    %66 = vector.extract_strided_slice %64 {offsets = [0, 0], sizes = [8, 128], strides = [1, 1]} : vector<8x384xf32> to vector<8x128xf32>
    %67 = arith.addf %65, %66 : vector<8x128xf32>
    %68 = arith.negf %67 : vector<8x128xf32>
    %69 = math.exp %68 : vector<8x128xf32>
    %cst_33 = arith.constant 1.000000e+00 : f32
    %70 = vector.broadcast %cst_33 : f32 to vector<8x128xf32>
    %71 = arith.addf %70, %69 : vector<8x128xf32>
    %72 = arith.divf %70, %71 : vector<8x128xf32>
    %73 = vector.extract_strided_slice %62 {offsets = [0, 128], sizes = [8, 128], strides = [1, 1]} : vector<8x384xf32> to vector<8x128xf32>
    %74 = vector.extract_strided_slice %64 {offsets = [0, 128], sizes = [8, 128], strides = [1, 1]} : vector<8x384xf32> to vector<8x128xf32>
    %75 = arith.addf %73, %74 : vector<8x128xf32>
    %76 = arith.negf %75 : vector<8x128xf32>
    %77 = math.exp %76 : vector<8x128xf32>
    %cst_34 = arith.constant 1.000000e+00 : f32
    %78 = vector.broadcast %cst_34 : f32 to vector<8x128xf32>
    %79 = arith.addf %78, %77 : vector<8x128xf32>
    %80 = arith.divf %78, %79 : vector<8x128xf32>
    %81 = vector.extract_strided_slice %62 {offsets = [0, 256], sizes = [8, 128], strides = [1, 1]} : vector<8x384xf32> to vector<8x128xf32>
    %82 = vector.extract_strided_slice %64 {offsets = [0, 256], sizes = [8, 128], strides = [1, 1]} : vector<8x384xf32> to vector<8x128xf32>
    %83 = vector.broadcast %22 : vector<1x128xf32> to vector<8x128xf32>
    %84 = arith.addf %82, %83 : vector<8x128xf32>
    %85 = arith.mulf %72, %84 : vector<8x128xf32>
    %86 = arith.addf %81, %85 : vector<8x128xf32>
    %87 = math.tanh %86 : vector<8x128xf32>
    %cst_35 = arith.constant 1.000000e+00 : f32
    %88 = vector.broadcast %cst_35 : f32 to vector<8x128xf32>
    %89 = arith.subf %88, %80 : vector<8x128xf32>
    %90 = arith.mulf %89, %87 : vector<8x128xf32>
    %91 = arith.mulf %80, %31 : vector<8x128xf32>
    %92 = arith.addf %90, %91 : vector<8x128xf32>
    %93 = vector.extract_strided_slice %14 {offsets = [1, 0], sizes = [1, 384], strides = [1, 1]} : vector<8x384xf32> to vector<1x384xf32>
    %94 = arith.truncf %61 : vector<1x128xf32> to vector<1x128xbf16>
    %cst_36 = arith.constant dense<0.000000e+00> : vector<1x384xf32>
    %95 = tpu.matmul %94, %18, %cst_36 {dimension_numbers = #tpu.dot_dimension_numbers<[1], [0], [0], [1], [0, 0, 1, 1], [], []>} : vector<1x128xbf16>, vector<128x384xbf16>, vector<1x384xf32> -> vector<1x384xf32>
    %96 = vector.extract_strided_slice %93 {offsets = [0, 0], sizes = [1, 128], strides = [1, 1]} : vector<1x384xf32> to vector<1x128xf32>
    %97 = vector.extract_strided_slice %95 {offsets = [0, 0], sizes = [1, 128], strides = [1, 1]} : vector<1x384xf32> to vector<1x128xf32>
    %98 = arith.addf %96, %97 : vector<1x128xf32>
    %99 = arith.negf %98 : vector<1x128xf32>
    %100 = math.exp %99 : vector<1x128xf32>
    %cst_37 = arith.constant 1.000000e+00 : f32
    %101 = vector.broadcast %cst_37 : f32 to vector<1x128xf32>
    %102 = arith.addf %101, %100 : vector<1x128xf32>
    %103 = arith.divf %101, %102 : vector<1x128xf32>
    %104 = vector.extract_strided_slice %93 {offsets = [0, 128], sizes = [1, 128], strides = [1, 1]} : vector<1x384xf32> to vector<1x128xf32>
    %105 = vector.extract_strided_slice %95 {offsets = [0, 128], sizes = [1, 128], strides = [1, 1]} : vector<1x384xf32> to vector<1x128xf32>
    %106 = arith.addf %104, %105 : vector<1x128xf32>
    %107 = arith.negf %106 : vector<1x128xf32>
    %108 = math.exp %107 : vector<1x128xf32>
    %cst_38 = arith.constant 1.000000e+00 : f32
    %109 = vector.broadcast %cst_38 : f32 to vector<1x128xf32>
    %110 = arith.addf %109, %108 : vector<1x128xf32>
    %111 = arith.divf %109, %110 : vector<1x128xf32>
    %112 = vector.extract_strided_slice %93 {offsets = [0, 256], sizes = [1, 128], strides = [1, 1]} : vector<1x384xf32> to vector<1x128xf32>
    %113 = vector.extract_strided_slice %95 {offsets = [0, 256], sizes = [1, 128], strides = [1, 1]} : vector<1x384xf32> to vector<1x128xf32>
    %114 = arith.addf %113, %21 : vector<1x128xf32>
    %115 = arith.mulf %103, %114 : vector<1x128xf32>
    %116 = arith.addf %112, %115 : vector<1x128xf32>
    %117 = math.tanh %116 : vector<1x128xf32>
    %cst_39 = arith.constant 1.000000e+00 : f32
    %118 = vector.broadcast %cst_39 : f32 to vector<1x128xf32>
    %119 = arith.subf %118, %111 : vector<1x128xf32>
    %120 = arith.mulf %119, %117 : vector<1x128xf32>
    %121 = arith.mulf %111, %61 : vector<1x128xf32>
    %122 = arith.addf %120, %121 : vector<1x128xf32>
    %123 = vector.extract_strided_slice %17 {offsets = [8, 0], sizes = [8, 384], strides = [1, 1]} : vector<48x384xf32> to vector<8x384xf32>
    %124 = arith.truncf %92 : vector<8x128xf32> to vector<8x128xbf16>
    %cst_40 = arith.constant dense<0.000000e+00> : vector<8x384xf32>
    %125 = tpu.matmul %124, %19, %cst_40 {dimension_numbers = #tpu.dot_dimension_numbers<[1], [0], [0], [1], [0, 0, 1, 1], [], []>} : vector<8x128xbf16>, vector<128x384xbf16>, vector<8x384xf32> -> vector<8x384xf32>
    %126 = vector.extract_strided_slice %123 {offsets = [0, 0], sizes = [8, 128], strides = [1, 1]} : vector<8x384xf32> to vector<8x128xf32>
    %127 = vector.extract_strided_slice %125 {offsets = [0, 0], sizes = [8, 128], strides = [1, 1]} : vector<8x384xf32> to vector<8x128xf32>
    %128 = arith.addf %126, %127 : vector<8x128xf32>
    %129 = arith.negf %128 : vector<8x128xf32>
    %130 = math.exp %129 : vector<8x128xf32>
    %cst_41 = arith.constant 1.000000e+00 : f32
    %131 = vector.broadcast %cst_41 : f32 to vector<8x128xf32>
    %132 = arith.addf %131, %130 : vector<8x128xf32>
    %133 = arith.divf %131, %132 : vector<8x128xf32>
    %134 = vector.extract_strided_slice %123 {offsets = [0, 128], sizes = [8, 128], strides = [1, 1]} : vector<8x384xf32> to vector<8x128xf32>
    %135 = vector.extract_strided_slice %125 {offsets = [0, 128], sizes = [8, 128], strides = [1, 1]} : vector<8x384xf32> to vector<8x128xf32>
    %136 = arith.addf %134, %135 : vector<8x128xf32>
    %137 = arith.negf %136 : vector<8x128xf32>
    %138 = math.exp %137 : vector<8x128xf32>
    %cst_42 = arith.constant 1.000000e+00 : f32
    %139 = vector.broadcast %cst_42 : f32 to vector<8x128xf32>
    %140 = arith.addf %139, %138 : vector<8x128xf32>
    %141 = arith.divf %139, %140 : vector<8x128xf32>
    %142 = vector.extract_strided_slice %123 {offsets = [0, 256], sizes = [8, 128], strides = [1, 1]} : vector<8x384xf32> to vector<8x128xf32>
    %143 = vector.extract_strided_slice %125 {offsets = [0, 256], sizes = [8, 128], strides = [1, 1]} : vector<8x384xf32> to vector<8x128xf32>
    %144 = vector.broadcast %22 : vector<1x128xf32> to vector<8x128xf32>
    %145 = arith.addf %143, %144 : vector<8x128xf32>
    %146 = arith.mulf %133, %145 : vector<8x128xf32>
    %147 = arith.addf %142, %146 : vector<8x128xf32>
    %148 = math.tanh %147 : vector<8x128xf32>
    %cst_43 = arith.constant 1.000000e+00 : f32
    %149 = vector.broadcast %cst_43 : f32 to vector<8x128xf32>
    %150 = arith.subf %149, %141 : vector<8x128xf32>
    %151 = arith.mulf %150, %148 : vector<8x128xf32>
    %152 = arith.mulf %141, %92 : vector<8x128xf32>
    %153 = arith.addf %151, %152 : vector<8x128xf32>
    %154 = vector.extract_strided_slice %14 {offsets = [2, 0], sizes = [1, 384], strides = [1, 1]} : vector<8x384xf32> to vector<1x384xf32>
    %155 = arith.truncf %122 : vector<1x128xf32> to vector<1x128xbf16>
    %cst_44 = arith.constant dense<0.000000e+00> : vector<1x384xf32>
    %156 = tpu.matmul %155, %18, %cst_44 {dimension_numbers = #tpu.dot_dimension_numbers<[1], [0], [0], [1], [0, 0, 1, 1], [], []>} : vector<1x128xbf16>, vector<128x384xbf16>, vector<1x384xf32> -> vector<1x384xf32>
    %157 = vector.extract_strided_slice %154 {offsets = [0, 0], sizes = [1, 128], strides = [1, 1]} : vector<1x384xf32> to vector<1x128xf32>
    %158 = vector.extract_strided_slice %156 {offsets = [0, 0], sizes = [1, 128], strides = [1, 1]} : vector<1x384xf32> to vector<1x128xf32>
    %159 = arith.addf %157, %158 : vector<1x128xf32>
    %160 = arith.negf %159 : vector<1x128xf32>
    %161 = math.exp %160 : vector<1x128xf32>
    %cst_45 = arith.constant 1.000000e+00 : f32
    %162 = vector.broadcast %cst_45 : f32 to vector<1x128xf32>
    %163 = arith.addf %162, %161 : vector<1x128xf32>
    %164 = arith.divf %162, %163 : vector<1x128xf32>
    %165 = vector.extract_strided_slice %154 {offsets = [0, 128], sizes = [1, 128], strides = [1, 1]} : vector<1x384xf32> to vector<1x128xf32>
    %166 = vector.extract_strided_slice %156 {offsets = [0, 128], sizes = [1, 128], strides = [1, 1]} : vector<1x384xf32> to vector<1x128xf32>
    %167 = arith.addf %165, %166 : vector<1x128xf32>
    %168 = arith.negf %167 : vector<1x128xf32>
    %169 = math.exp %168 : vector<1x128xf32>
    %cst_46 = arith.constant 1.000000e+00 : f32
    %170 = vector.broadcast %cst_46 : f32 to vector<1x128xf32>
    %171 = arith.addf %170, %169 : vector<1x128xf32>
    %172 = arith.divf %170, %171 : vector<1x128xf32>
    %173 = vector.extract_strided_slice %154 {offsets = [0, 256], sizes = [1, 128], strides = [1, 1]} : vector<1x384xf32> to vector<1x128xf32>
    %174 = vector.extract_strided_slice %156 {offsets = [0, 256], sizes = [1, 128], strides = [1, 1]} : vector<1x384xf32> to vector<1x128xf32>
    %175 = arith.addf %174, %21 : vector<1x128xf32>
    %176 = arith.mulf %164, %175 : vector<1x128xf32>
    %177 = arith.addf %173, %176 : vector<1x128xf32>
    %178 = math.tanh %177 : vector<1x128xf32>
    %cst_47 = arith.constant 1.000000e+00 : f32
    %179 = vector.broadcast %cst_47 : f32 to vector<1x128xf32>
    %180 = arith.subf %179, %172 : vector<1x128xf32>
    %181 = arith.mulf %180, %178 : vector<1x128xf32>
    %182 = arith.mulf %172, %122 : vector<1x128xf32>
    %183 = arith.addf %181, %182 : vector<1x128xf32>
    %184 = vector.extract_strided_slice %17 {offsets = [16, 0], sizes = [8, 384], strides = [1, 1]} : vector<48x384xf32> to vector<8x384xf32>
    %185 = arith.truncf %153 : vector<8x128xf32> to vector<8x128xbf16>
    %cst_48 = arith.constant dense<0.000000e+00> : vector<8x384xf32>
    %186 = tpu.matmul %185, %19, %cst_48 {dimension_numbers = #tpu.dot_dimension_numbers<[1], [0], [0], [1], [0, 0, 1, 1], [], []>} : vector<8x128xbf16>, vector<128x384xbf16>, vector<8x384xf32> -> vector<8x384xf32>
    %187 = vector.extract_strided_slice %184 {offsets = [0, 0], sizes = [8, 128], strides = [1, 1]} : vector<8x384xf32> to vector<8x128xf32>
    %188 = vector.extract_strided_slice %186 {offsets = [0, 0], sizes = [8, 128], strides = [1, 1]} : vector<8x384xf32> to vector<8x128xf32>
    %189 = arith.addf %187, %188 : vector<8x128xf32>
    %190 = arith.negf %189 : vector<8x128xf32>
    %191 = math.exp %190 : vector<8x128xf32>
    %cst_49 = arith.constant 1.000000e+00 : f32
    %192 = vector.broadcast %cst_49 : f32 to vector<8x128xf32>
    %193 = arith.addf %192, %191 : vector<8x128xf32>
    %194 = arith.divf %192, %193 : vector<8x128xf32>
    %195 = vector.extract_strided_slice %184 {offsets = [0, 128], sizes = [8, 128], strides = [1, 1]} : vector<8x384xf32> to vector<8x128xf32>
    %196 = vector.extract_strided_slice %186 {offsets = [0, 128], sizes = [8, 128], strides = [1, 1]} : vector<8x384xf32> to vector<8x128xf32>
    %197 = arith.addf %195, %196 : vector<8x128xf32>
    %198 = arith.negf %197 : vector<8x128xf32>
    %199 = math.exp %198 : vector<8x128xf32>
    %cst_50 = arith.constant 1.000000e+00 : f32
    %200 = vector.broadcast %cst_50 : f32 to vector<8x128xf32>
    %201 = arith.addf %200, %199 : vector<8x128xf32>
    %202 = arith.divf %200, %201 : vector<8x128xf32>
    %203 = vector.extract_strided_slice %184 {offsets = [0, 256], sizes = [8, 128], strides = [1, 1]} : vector<8x384xf32> to vector<8x128xf32>
    %204 = vector.extract_strided_slice %186 {offsets = [0, 256], sizes = [8, 128], strides = [1, 1]} : vector<8x384xf32> to vector<8x128xf32>
    %205 = vector.broadcast %22 : vector<1x128xf32> to vector<8x128xf32>
    %206 = arith.addf %204, %205 : vector<8x128xf32>
    %207 = arith.mulf %194, %206 : vector<8x128xf32>
    %208 = arith.addf %203, %207 : vector<8x128xf32>
    %209 = math.tanh %208 : vector<8x128xf32>
    %cst_51 = arith.constant 1.000000e+00 : f32
    %210 = vector.broadcast %cst_51 : f32 to vector<8x128xf32>
    %211 = arith.subf %210, %202 : vector<8x128xf32>
    %212 = arith.mulf %211, %209 : vector<8x128xf32>
    %213 = arith.mulf %202, %153 : vector<8x128xf32>
    %214 = arith.addf %212, %213 : vector<8x128xf32>
    %215 = vector.extract_strided_slice %14 {offsets = [3, 0], sizes = [1, 384], strides = [1, 1]} : vector<8x384xf32> to vector<1x384xf32>
    %216 = arith.truncf %183 : vector<1x128xf32> to vector<1x128xbf16>
    %cst_52 = arith.constant dense<0.000000e+00> : vector<1x384xf32>
    %217 = tpu.matmul %216, %18, %cst_52 {dimension_numbers = #tpu.dot_dimension_numbers<[1], [0], [0], [1], [0, 0, 1, 1], [], []>} : vector<1x128xbf16>, vector<128x384xbf16>, vector<1x384xf32> -> vector<1x384xf32>
    %218 = vector.extract_strided_slice %215 {offsets = [0, 0], sizes = [1, 128], strides = [1, 1]} : vector<1x384xf32> to vector<1x128xf32>
    %219 = vector.extract_strided_slice %217 {offsets = [0, 0], sizes = [1, 128], strides = [1, 1]} : vector<1x384xf32> to vector<1x128xf32>
    %220 = arith.addf %218, %219 : vector<1x128xf32>
    %221 = arith.negf %220 : vector<1x128xf32>
    %222 = math.exp %221 : vector<1x128xf32>
    %cst_53 = arith.constant 1.000000e+00 : f32
    %223 = vector.broadcast %cst_53 : f32 to vector<1x128xf32>
    %224 = arith.addf %223, %222 : vector<1x128xf32>
    %225 = arith.divf %223, %224 : vector<1x128xf32>
    %226 = vector.extract_strided_slice %215 {offsets = [0, 128], sizes = [1, 128], strides = [1, 1]} : vector<1x384xf32> to vector<1x128xf32>
    %227 = vector.extract_strided_slice %217 {offsets = [0, 128], sizes = [1, 128], strides = [1, 1]} : vector<1x384xf32> to vector<1x128xf32>
    %228 = arith.addf %226, %227 : vector<1x128xf32>
    %229 = arith.negf %228 : vector<1x128xf32>
    %230 = math.exp %229 : vector<1x128xf32>
    %cst_54 = arith.constant 1.000000e+00 : f32
    %231 = vector.broadcast %cst_54 : f32 to vector<1x128xf32>
    %232 = arith.addf %231, %230 : vector<1x128xf32>
    %233 = arith.divf %231, %232 : vector<1x128xf32>
    %234 = vector.extract_strided_slice %215 {offsets = [0, 256], sizes = [1, 128], strides = [1, 1]} : vector<1x384xf32> to vector<1x128xf32>
    %235 = vector.extract_strided_slice %217 {offsets = [0, 256], sizes = [1, 128], strides = [1, 1]} : vector<1x384xf32> to vector<1x128xf32>
    %236 = arith.addf %235, %21 : vector<1x128xf32>
    %237 = arith.mulf %225, %236 : vector<1x128xf32>
    %238 = arith.addf %234, %237 : vector<1x128xf32>
    %239 = math.tanh %238 : vector<1x128xf32>
    %cst_55 = arith.constant 1.000000e+00 : f32
    %240 = vector.broadcast %cst_55 : f32 to vector<1x128xf32>
    %241 = arith.subf %240, %233 : vector<1x128xf32>
    %242 = arith.mulf %241, %239 : vector<1x128xf32>
    %243 = arith.mulf %233, %183 : vector<1x128xf32>
    %244 = arith.addf %242, %243 : vector<1x128xf32>
    %245 = vector.extract_strided_slice %17 {offsets = [24, 0], sizes = [8, 384], strides = [1, 1]} : vector<48x384xf32> to vector<8x384xf32>
    %246 = arith.truncf %214 : vector<8x128xf32> to vector<8x128xbf16>
    %cst_56 = arith.constant dense<0.000000e+00> : vector<8x384xf32>
    %247 = tpu.matmul %246, %19, %cst_56 {dimension_numbers = #tpu.dot_dimension_numbers<[1], [0], [0], [1], [0, 0, 1, 1], [], []>} : vector<8x128xbf16>, vector<128x384xbf16>, vector<8x384xf32> -> vector<8x384xf32>
    %248 = vector.extract_strided_slice %245 {offsets = [0, 0], sizes = [8, 128], strides = [1, 1]} : vector<8x384xf32> to vector<8x128xf32>
    %249 = vector.extract_strided_slice %247 {offsets = [0, 0], sizes = [8, 128], strides = [1, 1]} : vector<8x384xf32> to vector<8x128xf32>
    %250 = arith.addf %248, %249 : vector<8x128xf32>
    %251 = arith.negf %250 : vector<8x128xf32>
    %252 = math.exp %251 : vector<8x128xf32>
    %cst_57 = arith.constant 1.000000e+00 : f32
    %253 = vector.broadcast %cst_57 : f32 to vector<8x128xf32>
    %254 = arith.addf %253, %252 : vector<8x128xf32>
    %255 = arith.divf %253, %254 : vector<8x128xf32>
    %256 = vector.extract_strided_slice %245 {offsets = [0, 128], sizes = [8, 128], strides = [1, 1]} : vector<8x384xf32> to vector<8x128xf32>
    %257 = vector.extract_strided_slice %247 {offsets = [0, 128], sizes = [8, 128], strides = [1, 1]} : vector<8x384xf32> to vector<8x128xf32>
    %258 = arith.addf %256, %257 : vector<8x128xf32>
    %259 = arith.negf %258 : vector<8x128xf32>
    %260 = math.exp %259 : vector<8x128xf32>
    %cst_58 = arith.constant 1.000000e+00 : f32
    %261 = vector.broadcast %cst_58 : f32 to vector<8x128xf32>
    %262 = arith.addf %261, %260 : vector<8x128xf32>
    %263 = arith.divf %261, %262 : vector<8x128xf32>
    %264 = vector.extract_strided_slice %245 {offsets = [0, 256], sizes = [8, 128], strides = [1, 1]} : vector<8x384xf32> to vector<8x128xf32>
    %265 = vector.extract_strided_slice %247 {offsets = [0, 256], sizes = [8, 128], strides = [1, 1]} : vector<8x384xf32> to vector<8x128xf32>
    %266 = vector.broadcast %22 : vector<1x128xf32> to vector<8x128xf32>
    %267 = arith.addf %265, %266 : vector<8x128xf32>
    %268 = arith.mulf %255, %267 : vector<8x128xf32>
    %269 = arith.addf %264, %268 : vector<8x128xf32>
    %270 = math.tanh %269 : vector<8x128xf32>
    %cst_59 = arith.constant 1.000000e+00 : f32
    %271 = vector.broadcast %cst_59 : f32 to vector<8x128xf32>
    %272 = arith.subf %271, %263 : vector<8x128xf32>
    %273 = arith.mulf %272, %270 : vector<8x128xf32>
    %274 = arith.mulf %263, %214 : vector<8x128xf32>
    %275 = arith.addf %273, %274 : vector<8x128xf32>
    %276 = vector.extract_strided_slice %14 {offsets = [4, 0], sizes = [1, 384], strides = [1, 1]} : vector<8x384xf32> to vector<1x384xf32>
    %277 = arith.truncf %244 : vector<1x128xf32> to vector<1x128xbf16>
    %cst_60 = arith.constant dense<0.000000e+00> : vector<1x384xf32>
    %278 = tpu.matmul %277, %18, %cst_60 {dimension_numbers = #tpu.dot_dimension_numbers<[1], [0], [0], [1], [0, 0, 1, 1], [], []>} : vector<1x128xbf16>, vector<128x384xbf16>, vector<1x384xf32> -> vector<1x384xf32>
    %279 = vector.extract_strided_slice %276 {offsets = [0, 0], sizes = [1, 128], strides = [1, 1]} : vector<1x384xf32> to vector<1x128xf32>
    %280 = vector.extract_strided_slice %278 {offsets = [0, 0], sizes = [1, 128], strides = [1, 1]} : vector<1x384xf32> to vector<1x128xf32>
    %281 = arith.addf %279, %280 : vector<1x128xf32>
    %282 = arith.negf %281 : vector<1x128xf32>
    %283 = math.exp %282 : vector<1x128xf32>
    %cst_61 = arith.constant 1.000000e+00 : f32
    %284 = vector.broadcast %cst_61 : f32 to vector<1x128xf32>
    %285 = arith.addf %284, %283 : vector<1x128xf32>
    %286 = arith.divf %284, %285 : vector<1x128xf32>
    %287 = vector.extract_strided_slice %276 {offsets = [0, 128], sizes = [1, 128], strides = [1, 1]} : vector<1x384xf32> to vector<1x128xf32>
    %288 = vector.extract_strided_slice %278 {offsets = [0, 128], sizes = [1, 128], strides = [1, 1]} : vector<1x384xf32> to vector<1x128xf32>
    %289 = arith.addf %287, %288 : vector<1x128xf32>
    %290 = arith.negf %289 : vector<1x128xf32>
    %291 = math.exp %290 : vector<1x128xf32>
    %cst_62 = arith.constant 1.000000e+00 : f32
    %292 = vector.broadcast %cst_62 : f32 to vector<1x128xf32>
    %293 = arith.addf %292, %291 : vector<1x128xf32>
    %294 = arith.divf %292, %293 : vector<1x128xf32>
    %295 = vector.extract_strided_slice %276 {offsets = [0, 256], sizes = [1, 128], strides = [1, 1]} : vector<1x384xf32> to vector<1x128xf32>
    %296 = vector.extract_strided_slice %278 {offsets = [0, 256], sizes = [1, 128], strides = [1, 1]} : vector<1x384xf32> to vector<1x128xf32>
    %297 = arith.addf %296, %21 : vector<1x128xf32>
    %298 = arith.mulf %286, %297 : vector<1x128xf32>
    %299 = arith.addf %295, %298 : vector<1x128xf32>
    %300 = math.tanh %299 : vector<1x128xf32>
    %cst_63 = arith.constant 1.000000e+00 : f32
    %301 = vector.broadcast %cst_63 : f32 to vector<1x128xf32>
    %302 = arith.subf %301, %294 : vector<1x128xf32>
    %303 = arith.mulf %302, %300 : vector<1x128xf32>
    %304 = arith.mulf %294, %244 : vector<1x128xf32>
    %305 = arith.addf %303, %304 : vector<1x128xf32>
    %306 = vector.extract_strided_slice %17 {offsets = [32, 0], sizes = [8, 384], strides = [1, 1]} : vector<48x384xf32> to vector<8x384xf32>
    %307 = arith.truncf %275 : vector<8x128xf32> to vector<8x128xbf16>
    %cst_64 = arith.constant dense<0.000000e+00> : vector<8x384xf32>
    %308 = tpu.matmul %307, %19, %cst_64 {dimension_numbers = #tpu.dot_dimension_numbers<[1], [0], [0], [1], [0, 0, 1, 1], [], []>} : vector<8x128xbf16>, vector<128x384xbf16>, vector<8x384xf32> -> vector<8x384xf32>
    %309 = vector.extract_strided_slice %306 {offsets = [0, 0], sizes = [8, 128], strides = [1, 1]} : vector<8x384xf32> to vector<8x128xf32>
    %310 = vector.extract_strided_slice %308 {offsets = [0, 0], sizes = [8, 128], strides = [1, 1]} : vector<8x384xf32> to vector<8x128xf32>
    %311 = arith.addf %309, %310 : vector<8x128xf32>
    %312 = arith.negf %311 : vector<8x128xf32>
    %313 = math.exp %312 : vector<8x128xf32>
    %cst_65 = arith.constant 1.000000e+00 : f32
    %314 = vector.broadcast %cst_65 : f32 to vector<8x128xf32>
    %315 = arith.addf %314, %313 : vector<8x128xf32>
    %316 = arith.divf %314, %315 : vector<8x128xf32>
    %317 = vector.extract_strided_slice %306 {offsets = [0, 128], sizes = [8, 128], strides = [1, 1]} : vector<8x384xf32> to vector<8x128xf32>
    %318 = vector.extract_strided_slice %308 {offsets = [0, 128], sizes = [8, 128], strides = [1, 1]} : vector<8x384xf32> to vector<8x128xf32>
    %319 = arith.addf %317, %318 : vector<8x128xf32>
    %320 = arith.negf %319 : vector<8x128xf32>
    %321 = math.exp %320 : vector<8x128xf32>
    %cst_66 = arith.constant 1.000000e+00 : f32
    %322 = vector.broadcast %cst_66 : f32 to vector<8x128xf32>
    %323 = arith.addf %322, %321 : vector<8x128xf32>
    %324 = arith.divf %322, %323 : vector<8x128xf32>
    %325 = vector.extract_strided_slice %306 {offsets = [0, 256], sizes = [8, 128], strides = [1, 1]} : vector<8x384xf32> to vector<8x128xf32>
    %326 = vector.extract_strided_slice %308 {offsets = [0, 256], sizes = [8, 128], strides = [1, 1]} : vector<8x384xf32> to vector<8x128xf32>
    %327 = vector.broadcast %22 : vector<1x128xf32> to vector<8x128xf32>
    %328 = arith.addf %326, %327 : vector<8x128xf32>
    %329 = arith.mulf %316, %328 : vector<8x128xf32>
    %330 = arith.addf %325, %329 : vector<8x128xf32>
    %331 = math.tanh %330 : vector<8x128xf32>
    %cst_67 = arith.constant 1.000000e+00 : f32
    %332 = vector.broadcast %cst_67 : f32 to vector<8x128xf32>
    %333 = arith.subf %332, %324 : vector<8x128xf32>
    %334 = arith.mulf %333, %331 : vector<8x128xf32>
    %335 = arith.mulf %324, %275 : vector<8x128xf32>
    %336 = arith.addf %334, %335 : vector<8x128xf32>
    %337 = vector.extract_strided_slice %14 {offsets = [5, 0], sizes = [1, 384], strides = [1, 1]} : vector<8x384xf32> to vector<1x384xf32>
    %338 = arith.truncf %305 : vector<1x128xf32> to vector<1x128xbf16>
    %cst_68 = arith.constant dense<0.000000e+00> : vector<1x384xf32>
    %339 = tpu.matmul %338, %18, %cst_68 {dimension_numbers = #tpu.dot_dimension_numbers<[1], [0], [0], [1], [0, 0, 1, 1], [], []>} : vector<1x128xbf16>, vector<128x384xbf16>, vector<1x384xf32> -> vector<1x384xf32>
    %340 = vector.extract_strided_slice %337 {offsets = [0, 0], sizes = [1, 128], strides = [1, 1]} : vector<1x384xf32> to vector<1x128xf32>
    %341 = vector.extract_strided_slice %339 {offsets = [0, 0], sizes = [1, 128], strides = [1, 1]} : vector<1x384xf32> to vector<1x128xf32>
    %342 = arith.addf %340, %341 : vector<1x128xf32>
    %343 = arith.negf %342 : vector<1x128xf32>
    %344 = math.exp %343 : vector<1x128xf32>
    %cst_69 = arith.constant 1.000000e+00 : f32
    %345 = vector.broadcast %cst_69 : f32 to vector<1x128xf32>
    %346 = arith.addf %345, %344 : vector<1x128xf32>
    %347 = arith.divf %345, %346 : vector<1x128xf32>
    %348 = vector.extract_strided_slice %337 {offsets = [0, 128], sizes = [1, 128], strides = [1, 1]} : vector<1x384xf32> to vector<1x128xf32>
    %349 = vector.extract_strided_slice %339 {offsets = [0, 128], sizes = [1, 128], strides = [1, 1]} : vector<1x384xf32> to vector<1x128xf32>
    %350 = arith.addf %348, %349 : vector<1x128xf32>
    %351 = arith.negf %350 : vector<1x128xf32>
    %352 = math.exp %351 : vector<1x128xf32>
    %cst_70 = arith.constant 1.000000e+00 : f32
    %353 = vector.broadcast %cst_70 : f32 to vector<1x128xf32>
    %354 = arith.addf %353, %352 : vector<1x128xf32>
    %355 = arith.divf %353, %354 : vector<1x128xf32>
    %356 = vector.extract_strided_slice %337 {offsets = [0, 256], sizes = [1, 128], strides = [1, 1]} : vector<1x384xf32> to vector<1x128xf32>
    %357 = vector.extract_strided_slice %339 {offsets = [0, 256], sizes = [1, 128], strides = [1, 1]} : vector<1x384xf32> to vector<1x128xf32>
    %358 = arith.addf %357, %21 : vector<1x128xf32>
    %359 = arith.mulf %347, %358 : vector<1x128xf32>
    %360 = arith.addf %356, %359 : vector<1x128xf32>
    %361 = math.tanh %360 : vector<1x128xf32>
    %cst_71 = arith.constant 1.000000e+00 : f32
    %362 = vector.broadcast %cst_71 : f32 to vector<1x128xf32>
    %363 = arith.subf %362, %355 : vector<1x128xf32>
    %364 = arith.mulf %363, %361 : vector<1x128xf32>
    %365 = arith.mulf %355, %305 : vector<1x128xf32>
    %366 = arith.addf %364, %365 : vector<1x128xf32>
    %367 = vector.extract_strided_slice %17 {offsets = [40, 0], sizes = [8, 384], strides = [1, 1]} : vector<48x384xf32> to vector<8x384xf32>
    %368 = arith.truncf %336 : vector<8x128xf32> to vector<8x128xbf16>
    %cst_72 = arith.constant dense<0.000000e+00> : vector<8x384xf32>
    %369 = tpu.matmul %368, %19, %cst_72 {dimension_numbers = #tpu.dot_dimension_numbers<[1], [0], [0], [1], [0, 0, 1, 1], [], []>} : vector<8x128xbf16>, vector<128x384xbf16>, vector<8x384xf32> -> vector<8x384xf32>
    %370 = vector.extract_strided_slice %367 {offsets = [0, 0], sizes = [8, 128], strides = [1, 1]} : vector<8x384xf32> to vector<8x128xf32>
    %371 = vector.extract_strided_slice %369 {offsets = [0, 0], sizes = [8, 128], strides = [1, 1]} : vector<8x384xf32> to vector<8x128xf32>
    %372 = arith.addf %370, %371 : vector<8x128xf32>
    %373 = arith.negf %372 : vector<8x128xf32>
    %374 = math.exp %373 : vector<8x128xf32>
    %cst_73 = arith.constant 1.000000e+00 : f32
    %375 = vector.broadcast %cst_73 : f32 to vector<8x128xf32>
    %376 = arith.addf %375, %374 : vector<8x128xf32>
    %377 = arith.divf %375, %376 : vector<8x128xf32>
    %378 = vector.extract_strided_slice %367 {offsets = [0, 128], sizes = [8, 128], strides = [1, 1]} : vector<8x384xf32> to vector<8x128xf32>
    %379 = vector.extract_strided_slice %369 {offsets = [0, 128], sizes = [8, 128], strides = [1, 1]} : vector<8x384xf32> to vector<8x128xf32>
    %380 = arith.addf %378, %379 : vector<8x128xf32>
    %381 = arith.negf %380 : vector<8x128xf32>
    %382 = math.exp %381 : vector<8x128xf32>
    %cst_74 = arith.constant 1.000000e+00 : f32
    %383 = vector.broadcast %cst_74 : f32 to vector<8x128xf32>
    %384 = arith.addf %383, %382 : vector<8x128xf32>
    %385 = arith.divf %383, %384 : vector<8x128xf32>
    %386 = vector.extract_strided_slice %367 {offsets = [0, 256], sizes = [8, 128], strides = [1, 1]} : vector<8x384xf32> to vector<8x128xf32>
    %387 = vector.extract_strided_slice %369 {offsets = [0, 256], sizes = [8, 128], strides = [1, 1]} : vector<8x384xf32> to vector<8x128xf32>
    %388 = vector.broadcast %22 : vector<1x128xf32> to vector<8x128xf32>
    %389 = arith.addf %387, %388 : vector<8x128xf32>
    %390 = arith.mulf %377, %389 : vector<8x128xf32>
    %391 = arith.addf %386, %390 : vector<8x128xf32>
    %392 = math.tanh %391 : vector<8x128xf32>
    %cst_75 = arith.constant 1.000000e+00 : f32
    %393 = vector.broadcast %cst_75 : f32 to vector<8x128xf32>
    %394 = arith.subf %393, %385 : vector<8x128xf32>
    %395 = arith.mulf %394, %392 : vector<8x128xf32>
    %396 = arith.mulf %385, %336 : vector<8x128xf32>
    %397 = arith.addf %395, %396 : vector<8x128xf32>
    %cst_76 = arith.constant 0.000000e+00 : f32
    %398 = vector.broadcast %cst_76 : f32 to vector<120x128xf32>
    %399 = tpu.concatenate %397, %398 in 0 : vector<8x128xf32>, vector<120x128xf32> -> vector<128x128xf32>
    %400 = arith.truncf %399 : vector<128x128xf32> to vector<128x128xbf16>
    %cst_77 = arith.constant dense<0.000000e+00> : vector<1x128xf32>
    %401 = tpu.matmul %28, %400, %cst_77 {dimension_numbers = #tpu.dot_dimension_numbers<[1], [1], [0], [0], [0, 0, 1, 0], [], []>} : vector<1x128xbf16>, vector<128x128xbf16>, vector<1x128xf32> -> vector<1x128xf32>
    %402 = vector.extract_strided_slice %14 {offsets = [6, 0], sizes = [1, 384], strides = [1, 1]} : vector<8x384xf32> to vector<1x384xf32>
    %403 = arith.truncf %366 : vector<1x128xf32> to vector<1x128xbf16>
    %cst_78 = arith.constant dense<0.000000e+00> : vector<1x384xf32>
    %404 = tpu.matmul %403, %18, %cst_78 {dimension_numbers = #tpu.dot_dimension_numbers<[1], [0], [0], [1], [0, 0, 1, 1], [], []>} : vector<1x128xbf16>, vector<128x384xbf16>, vector<1x384xf32> -> vector<1x384xf32>
    %405 = vector.extract_strided_slice %402 {offsets = [0, 0], sizes = [1, 128], strides = [1, 1]} : vector<1x384xf32> to vector<1x128xf32>
    %406 = vector.extract_strided_slice %404 {offsets = [0, 0], sizes = [1, 128], strides = [1, 1]} : vector<1x384xf32> to vector<1x128xf32>
    %407 = arith.addf %405, %406 : vector<1x128xf32>
    %408 = arith.negf %407 : vector<1x128xf32>
    %409 = math.exp %408 : vector<1x128xf32>
    %cst_79 = arith.constant 1.000000e+00 : f32
    %410 = vector.broadcast %cst_79 : f32 to vector<1x128xf32>
    %411 = arith.addf %410, %409 : vector<1x128xf32>
    %412 = arith.divf %410, %411 : vector<1x128xf32>
    %413 = vector.extract_strided_slice %402 {offsets = [0, 128], sizes = [1, 128], strides = [1, 1]} : vector<1x384xf32> to vector<1x128xf32>
    %414 = vector.extract_strided_slice %404 {offsets = [0, 128], sizes = [1, 128], strides = [1, 1]} : vector<1x384xf32> to vector<1x128xf32>
    %415 = arith.addf %413, %414 : vector<1x128xf32>
    %416 = arith.negf %415 : vector<1x128xf32>
    %417 = math.exp %416 : vector<1x128xf32>
    %cst_80 = arith.constant 1.000000e+00 : f32
    %418 = vector.broadcast %cst_80 : f32 to vector<1x128xf32>
    %419 = arith.addf %418, %417 : vector<1x128xf32>
    %420 = arith.divf %418, %419 : vector<1x128xf32>
    %421 = vector.extract_strided_slice %402 {offsets = [0, 256], sizes = [1, 128], strides = [1, 1]} : vector<1x384xf32> to vector<1x128xf32>
    %422 = vector.extract_strided_slice %404 {offsets = [0, 256], sizes = [1, 128], strides = [1, 1]} : vector<1x384xf32> to vector<1x128xf32>
    %423 = arith.addf %422, %21 : vector<1x128xf32>
    %424 = arith.mulf %412, %423 : vector<1x128xf32>
    %425 = arith.addf %421, %424 : vector<1x128xf32>
    %426 = math.tanh %425 : vector<1x128xf32>
    %cst_81 = arith.constant 1.000000e+00 : f32
    %427 = vector.broadcast %cst_81 : f32 to vector<1x128xf32>
    %428 = arith.subf %427, %420 : vector<1x128xf32>
    %429 = arith.mulf %428, %426 : vector<1x128xf32>
    %430 = arith.mulf %420, %366 : vector<1x128xf32>
    %431 = arith.addf %429, %430 : vector<1x128xf32>
    %432 = vector.extract_strided_slice %14 {offsets = [7, 0], sizes = [1, 384], strides = [1, 1]} : vector<8x384xf32> to vector<1x384xf32>
    %433 = arith.truncf %431 : vector<1x128xf32> to vector<1x128xbf16>
    %cst_82 = arith.constant dense<0.000000e+00> : vector<1x384xf32>
    %434 = tpu.matmul %433, %18, %cst_82 {dimension_numbers = #tpu.dot_dimension_numbers<[1], [0], [0], [1], [0, 0, 1, 1], [], []>} : vector<1x128xbf16>, vector<128x384xbf16>, vector<1x384xf32> -> vector<1x384xf32>
    %435 = vector.extract_strided_slice %432 {offsets = [0, 0], sizes = [1, 128], strides = [1, 1]} : vector<1x384xf32> to vector<1x128xf32>
    %436 = vector.extract_strided_slice %434 {offsets = [0, 0], sizes = [1, 128], strides = [1, 1]} : vector<1x384xf32> to vector<1x128xf32>
    %437 = arith.addf %435, %436 : vector<1x128xf32>
    %438 = arith.negf %437 : vector<1x128xf32>
    %439 = math.exp %438 : vector<1x128xf32>
    %cst_83 = arith.constant 1.000000e+00 : f32
    %440 = vector.broadcast %cst_83 : f32 to vector<1x128xf32>
    %441 = arith.addf %440, %439 : vector<1x128xf32>
    %442 = arith.divf %440, %441 : vector<1x128xf32>
    %443 = vector.extract_strided_slice %432 {offsets = [0, 128], sizes = [1, 128], strides = [1, 1]} : vector<1x384xf32> to vector<1x128xf32>
    %444 = vector.extract_strided_slice %434 {offsets = [0, 128], sizes = [1, 128], strides = [1, 1]} : vector<1x384xf32> to vector<1x128xf32>
    %445 = arith.addf %443, %444 : vector<1x128xf32>
    %446 = arith.negf %445 : vector<1x128xf32>
    %447 = math.exp %446 : vector<1x128xf32>
    %cst_84 = arith.constant 1.000000e+00 : f32
    %448 = vector.broadcast %cst_84 : f32 to vector<1x128xf32>
    %449 = arith.addf %448, %447 : vector<1x128xf32>
    %450 = arith.divf %448, %449 : vector<1x128xf32>
    %451 = vector.extract_strided_slice %432 {offsets = [0, 256], sizes = [1, 128], strides = [1, 1]} : vector<1x384xf32> to vector<1x128xf32>
    %452 = vector.extract_strided_slice %434 {offsets = [0, 256], sizes = [1, 128], strides = [1, 1]} : vector<1x384xf32> to vector<1x128xf32>
    %453 = arith.addf %452, %21 : vector<1x128xf32>
    %454 = arith.mulf %442, %453 : vector<1x128xf32>
    %455 = arith.addf %451, %454 : vector<1x128xf32>
    %456 = math.tanh %455 : vector<1x128xf32>
    %cst_85 = arith.constant 1.000000e+00 : f32
    %457 = vector.broadcast %cst_85 : f32 to vector<1x128xf32>
    %458 = arith.subf %457, %450 : vector<1x128xf32>
    %459 = arith.mulf %458, %456 : vector<1x128xf32>
    %460 = arith.mulf %450, %431 : vector<1x128xf32>
    %461 = arith.addf %459, %460 : vector<1x128xf32>
    %462 = arith.truncf %461 : vector<1x128xf32> to vector<1x128xbf16>
    %cst_86 = arith.constant dense<0.000000e+00> : vector<1x384xf32>
    %463 = tpu.matmul %462, %20, %cst_86 {dimension_numbers = #tpu.dot_dimension_numbers<[1], [0], [0], [1], [0, 0, 1, 1], [], []>} : vector<1x128xbf16>, vector<128x384xbf16>, vector<1x384xf32> -> vector<1x384xf32>
    %464 = arith.addf %463, %24 : vector<1x384xf32>
    %465 = vector.extract_strided_slice %464 {offsets = [0, 0], sizes = [1, 128], strides = [1, 1]} : vector<1x384xf32> to vector<1x128xf32>
    %466 = vector.extract_strided_slice %4 {offsets = [0, 0], sizes = [1, 128], strides = [1, 1]} : vector<1x384xf32> to vector<1x128xf32>
    %467 = arith.addf %465, %466 : vector<1x128xf32>
    %468 = arith.negf %467 : vector<1x128xf32>
    %469 = math.exp %468 : vector<1x128xf32>
    %cst_87 = arith.constant 1.000000e+00 : f32
    %470 = vector.broadcast %cst_87 : f32 to vector<1x128xf32>
    %471 = arith.addf %470, %469 : vector<1x128xf32>
    %472 = arith.divf %470, %471 : vector<1x128xf32>
    %473 = vector.extract_strided_slice %464 {offsets = [0, 128], sizes = [1, 128], strides = [1, 1]} : vector<1x384xf32> to vector<1x128xf32>
    %474 = vector.extract_strided_slice %4 {offsets = [0, 128], sizes = [1, 128], strides = [1, 1]} : vector<1x384xf32> to vector<1x128xf32>
    %475 = arith.addf %473, %474 : vector<1x128xf32>
    %476 = arith.negf %475 : vector<1x128xf32>
    %477 = math.exp %476 : vector<1x128xf32>
    %cst_88 = arith.constant 1.000000e+00 : f32
    %478 = vector.broadcast %cst_88 : f32 to vector<1x128xf32>
    %479 = arith.addf %478, %477 : vector<1x128xf32>
    %480 = arith.divf %478, %479 : vector<1x128xf32>
    %481 = vector.extract_strided_slice %464 {offsets = [0, 256], sizes = [1, 128], strides = [1, 1]} : vector<1x384xf32> to vector<1x128xf32>
    %482 = vector.extract_strided_slice %4 {offsets = [0, 256], sizes = [1, 128], strides = [1, 1]} : vector<1x384xf32> to vector<1x128xf32>
    %483 = arith.addf %482, %23 : vector<1x128xf32>
    %484 = arith.mulf %472, %483 : vector<1x128xf32>
    %485 = arith.addf %481, %484 : vector<1x128xf32>
    %486 = math.tanh %485 : vector<1x128xf32>
    %cst_89 = arith.constant 1.000000e+00 : f32
    %487 = vector.broadcast %cst_89 : f32 to vector<1x128xf32>
    %488 = arith.subf %487, %480 : vector<1x128xf32>
    %489 = arith.mulf %488, %486 : vector<1x128xf32>
    %490 = arith.mulf %480, %0 : vector<1x128xf32>
    %491 = arith.addf %489, %490 : vector<1x128xf32>
    %492 = arith.truncf %491 : vector<1x128xf32> to vector<1x128xbf16>
    %cst_90 = arith.constant dense<0.000000e+00> : vector<1x2xf32>
    %493 = tpu.matmul %492, %26, %cst_90 {dimension_numbers = #tpu.dot_dimension_numbers<[1], [1], [0], [0], [0, 0, 1, 0], [], []>} : vector<1x128xbf16>, vector<2x128xbf16>, vector<1x2xf32> -> vector<1x2xf32>
    %494 = arith.addf %493, %29 : vector<1x2xf32>
    %495 = vector.extract_strided_slice %494 {offsets = [0, 0], sizes = [1, 1], strides = [1, 1]} : vector<1x2xf32> to vector<1x1xf32>
    %496 = vector.extract_strided_slice %494 {offsets = [0, 1], sizes = [1, 1], strides = [1, 1]} : vector<1x2xf32> to vector<1x1xf32>
    %497 = tpu.iota {dimensions = array<i32: 1>} : vector<1x128xi32>
    %c8_i32 = arith.constant 8 : i32
    %498 = vector.broadcast %c8_i32 : i32 to vector<1x128xi32>
    %499 = arith.cmpi slt, %497, %498 : vector<1x128xi32>
    %500 = vector.broadcast %496 : vector<1x1xf32> to vector<1x128xf32>
    %501 = arith.addf %401, %500 : vector<1x128xf32>
    %cst_91 = arith.constant 0.000000e+00 : f32
    %502 = vector.broadcast %cst_91 : f32 to vector<1x128xf32>
    %503 = arith.maximumf %501, %502 : vector<1x128xf32>
    %cst_92 = arith.constant 0.000000e+00 : f32
    %504 = vector.broadcast %cst_92 : f32 to vector<1x128xf32>
    %505 = arith.select %499, %503, %504 : vector<1x128xi1>, vector<1x128xf32>
    %cst_93 = arith.constant dense<0xFF800000> : vector<1xf32>
    %506 = vector.multi_reduction <maximumf>, %505, %cst_93 [1] : vector<1x128xf32> to vector<1xf32>
    %507 = vector.shape_cast %506 : vector<1xf32> to vector<1x1xf32>
    %508 = vector.broadcast %507 : vector<1x1xf32> to vector<1x128xf32>
    %509 = arith.subf %505, %508 : vector<1x128xf32>
    %510 = math.exp %509 : vector<1x128xf32>
    %cst_94 = arith.constant 0.000000e+00 : f32
    %511 = vector.broadcast %cst_94 : f32 to vector<1x128xf32>
    %512 = arith.select %499, %510, %511 : vector<1x128xi1>, vector<1x128xf32>
    %cst_95 = arith.constant dense<0.000000e+00> : vector<1xf32>
    %513 = vector.multi_reduction <add>, %512, %cst_95 [1] : vector<1x128xf32> to vector<1xf32>
    %514 = vector.shape_cast %513 : vector<1xf32> to vector<1x1xf32>
    %515 = tpu.iota {dimensions = array<i32: 0>} : vector<128x128xi32>
    %516 = tpu.iota {dimensions = array<i32: 1>} : vector<128x128xi32>
    %517 = arith.cmpi sle, %515, %516 : vector<128x128xi32>
    %518 = arith.extui %517 : vector<128x128xi1> to vector<128x128xi32>
    %519 = arith.sitofp %518 : vector<128x128xi32> to vector<128x128xf32>
    %cst_96 = arith.constant dense<0.000000e+00> : vector<1x128xf32>
    %520 = tpu.matmul %512, %519, %cst_96 {dimension_numbers = #tpu.dot_dimension_numbers<[1], [0], [0], [1], [0, 0, 1, 1], [], []>} : vector<1x128xf32>, vector<128x128xf32>, vector<1x128xf32> -> vector<1x128xf32>
    %521 = arith.mulf %1, %514 : vector<1x1xf32>
    %522 = vector.broadcast %521 : vector<1x1xf32> to vector<1x128xf32>
    %523 = arith.cmpf ole, %520, %522 : vector<1x128xf32>
    %524 = arith.extui %523 : vector<1x128xi1> to vector<1x128xi32>
    %525 = arith.sitofp %524 : vector<1x128xi32> to vector<1x128xf32>
    %cst_97 = arith.constant dense<0.000000e+00> : vector<1xf32>
    %526 = vector.multi_reduction <add>, %525, %cst_97 [1] : vector<1x128xf32> to vector<1xf32>
    %527 = vector.shape_cast %526 : vector<1xf32> to vector<1x1xf32>
    %cst_98 = arith.constant 7.000000e+00 : f32
    %528 = vector.broadcast %cst_98 : f32 to vector<1x1xf32>
    %529 = arith.minimumf %527, %528 : vector<1x1xf32>
    %c0_i32 = arith.constant 0 : i32
    %530 = vector.broadcast %c0_i32 : i32 to vector<1x128xi32>
    %531 = arith.cmpi eq, %497, %530 : vector<1x128xi32>
    %c1_i32 = arith.constant 1 : i32
    %532 = vector.broadcast %c1_i32 : i32 to vector<1x128xi32>
    %533 = arith.cmpi eq, %497, %532 : vector<1x128xi32>
    %cst_99 = arith.constant 0.000000e+00 : f32
    %534 = vector.shape_cast %529 : vector<1x1xf32> to vector<1x1xf32>
    %535 = vector.broadcast %534 : vector<1x1xf32> to vector<1x128xf32>
    %536 = vector.broadcast %cst_99 : f32 to vector<1x128xf32>
    %537 = arith.select %533, %535, %536 : vector<1x128xi1>, vector<1x128xf32>
    %538 = vector.shape_cast %495 : vector<1x1xf32> to vector<1x1xf32>
    %539 = vector.broadcast %538 : vector<1x1xf32> to vector<1x128xf32>
    %540 = arith.select %531, %539, %537 : vector<1x128xi1>, vector<1x128xf32>
    %cst_100 = arith.constant 0.000000e+00 : f32
    %541 = vector.broadcast %cst_100 : f32 to vector<5x128xf32>
    %542 = tpu.concatenate %505, %540, %491, %541 in 0 : vector<1x128xf32>, vector<1x128xf32>, vector<1x128xf32>, vector<5x128xf32> -> vector<8x128xf32>
    %c0_101 = arith.constant 0 : index
    %c0_102 = arith.constant 0 : index
    %543 = vector.load %arg5[%c0_101, %c0_102] : memref<8x128xf32, #tpu.memory_space<vmem>>, vector<8x128xf32>
    tpu.vector_store %arg5[%c0_101, %c0_102], %542 {strides = array<i32>} : memref<8x128xf32, #tpu.memory_space<vmem>>, vector<8x128xf32>,
    return
  }
}

</mosaic_0001>

<bundles_post_ra>
// kernel: tpu_custom_call.1
= control target key start
LH: loop header
LB: loop body
LE: loop exit
PB: predicated region body
PF: predicated region fallthrough
CT: control target
= control target key end

     0   :  { %10 = vsyncpa [#allocation3], 0  ;;  %s5843_s0 = inlined_call_operand.vmem [shape: s32[56,1], index: 0, kind: input, shape index: {}]   ;;  %s5844_s1 = inlined_call_operand.vmem [shape: f32[2,128], index: 1, kind: input, shape index: {}]   ;;  %s5845_s2 = inlined_call_operand.hbm [shape: bf16[128,768], index: 2, kind: input, shape index: {}]   ;;  %s5846_s3 = inlined_call_operand.hbm [shape: bf16[512,384], index: 3, kind: input, shape index: {}]   ;;  %s5847_s4 = inlined_call_operand.vmem [shape: f32[8,384], index: 4, kind: input, shape index: {}]   ;;  %s5848_s5 = inlined_call_operand.hbm [shape: f32[8,128], index: 5, kind: output, shape index: {}]  }
   0x1   :  { %11 = vsyncpa [#allocation6], 0 }
   0x2   :  { %12 = vsyncpa [#allocation4], 0  ;;  %s4689_s18 = smov [#allocation2]   ;;  %s4617_s22 = scalar_lea.hbm %s5845_s2, 6144 }
   0x3   :  { %s22_s19 = sshll.u32 %s4689_s18, 4  ;;  %p4618_p0 = scmp.ne.s32.totalorder %s5845_s2, %s4617_s22  ;;  %s23_s19 = int_to_ptr.vmem [resolvable:$true] %s22_s19 }
   0x4   :  { %p4621_p1 = scmp.lt.u32.totalorder %s4617_s22, %s5845_s2 }
   0x6   :  { %p4623_p2 = pnand %p4621_p1, %p4618_p0 }
   0x8   :  { %4626 = shalt.err (!%p4623_p2)
}
   0x9   :  { %s4627_s27 = scalar_lea.vmem %s23_s19, 6144  ;;  %p4632_p4 = scmp.lt.s32.totalorder %s23_s19, %s23_s19 }
   0xa   :  { %p4628_p3 = scmp.ne.s32.totalorder %s23_s19, %s4627_s27  ;;  %p4633_p5 = scmp.lt.s32.totalorder %s4627_s27, %s4627_s27 }
   0xc   :  { %p4634_p6 = por %p4633_p5, %p4632_p4 }
   0xe   :  { %p4635_p7 = pnand %p4634_p6, %p4628_p3 }
  0x10   :  { %4638 = shalt.err (!%p4635_p7)
}
  0x11   :  { %s4690_s28 = smov 384   ;;  %s4691_s29 = smov 24  }
  0x12   :  { %28 = dma.hbm_to_vmem [thread:$0]  %s5845_s2, 6144, %s23_s19, [#allocation3], %s4690_s28, %s4690_s28, %s4691_s29  }
  0x13   :  { %s4692_s7 = smov [#allocation5]   ;;  %s4639_s11 = scalar_lea.hbm %s5846_s3, 12288 }
  0x14   :  { %s34_s8 = sshll.u32 %s4692_s7, 4  ;;  %p4640_p8 = scmp.ne.s32.totalorder %s5846_s3, %s4639_s11  ;;  %s35_s8 = int_to_ptr.vmem [resolvable:$true] %s34_s8 }
  0x15   :  { %p4643_p9 = scmp.lt.u32.totalorder %s4639_s11, %s5846_s3 }
  0x17   :  { %p4645_p10 = pnand %p4643_p9, %p4640_p8 }
  0x19   :  { %4648 = shalt.err (!%p4645_p10)
}
  0x1a   :  { %s4649_s16 = scalar_lea.vmem %s35_s8, 12288  ;;  %p4654_p12 = scmp.lt.s32.totalorder %s35_s8, %s35_s8 }
  0x1b   :  { %p4650_p11 = scmp.ne.s32.totalorder %s35_s8, %s4649_s16  ;;  %p4655_p13 = scmp.lt.s32.totalorder %s4649_s16, %s4649_s16 }
  0x1d   :  { %p4656_p0 = por %p4655_p13, %p4654_p12 }
  0x1f   :  { %p4657_p1 = pnand %p4656_p0, %p4650_p11 }
  0x21   :  { %4660 = shalt.err (!%p4657_p1)
}
  0x22   :  { %s4693_s2 = smov 192   ;;  %s4694_s17 = smov 12  }
  0x23   :  { %40 = dma.hbm_to_vmem [thread:$0]  %s5846_s3, 12288, %s35_s8, [#allocation6], %s4693_s2, %s4693_s2, %s4694_s17  }
  0x24   :  { %4683 = dma.done.wait [#allocation3], 6144  }
  0x25   :  { %4684 = vsyncadd [#allocation3], 4294961152 }
  0x26   :  { %4685 = dma.done.wait [#allocation6], 12288  }
  0x27   :  { %4686 = vsyncadd [#allocation6], 4294955008  ;;  %v5852_v0 = vmov 0   ;;  %v5856_v1 = vmov 0.0   ;;  %vm4697_vm0 = vmmov 0   ;;  %v296_v2 = vld [vmem:[%s5843_s0 + $0x10] sm:$0xff]  ;;  %v5851_v60 = vlaneseq }
  0x28   :  { %4219 = vset.pattern.permute.xlu1 %v5852_v0  ;;  %4218 = vset.pattern.permute.xlu0 %v5852_v0  ;;  %v294_v3 = vld [vmem:[%s5843_s0] sm:$0xff]  ;;  %v297_v4 = vld [vmem:[%s5843_s0 + $0x18] sm:$0xff]  ;;  %v295_v5 = vld [vmem:[%s5843_s0 + $0x8] sm:$0xff]  ;;  %vm626_vm8 = vcmask 1043456  }
  0x29   :  { %3760 = vmatprep.subr.bf16.mxu1 %v5856_v1  ;;  %245 = vmatprep.mubr.bf16.mxu0 %v5852_v0  ;;  %v4222_v6 = vld [vmem:[#allocation5 + $0x184] ss:$12 sps:$4 sm:$0xff]   ;;  %v4224_v7 = vld [vmem:[#allocation5 + $0x180] ss:$12 sps:$4 sm:$0xff]   ;;  %v4225_v9 = vld [vmem:[#allocation5 + $0x188] ss:$12 sps:$4 sm:$0xff]  }
  0x2a   :  { %3776 = vmatprep.mubr.msk.bf16.mxu1 %vm4697_vm0, %v5856_v1  ;;  %310 = vperm.xlu1 %4219, %v296_v2   ;;  %v299_v8 = vld [vmem:[%s5843_s0 + $0x28] sm:$0xff]  ;;  %v298_v10 = vld [vmem:[%s5843_s0 + $0x20] sm:$0xff]  ;;  %v300_v15 = vld [vmem:[%s5843_s0 + $0x30] sm:$0xff]  ;;  %v4806_v62 = vand.u32 127, %v5851_v60 }
  0x2b   :  { %304 = vperm.xlu0 %4218, %v294_v3   ;;  %v4226_v11 = vld [vmem:[#allocation5 + $0x19c] ss:$12 sps:$4 sm:$0xff]   ;;  %213 = vmatprep.subr.bf16.mxu0 %v4222_v6  ;;  %v4229_v12 = vld [vmem:[#allocation5 + $0x1a0] ss:$12 sps:$4 sm:$0xff]   ;;  %v4228_v13 = vld [vmem:[#allocation5 + $0x198] ss:$12 sps:$4 sm:$0xff]  }
  0x2c   :  { %3761 = vmatpush3.bf16.msra.mxu1 %v4225_v9  ;;  %214 = vmatpush1.bf16.msra.mxu0 %v4224_v7  ;;  %v4230_v14 = vld [vmem:[#allocation5 + $0x1b4] ss:$12 sps:$4 sm:$0xff]   ;;  %v4233_v16 = vld [vmem:[#allocation5 + $0x1b8] ss:$12 sps:$4 sm:$0xff]   ;;  %v4232_v17 = vld [vmem:[#allocation5 + $0x1b0] ss:$12 sps:$4 sm:$0xff]  }
  0x2d   :  { %3762 = vmatprep.subr.bf16.mxu1 %v5856_v1  ;;  %215 = vmatprep.subr.bf16.mxu0 %v4226_v11  ;;  %v4234_v18 = vld [vmem:[#allocation5 + $0x1cc] ss:$12 sps:$4 sm:$0xff]   ;;  %v4237_v19 = vld [vmem:[#allocation5 + $0x1d0] ss:$12 sps:$4 sm:$0xff]   ;;  %v4236_v20 = vld [vmem:[#allocation5 + $0x1c8] ss:$12 sps:$4 sm:$0xff]  }
  0x2e   :  { %313 = vperm.xlu1 %4219, %v297_v4   ;;  %v4238_v21 = vld [vmem:[#allocation5 + $0x1e4] ss:$12 sps:$4 sm:$0xff]   ;;  %v4241_v22 = vld [vmem:[#allocation5 + $0x1e8] ss:$12 sps:$4 sm:$0xff]   ;;  %v4240_v23 = vld [vmem:[#allocation5 + $0x1e0] ss:$12 sps:$4 sm:$0xff]  }
  0x2f   :  { %307 = vperm.xlu0 %4218, %v295_v5   ;;  %v4242_v24 = vld [vmem:[#allocation5 + $0x1fc] ss:$12 sps:$4 sm:$0xff]   ;;  %v4245_v25 = vld [vmem:[#allocation5 + $0x200] ss:$12 sps:$4 sm:$0xff]   ;;  %v4244_v26 = vld [vmem:[#allocation5 + $0x1f8] ss:$12 sps:$4 sm:$0xff]  }
  0x30   :  { %3763 = vmatpush3.bf16.msra.mxu1 %v4229_v12  ;;  %216 = vmatpush1.bf16.msra.mxu0 %v4228_v13  ;;  %v4246_v27 = vld [vmem:[#allocation5 + $0x214] ss:$12 sps:$4 sm:$0xff]   ;;  %v4249_v28 = vld [vmem:[#allocation5 + $0x218] ss:$12 sps:$4 sm:$0xff]   ;;  %v4248_v29 = vld [vmem:[#allocation5 + $0x210] ss:$12 sps:$4 sm:$0xff]  }
  0x31   :  { %3764 = vmatprep.subr.bf16.mxu1 %v5856_v1  ;;  %217 = vmatprep.subr.bf16.mxu0 %v4230_v14  ;;  %v4250_v30 = vld [vmem:[#allocation5 + $0x22c] ss:$12 sps:$4 sm:$0xff]   ;;  %v4253_v31 = vld [vmem:[#allocation5 + $0x230] ss:$12 sps:$4 sm:$0xff]   ;;  %v50_v32 = vld [vmem:[%s5844_s1] sm:$0x1] }
  0x32   :  { %319 = vperm.xlu1 %4219, %v299_v8   ;;  %v4252_v33 = vld [vmem:[#allocation5 + $0x228] ss:$12 sps:$4 sm:$0xff]   ;;  %v4256_v34 = vld [vmem:[#allocation2 + $0x4] ss:$24 sps:$4 sm:$0xff]   ;;  %v84_v35 = vpack.c.bf16 %v50_v32, %v50_v32  ;;  %v4254_v37 = vld [vmem:[#allocation2] ss:$24 sps:$4 sm:$0xff]  }
  0x33   :  { %316 = vperm.xlu0 %4218, %v298_v10   ;;  %v4257_v36 = vld [vmem:[#allocation2 + $0x8] ss:$24 sps:$4 sm:$0xff]   ;;  %v4260_v38 = vld [vmem:[#allocation2 + $0x34] ss:$24 sps:$4 sm:$0xff]   ;;  %v4261_v39 = vld [vmem:[#allocation2 + $0x38] ss:$24 sps:$4 sm:$0xff]  }
  0x34   :  { %3765 = vmatpush3.bf16.msra.mxu1 %v4233_v16  ;;  %218 = vmatpush1.bf16.msra.mxu0 %v4232_v17  ;;  %v4258_v40 = vld [vmem:[#allocation2 + $0x30] ss:$24 sps:$4 sm:$0xff]   ;;  %v4264_v41 = vld [vmem:[#allocation2 + $0x64] ss:$24 sps:$4 sm:$0xff]   ;;  %v4262_v43 = vld [vmem:[#allocation2 + $0x60] ss:$24 sps:$4 sm:$0xff]  }
  0x35   :  { %3766 = vmatprep.subr.bf16.mxu1 %v5856_v1  ;;  %219 = vmatprep.subr.bf16.mxu0 %v4234_v18  ;;  %v4265_v42 = vld [vmem:[#allocation2 + $0x68] ss:$24 sps:$4 sm:$0xff]   ;;  %v4268_v44 = vld [vmem:[#allocation2 + $0x94] ss:$24 sps:$4 sm:$0xff]   ;;  %v4269_v45 = vld [vmem:[#allocation2 + $0x98] ss:$24 sps:$4 sm:$0xff]  }
  0x36   :  { %v4266_v46 = vld [vmem:[#allocation2 + $0x90] ss:$24 sps:$4 sm:$0xff]   ;;  %v4272_v47 = vld [vmem:[#allocation2 + $0xc4] ss:$24 sps:$4 sm:$0xff]   ;;  %v4270_v49 = vld [vmem:[#allocation2 + $0xc0] ss:$24 sps:$4 sm:$0xff]  }
  0x37   :  { %322 = vperm.xlu0 %4218, %v300_v15   ;;  %v4273_v48 = vld [vmem:[#allocation2 + $0xc8] ss:$24 sps:$4 sm:$0xff]   ;;  %v4276_v50 = vld [vmem:[#allocation2 + $0xf4] ss:$24 sps:$4 sm:$0xff]   ;;  %v4277_v51 = vld [vmem:[#allocation2 + $0xf8] ss:$24 sps:$4 sm:$0xff]  }
  0x38   :  { %3767 = vmatpush3.bf16.msra.mxu1 %v4237_v19  ;;  %220 = vmatpush1.bf16.msra.mxu0 %v4236_v20  ;;  %v4274_v52 = vld [vmem:[#allocation2 + $0xf0] ss:$24 sps:$4 sm:$0xff]   ;;  %v4280_v53 = vld [vmem:[#allocation2 + $0x124] ss:$24 sps:$4 sm:$0xff]   ;;  %v4278_v55 = vld [vmem:[#allocation2 + $0x120] ss:$24 sps:$4 sm:$0xff]  }
  0x39   :  { %3768 = vmatprep.subr.bf16.mxu1 %v5856_v1  ;;  %221 = vmatprep.subr.bf16.mxu0 %v4238_v21  ;;  %v4281_v54 = vld [vmem:[#allocation2 + $0x128] ss:$24 sps:$4 sm:$0xff]   ;;  %v4284_v56 = vld [vmem:[#allocation2 + $0x154] ss:$24 sps:$4 sm:$0xff]   ;;  %v4285_v57 = vld [vmem:[#allocation2 + $0x158] ss:$24 sps:$4 sm:$0xff]  }
  0x3a   :  { %v4282_v58 = vld [vmem:[#allocation2 + $0x150] ss:$24 sps:$4 sm:$0xff]   ;;  %5907 = vst [vmem:[#allocation11_spill] sm:$0xff] %v4806_v62  ;;  %v4286_v2 = vld [vmem:[#allocation2 + $0xc] ss:$24 sps:$4 sm:$0xff]  }
  0x3b   :  { %v4288_v59 = vld [vmem:[#allocation2 + $0x10] ss:$24 sps:$4 sm:$0xff]   ;;  %v4289_v3 = vld [vmem:[#allocation2 + $0x14] ss:$24 sps:$4 sm:$0xff]   ;;  %v4292_v4 = vld [vmem:[#allocation2 + $0x40] ss:$24 sps:$4 sm:$0xff]  }
  0x3c   :  { %3769 = vmatpush3.bf16.msra.mxu1 %v4241_v22  ;;  %222 = vmatpush1.bf16.msra.mxu0 %v4240_v23  ;;  %v5849_v5 = vmov 1.0|1.0   ;;  %v4290_v6 = vld [vmem:[#allocation2 + $0x3c] ss:$24 sps:$4 sm:$0xff]   ;;  %v4296_v8 = vld [vmem:[#allocation2 + $0x70] ss:$24 sps:$4 sm:$0xff]  }
  0x3d   :  { %3770 = vmatprep.subr.bf16.mxu1 %v5856_v1  ;;  %223 = vmatprep.subr.bf16.mxu0 %v4242_v24  ;;  %v4293_v7 = vld [vmem:[#allocation2 + $0x44] ss:$24 sps:$4 sm:$0xff]   ;;  %v4297_v10 = vld [vmem:[#allocation2 + $0x74] ss:$24 sps:$4 sm:$0xff]   ;;  %v4300_v11 = vld [vmem:[#allocation2 + $0xa0] ss:$24 sps:$4 sm:$0xff]  }
  0x3e   :  { %v4294_v9 = vld [vmem:[#allocation2 + $0x6c] ss:$24 sps:$4 sm:$0xff]   ;;  %v4298_v13 = vld [vmem:[#allocation2 + $0x9c] ss:$24 sps:$4 sm:$0xff]   ;;  %v4304_v15 = vld [vmem:[#allocation2 + $0xd0] ss:$24 sps:$4 sm:$0xff]  }
  0x3f   :  { %v4301_v14 = vld [vmem:[#allocation2 + $0xa4] ss:$24 sps:$4 sm:$0xff]   ;;  %v4305_v17 = vld [vmem:[#allocation2 + $0xd4] ss:$24 sps:$4 sm:$0xff]   ;;  %v4308_v19 = vld [vmem:[#allocation2 + $0x100] ss:$24 sps:$4 sm:$0xff]  }
  0x40   :  { %3771 = vmatpush3.bf16.msra.mxu1 %v4245_v25  ;;  %224 = vmatpush1.bf16.msra.mxu0 %v4244_v26  ;;  %v4302_v16 = vld [vmem:[#allocation2 + $0xcc] ss:$24 sps:$4 sm:$0xff]   ;;  %v4306_v20 = vld [vmem:[#allocation2 + $0xfc] ss:$24 sps:$4 sm:$0xff]   ;;  %v4312_v22 = vld [vmem:[#allocation2 + $0x130] ss:$24 sps:$4 sm:$0xff]  }
  0x41   :  { %3772 = vmatprep.subr.bf16.mxu1 %v5856_v1  ;;  %225 = vmatprep.subr.bf16.mxu0 %v4246_v27  ;;  %v4309_v21 = vld [vmem:[#allocation2 + $0x104] ss:$24 sps:$4 sm:$0xff]   ;;  %v4313_v27 = vld [vmem:[#allocation2 + $0x134] ss:$24 sps:$4 sm:$0xff]  }
  0x42   :  { %v4310_v26 = vld [vmem:[#allocation2 + $0x12c] ss:$24 sps:$4 sm:$0xff]  }
  0x44   :  { %3773 = vmatpush3.bf16.msra.mxu1 %v4249_v28  ;;  %226 = vmatpush1.bf16.msra.mxu0 %v4248_v29 }
  0x45   :  { %3774 = vmatprep.subr.bf16.mxu1 %v5856_v1  ;;  %227 = vmatprep.subr.bf16.mxu0 %v4250_v30 }
  0x48   :  { %3775 = vmatpush3.bf16.msra.mxu1 %v4253_v31  ;;  %228 = vmatpush1.bf16.msra.mxu0 %v4252_v33  ;;  %v4316_v31 = vld [vmem:[#allocation2 + $0x160] ss:$24 sps:$4 sm:$0xff]  }
  0x49   :  { %3780 = vmatprep.subr.bf16.mxu1 %v5856_v1  ;;  %509 = vmatprep.subr.bf16.mxu0 %v4256_v34  ;;  %v4314_v34 = vld [vmem:[#allocation2 + $0x15c] ss:$24 sps:$4 sm:$0xff]  }
  0x4b   :  { %3777 = vmatmul.mubr.bf16.vlgmr.msra.gmra.mrb[0].mxu1 %v84_v35  ;;  %246 = vmatmul.mubr.bf16.vlgmr.msra.gmra.mrb[0].mxu0 %v84_v35  ;;  %v4317_v35 = vld [vmem:[#allocation2 + $0x164] ss:$24 sps:$4 sm:$0xff]  }
  0x4c   :  { %3781 = vmatpush3.bf16.msra.mxu1 %v4257_v36  ;;  %510 = vmatpush1.bf16.msra.mxu0 %v4254_v37  ;;  %v4838_v36 = vld [vmem:[#allocation5 + $0x4] ss:$12 sps:$4 sm:$0xff]  }
  0x4d   :  { %3782 = vmatprep.subr.bf16.mxu1 %v5856_v1  ;;  %511 = vmatprep.subr.bf16.mxu0 %v4260_v38 }
  0x4e   :  { %541 = vmatprep.mubr.bf16.mxu0 %v5852_v0  ;;  %3796 = vmatprep.mubr.msk.bf16.mxu1 %vm4697_vm0, %v5856_v1 }
  0x50   :  { %3783 = vmatpush3.bf16.msra.mxu1 %v4261_v39  ;;  %512 = vmatpush1.bf16.msra.mxu0 %v4258_v40 }
  0x51   :  { %3784 = vmatprep.subr.bf16.mxu1 %v5856_v1  ;;  %513 = vmatprep.subr.bf16.mxu0 %v4264_v41  ;;  %v4842_v41 = vld [vmem:[#allocation5] ss:$12 sps:$4 sm:$0xff]  }
  0x54   :  { %3785 = vmatpush3.bf16.msra.mxu1 %v4265_v42  ;;  %514 = vmatpush1.bf16.msra.mxu0 %v4262_v43  ;;  %v4845_v43 = vld [vmem:[#allocation5 + $0x1c] ss:$12 sps:$4 sm:$0xff]  }
  0x55   :  { %3786 = vmatprep.subr.bf16.mxu1 %v5856_v1  ;;  %515 = vmatprep.subr.bf16.mxu0 %v4268_v44 }
  0x58   :  { %3787 = vmatpush3.bf16.msra.mxu1 %v4269_v45  ;;  %516 = vmatpush1.bf16.msra.mxu0 %v4266_v46  ;;  %v4849_v46 = vld [vmem:[#allocation5 + $0x8] ss:$12 sps:$4 sm:$0xff]  }
  0x59   :  { %3788 = vmatprep.subr.bf16.mxu1 %v5856_v1  ;;  %517 = vmatprep.subr.bf16.mxu0 %v4272_v47  ;;  %v4853_v47 = vld [vmem:[#allocation5 + $0x18] ss:$12 sps:$4 sm:$0xff]  }
  0x5c   :  { %3789 = vmatpush3.bf16.msra.mxu1 %v4273_v48  ;;  %518 = vmatpush1.bf16.msra.mxu0 %v4270_v49  ;;  %v4859_v48 = vld [vmem:[#allocation5 + $0x34] ss:$12 sps:$4 sm:$0xff]  }
  0x5d   :  { %3790 = vmatprep.subr.bf16.mxu1 %v5856_v1  ;;  %519 = vmatprep.subr.bf16.mxu0 %v4276_v50  ;;  %v4862_v50 = vld [vmem:[#allocation5 + $0x20] ss:$12 sps:$4 sm:$0xff]  }
  0x60   :  { %3791 = vmatpush3.bf16.msra.mxu1 %v4277_v51  ;;  %520 = vmatpush1.bf16.msra.mxu0 %v4274_v52  ;;  %v4867_v52 = vld [vmem:[#allocation5 + $0x30] ss:$12 sps:$4 sm:$0xff]  }
  0x61   :  { %3792 = vmatprep.subr.bf16.mxu1 %v5856_v1  ;;  %521 = vmatprep.subr.bf16.mxu0 %v4280_v53  ;;  %v4870_v53 = vld [vmem:[#allocation5 + $0x4c] ss:$12 sps:$4 sm:$0xff]  }
  0x64   :  { %3793 = vmatpush3.bf16.msra.mxu1 %v4281_v54  ;;  %522 = vmatpush1.bf16.msra.mxu0 %v4278_v55 }
  0x65   :  { %3794 = vmatprep.subr.bf16.mxu1 %v5856_v1  ;;  %523 = vmatprep.subr.bf16.mxu0 %v4284_v56  ;;  %v4874_v56 = vld [vmem:[#allocation5 + $0x38] ss:$12 sps:$4 sm:$0xff]  }
  0x68   :  { %3795 = vmatpush3.bf16.msra.mxu1 %v4285_v57  ;;  %524 = vmatpush1.bf16.msra.mxu0 %v4282_v58  ;;  %v4877_v57 = vld [vmem:[#allocation5 + $0x48] ss:$12 sps:$4 sm:$0xff]   ;;  %v4883_v58 = vld [vmem:[#allocation5 + $0x64] ss:$12 sps:$4 sm:$0xff]  }
  0x69   :  { %3800 = vmatprep.subr.bf16.mxu1 %v5856_v1  ;;  %765 = vmatprep.subr.bf16.mxu0 %v4288_v59 }
  0xa9   :  { %v311_v12 = vpop.permute.xlu1 %310 }
  0xaa   :  { %v305_v61 = vpop.permute.xlu0 %304  ;;  %vm326_vm4 = vcmp.eq.s32.totalorder %v4806_v62, %v311_v12  ;;  %v4924_v12 = vld [vmem:[#allocation5 + $0xc4] ss:$12 sps:$4 sm:$0xff]  }
  0xab   :  { %vm324_vm1 = vcmp.eq.s32.totalorder %v4806_v62, %v305_v61  ;;  %v3381_v23 = vsel %vm326_vm4, 1.0, %v5856_v1  ;;  %v4888_v61 = vld [vmem:[#allocation5 + $0x60] ss:$12 sps:$4 sm:$0xff]   ;;  %5916 = vst [vmem:[#allocation20_spill] sm:$0xff] %v4924_v12 }
  0xac   :  { %v3379_v28 = vsel %vm324_vm1, 1.0, %v5856_v1 }
  0xad   :  { %v314_v18 = vpop.permute.xlu1 %313 }
  0xae   :  { %v308_v63 = vpop.permute.xlu0 %307  ;;  %vm327_vm5 = vcmp.eq.s32.totalorder %v4806_v62, %v314_v18  ;;  %v4946_v18 = vld [vmem:[#allocation5 + $0xf4] ss:$12 sps:$4 sm:$0xff]  }
  0xaf   :  { %vm325_vm2 = vcmp.eq.s32.totalorder %v4806_v62, %v308_v63  ;;  %v3382_v24 = vsel %vm327_vm5, 1.0, %v5856_v1  ;;  %v4892_v63 = vld [vmem:[#allocation5 + $0x7c] ss:$12 sps:$4 sm:$0xff]  }
  0xb0   :  { %vm3410_vm3 = vmpackc.low %vm325_vm2, %vm324_vm1  ;;  %v3380_v25 = vsel %vm325_vm2, 1.0, %v5856_v1  ;;  %v346_v32 = vpack.c.bf16 %v3382_v24, %v3381_v23  ;;  %5908 = vst [vmem:[#allocation12_spill] sm:$0xff] %v4892_v63  ;;  %v4966_v23 = vld [vmem:[#allocation5 + $0x108] ss:$12 sps:$4 sm:$0xff]   ;;  %v4969_v24 = vld [vmem:[#allocation5 + $0x124] ss:$12 sps:$4 sm:$0xff]  }
  0xb1   :  { %3411 = vmatmul.mubr.msk.bf16.vlgmr.msra.gmra.mrb[4].mxu0 %vm3410_vm3, %v5849_v5  ;;  %3797 = vmatmul.mubr.msk.bf16.vlgmr.msra.gmra.mrb[4].mxu1 %vm3410_vm3, %v5849_v5  ;;  %v320_v29 = vpop.permute.xlu1 %319  ;;  %v345_v33 = vpack.c.bf16 %v3380_v25, %v3379_v28  ;;  %v4972_v25 = vld [vmem:[#allocation5 + $0xf8] ss:$12 sps:$4 sm:$0xff]   ;;  %v4982_v28 = vld [vmem:[#allocation5 + $0x110] ss:$12 sps:$4 sm:$0xff]  }
  0xb2   :  { %766 = vmatpush1.bf16.msra.mxu0 %v4286_v2  ;;  %3801 = vmatpush3.bf16.msra.mxu1 %v4289_v3  ;;  %v317_v30 = vpop.permute.xlu0 %316  ;;  %vm329_vm6 = vcmp.eq.s32.totalorder %v4806_v62, %v320_v29  ;;  %v628_v37 = vrot.slane %v346_v32, 4  ;;  %v4894_v2 = vld [vmem:[#allocation5 + $0x50] ss:$12 sps:$4 sm:$0xff]   ;;  %v4986_v29 = vld [vmem:[#allocation5 + $0x138] ss:$12 sps:$4 sm:$0xff]  }
  0xb3   :  { %767 = vmatprep.subr.bf16.mxu0 %v4292_v4  ;;  %3802 = vmatprep.subr.bf16.mxu1 %v5856_v1  ;;  %vm328_vm7 = vcmp.eq.s32.totalorder %v4806_v62, %v317_v30  ;;  %v627_v38 = vrot.slane %v345_v33, 4  ;;  %v3384_v39 = vsel %vm329_vm6, 1.0, %v5856_v1  ;;  %v4898_v4 = vld [vmem:[#allocation5 + $0x78] ss:$12 sps:$4 sm:$0xff]   ;;  %v4989_v30 = vld [vmem:[#allocation5 + $0x154] ss:$12 sps:$4 sm:$0xff]  }
  0xb4   :  { %797 = vmatprep.mubr.bf16.mxu0 %v5852_v0  ;;  %3816 = vmatprep.mubr.msk.bf16.mxu1 %vm4697_vm0, %v5856_v1  ;;  %v3383_v40 = vsel %vm328_vm7, 1.0, %v5856_v1  ;;  %5909 = vst [vmem:[#allocation13_spill] sm:$0xff] %v4898_v4  ;;  %v4996_v32 = vld [vmem:[#allocation5 + $0x150] ss:$12 sps:$4 sm:$0xff]   ;;  %v4999_v33 = vld [vmem:[#allocation5 + $0x16c] ss:$12 sps:$4 sm:$0xff]  }
  0xb5   :  { %v347_v44 = vpack.c.bf16 %v3384_v39, %v3383_v40  ;;  %v629_v45 = vsel %vm626_vm8, %v627_v38, %v628_v37  ;;  %v5015_v38 = vld [vmem:[#allocation5 + $0x170] ss:$12 sps:$4 sm:$0xff]   ;;  %vm3160_vm7 = vcmask 1040384  }
  0xb6   :  { %768 = vmatpush1.bf16.msra.mxu0 %v4290_v6  ;;  %3803 = vmatpush3.bf16.msra.mxu1 %v4293_v7  ;;  %v323_v42 = vpop.permute.xlu0 %322  ;;  %v4902_v6 = vld [vmem:[#allocation5 + $0x94] ss:$12 sps:$4 sm:$0xff]  }
  0xb7   :  { %769 = vmatprep.subr.bf16.mxu0 %v4296_v8  ;;  %3804 = vmatprep.subr.bf16.mxu1 %v5856_v1  ;;  %vm330_vm9 = vcmp.eq.s32.totalorder %v4806_v62, %v323_v42  ;;  %v630_v49 = vrot.slane %v347_v44, 4  ;;  %5910 = vst [vmem:[#allocation14_spill] sm:$0xff] %v4902_v6  ;;  %v4905_v7 = vld [vmem:[#allocation5 + $0x68] ss:$12 sps:$4 sm:$0xff]   ;;  %v4911_v8 = vld [vmem:[#allocation5 + $0x90] ss:$12 sps:$4 sm:$0xff]  }
  0xb8   :  { %v3385_v51 = vsel %vm330_vm9, 1.0, %v5856_v1  ;;  %5911 = vst [vmem:[#allocation15_spill] sm:$0xff] %v4905_v7  ;;  %5912 = vst [vmem:[#allocation16_spill] sm:$0xff] %v4911_v8 }
  0xb9   :  { %v348_v54 = vpack.c.bf16 %v3385_v51, %v3385_v51  ;;  %v631_v55 = vsel %vm626_vm8, %v628_v37, %v630_v49  ;;  %v5010_v37 = vld [vmem:[#allocation5 + $0x158] ss:$12 sps:$4 sm:$0xff]  }
  0xba   :  { %770 = vmatpush1.bf16.msra.mxu0 %v4294_v9  ;;  %3805 = vmatpush3.bf16.msra.mxu1 %v4297_v10  ;;  %v4914_v9 = vld [vmem:[#allocation5 + $0xac] ss:$12 sps:$4 sm:$0xff]  }
  0xbb   :  { %771 = vmatprep.subr.bf16.mxu0 %v4300_v11  ;;  %3806 = vmatprep.subr.bf16.mxu1 %v5856_v1  ;;  %v632_v59 = vrot.slane %v348_v54, 4  ;;  %5913 = vst [vmem:[#allocation17_spill] sm:$0xff] %v4914_v9  ;;  %v4917_v10 = vld [vmem:[#allocation5 + $0x80] ss:$12 sps:$4 sm:$0xff]   ;;  %v4921_v11 = vld [vmem:[#allocation5 + $0xa8] ss:$12 sps:$4 sm:$0xff]  }
  0xbc   :  { %5914 = vst [vmem:[#allocation18_spill] sm:$0xff] %v4917_v10  ;;  %5915 = vst [vmem:[#allocation19_spill] sm:$0xff] %v4921_v11 }
  0xbd   :  { %v633_v3 = vsel %vm626_vm8, %v630_v49, %v632_v59 }
  0xbe   :  { %772 = vmatpush1.bf16.msra.mxu0 %v4298_v13  ;;  %3807 = vmatpush3.bf16.msra.mxu1 %v4301_v14  ;;  %v4927_v13 = vld [vmem:[#allocation5 + $0x98] ss:$12 sps:$4 sm:$0xff]   ;;  %v4931_v14 = vld [vmem:[#allocation5 + $0xc0] ss:$12 sps:$4 sm:$0xff]  }
  0xbf   :  { %773 = vmatprep.subr.bf16.mxu0 %v4304_v15  ;;  %3808 = vmatprep.subr.bf16.mxu1 %v5856_v1  ;;  %5917 = vst [vmem:[#allocation21_spill] sm:$0xff] %v4927_v13  ;;  %v4934_v15 = vld [vmem:[#allocation5 + $0xdc] ss:$12 sps:$4 sm:$0xff]  }
  0xc2   :  { %774 = vmatpush1.bf16.msra.mxu0 %v4302_v16  ;;  %3809 = vmatpush3.bf16.msra.mxu1 %v4305_v17  ;;  %v4937_v16 = vld [vmem:[#allocation5 + $0xb0] ss:$12 sps:$4 sm:$0xff]   ;;  %v4942_v17 = vld [vmem:[#allocation5 + $0xd8] ss:$12 sps:$4 sm:$0xff]  }
  0xc3   :  { %775 = vmatprep.subr.bf16.mxu0 %v4308_v19  ;;  %3810 = vmatprep.subr.bf16.mxu1 %v5856_v1  ;;  %5918 = vst [vmem:[#allocation22_spill] sm:$0xff] %v4937_v16  ;;  %v4949_v19 = vld [vmem:[#allocation5 + $0xc8] ss:$12 sps:$4 sm:$0xff]  }
  0xc6   :  { %776 = vmatpush1.bf16.msra.mxu0 %v4306_v20  ;;  %3811 = vmatpush3.bf16.msra.mxu1 %v4309_v21  ;;  %v4953_v20 = vld [vmem:[#allocation5 + $0xf0] ss:$12 sps:$4 sm:$0xff]   ;;  %v4957_v21 = vld [vmem:[#allocation5 + $0x10c] ss:$12 sps:$4 sm:$0xff]  }
  0xc7   :  { %777 = vmatprep.subr.bf16.mxu0 %v4312_v22  ;;  %3812 = vmatprep.subr.bf16.mxu1 %v5856_v1  ;;  %v4960_v22 = vld [vmem:[#allocation5 + $0xe0] ss:$12 sps:$4 sm:$0xff]  }
  0xca   :  { %778 = vmatpush1.bf16.msra.mxu0 %v4310_v26  ;;  %3813 = vmatpush3.bf16.msra.mxu1 %v4313_v27  ;;  %v4976_v26 = vld [vmem:[#allocation5 + $0x120] ss:$12 sps:$4 sm:$0xff]   ;;  %v4979_v27 = vld [vmem:[#allocation5 + $0x13c] ss:$12 sps:$4 sm:$0xff]  }
  0xcb   :  { %779 = vmatprep.subr.bf16.mxu0 %v4316_v31  ;;  %3814 = vmatprep.subr.bf16.mxu1 %v5856_v1  ;;  %v4992_v31 = vld [vmem:[#allocation5 + $0x128] ss:$12 sps:$4 sm:$0xff]  }
  0xce   :  { %780 = vmatpush1.bf16.msra.mxu0 %v4314_v34  ;;  %3815 = vmatpush3.bf16.msra.mxu1 %v4317_v35  ;;  %v5002_v34 = vld [vmem:[#allocation5 + $0x140] ss:$12 sps:$4 sm:$0xff]   ;;  %v5006_v35 = vld [vmem:[#allocation5 + $0x168] ss:$12 sps:$4 sm:$0xff]  }
  0xcf   :  { %1119 = vmatprep.subr.bf16.mxu0 %v4838_v36  ;;  %3828 = vmatprep.subr.bf16.mxu1 %v5856_v1 }
  0xd1   :  { %798 = vmatmul.mubr.bf16.vlgmr.msra.gmra.mrb[8].mxu0 %v629_v45  ;;  %3817 = vmatmul.mubr.bf16.vlgmr.msra.gmra.mrb[8].mxu1 %v629_v45 }
  0xd2   :  { %1120 = vmatpush1.bf16.msra.mxu0 %v4842_v41  ;;  %807 = vmatprep.mubr.bf16.mxu0 %v5852_v0 }
  0xd3   :  { %1121 = vmatprep.subr.bf16.mxu0 %v4845_v43  ;;  %3820 = vmatprep.mubr.msk.bf16.mxu1 %vm4697_vm0, %v5856_v1 }
  0xd4   :  { %3829 = vmatpush3.bf16.msra.mxu1 %v4849_v46 }
  0xd5   :  { %3830 = vmatprep.subr.bf16.mxu1 %v5856_v1 }
  0xd6   :  { %1122 = vmatpush1.bf16.msra.mxu0 %v4853_v47 }
  0xd7   :  { %1123 = vmatprep.subr.bf16.mxu0 %v4859_v48 }
  0xd8   :  { %3831 = vmatpush3.bf16.msra.mxu1 %v4862_v50 }
  0xd9   :  { %808 = vmatmul.mubr.bf16.gmra.mrb[12].mxu0 %v631_v55  ;;  %3821 = vmatmul.mubr.bf16.gmra.mrb[12].mxu1 %v631_v55 }
  0xda   :  { %1124 = vmatpush1.bf16.msra.mxu0 %v4867_v52  ;;  %817 = vmatprep.mubr.bf16.mxu0 %v5852_v0 }
  0xdb   :  { %1125 = vmatprep.subr.bf16.mxu0 %v4870_v53  ;;  %3824 = vmatprep.mubr.msk.bf16.mxu1 %vm4697_vm0, %v5856_v1 }
  0xdc   :  { %3832 = vmatprep.subr.bf16.mxu1 %v5856_v1 }
  0xdd   :  { %3833 = vmatpush3.bf16.msra.mxu1 %v4874_v56 }
  0xde   :  { %1126 = vmatpush1.bf16.msra.mxu0 %v4877_v57  ;;  %3834 = vmatprep.subr.bf16.mxu1 %v5856_v1 }
  0xdf   :  { %1127 = vmatprep.subr.bf16.mxu0 %v4883_v58 }
  0xe1   :  { %818 = vmatmul.mubr.bf16.gmra.mrb[16].mxu0 %v633_v3  ;;  %3825 = vmatmul.mubr.bf16.gmra.mrb[16].mxu1 %v633_v3 }
  0xe2   :  { %1128 = vmatpush1.bf16.msra.mxu0 %v4888_v61  ;;  %1151 = vmatprep.mubr.bf16.mxu0 %v5852_v0 }
  0xe3   :  { %1129 = vmatprep.subr.bf16.mxu0 %v4892_v63  ;;  %3835 = vmatpush3.bf16.msra.mxu1 %v4894_v2 }
  0xe4   :  { %3836 = vmatprep.subr.bf16.mxu1 %v5856_v1  ;;  %3844 = vmatprep.mubr.msk.bf16.mxu1 %vm4697_vm0, %v5856_v1 }
  0xe6   :  { %1130 = vmatpush1.bf16.msra.mxu0 %v4898_v4 }
  0xe7   :  { %1131 = vmatprep.subr.bf16.mxu0 %v4902_v6  ;;  %3837 = vmatpush3.bf16.msra.mxu1 %v4905_v7 }
  0xe8   :  { %3838 = vmatprep.subr.bf16.mxu1 %v5856_v1 }
  0xea   :  { %1132 = vmatpush1.bf16.msra.mxu0 %v4911_v8 }
  0xeb   :  { %1133 = vmatprep.subr.bf16.mxu0 %v4914_v9  ;;  %3839 = vmatpush3.bf16.msra.mxu1 %v4917_v10 }
  0xec   :  { %3840 = vmatprep.subr.bf16.mxu1 %v5856_v1 }
  0xee   :  { %1134 = vmatpush1.bf16.msra.mxu0 %v4921_v11 }
  0xef   :  { %1350 = vmatprep.subr.bf16.mxu0 %v4924_v12  ;;  %3841 = vmatpush3.bf16.msra.mxu1 %v4927_v13 }
  0xf0   :  { %3842 = vmatprep.subr.bf16.mxu1 %v5856_v1 }
  0xf1   :  { %1152 = vmatmul.mubr.bf16.vlgmr.msra.gmra.mrb[20].mxu0 %v5852_v0 }
  0xf2   :  { %1351 = vmatpush1.bf16.msra.mxu0 %v4931_v14  ;;  %1382 = vmatprep.mubr.bf16.mxu0 %v5852_v0 }
  0xf3   :  { %1352 = vmatprep.subr.bf16.mxu0 %v4934_v15  ;;  %3843 = vmatpush3.bf16.msra.mxu1 %v4937_v16 }
  0xf4   :  { %3848 = vmatprep.subr.bf16.mxu1 %v5856_v1 }
  0xf6   :  { %1353 = vmatpush1.bf16.msra.mxu0 %v4942_v17  ;;  %3845 = vmatmul.mubr.bf16.vlgmr.msra.gmra.mrb[20].mxu1 %v5852_v0 }
  0xf7   :  { %1354 = vmatprep.subr.bf16.mxu0 %v4946_v18  ;;  %3849 = vmatpush3.bf16.msra.mxu1 %v4949_v19 }
  0xf8   :  { %3850 = vmatprep.subr.bf16.mxu1 %v5856_v1  ;;  %3864 = vmatprep.mubr.msk.bf16.mxu1 %vm4697_vm0, %v5856_v1 }
  0xfa   :  { %1355 = vmatpush1.bf16.msra.mxu0 %v4953_v20 }
  0xfb   :  { %1356 = vmatprep.subr.bf16.mxu0 %v4957_v21  ;;  %3851 = vmatpush3.bf16.msra.mxu1 %v4960_v22 }
  0xfc   :  { %3852 = vmatprep.subr.bf16.mxu1 %v5856_v1 }
  0xfe   :  { %1357 = vmatpush1.bf16.msra.mxu0 %v4966_v23 }
  0xff   :  { %1358 = vmatprep.subr.bf16.mxu0 %v4969_v24  ;;  %3853 = vmatpush3.bf16.msra.mxu1 %v4972_v25 }
 0x100   :  { %3854 = vmatprep.subr.bf16.mxu1 %v5856_v1 }
 0x102   :  { %1359 = vmatpush1.bf16.msra.mxu0 %v4976_v26 }
 0x103   :  { %1360 = vmatprep.subr.bf16.mxu0 %v4979_v27  ;;  %3855 = vmatpush3.bf16.msra.mxu1 %v4982_v28 }
 0x104   :  { %3856 = vmatprep.subr.bf16.mxu1 %v5856_v1 }
 0x106   :  { %1361 = vmatpush1.bf16.msra.mxu0 %v4986_v29 }
 0x107   :  { %1362 = vmatprep.subr.bf16.mxu0 %v4989_v30  ;;  %3857 = vmatpush3.bf16.msra.mxu1 %v4992_v31 }
 0x108   :  { %3858 = vmatprep.subr.bf16.mxu1 %v5856_v1 }
 0x10a   :  { %1363 = vmatpush1.bf16.msra.mxu0 %v4996_v32 }
 0x10b   :  { %1364 = vmatprep.subr.bf16.mxu0 %v4999_v33  ;;  %3859 = vmatpush3.bf16.msra.mxu1 %v5002_v34 }
 0x10c   :  { %3860 = vmatprep.subr.bf16.mxu1 %v5856_v1 }
 0x10e   :  { %1365 = vmatpush1.bf16.msra.mxu0 %v5006_v35 }
 0x10f   :  { %3861 = vmatpush3.bf16.msra.mxu1 %v5010_v37  ;;  %1454 = vmatprep.subr.bf16.mxu0 %v4838_v36 }
 0x110   :  { %3862 = vmatprep.subr.bf16.mxu1 %v5856_v1 }
 0x111   :  { %1383 = vmatmul.mubr.bf16.vlgmr.msra.gmra.mrb[24].mxu0 %v5852_v0 }
 0x112   :  { %1455 = vmatpush1.bf16.msra.mxu0 %v4842_v41  ;;  %1486 = vmatprep.mubr.bf16.mxu0 %v5852_v0 }
 0x113   :  { %3863 = vmatpush3.bf16.msra.mxu1 %v5015_v38  ;;  %1456 = vmatprep.subr.bf16.mxu0 %v4845_v43 }
 0x114   :  { %3868 = vmatprep.subr.bf16.mxu1 %v5856_v1 }
 0x116   :  { %3865 = vmatmul.mubr.bf16.vlgmr.msra.gmra.mrb[24].mxu1 %v5852_v0  ;;  %1457 = vmatpush1.bf16.msra.mxu0 %v4853_v47 }
 0x117   :  { %3869 = vmatpush3.bf16.msra.mxu1 %v4849_v46  ;;  %1458 = vmatprep.subr.bf16.mxu0 %v4859_v48 }
 0x118   :  { %3870 = vmatprep.subr.bf16.mxu1 %v5856_v1  ;;  %3884 = vmatprep.mubr.msk.bf16.mxu1 %vm4697_vm0, %v5856_v1 }
 0x11a   :  { %1459 = vmatpush1.bf16.msra.mxu0 %v4867_v52 }
 0x11b   :  { %3871 = vmatpush3.bf16.msra.mxu1 %v4862_v50  ;;  %1460 = vmatprep.subr.bf16.mxu0 %v4870_v53 }
 0x11c   :  { %3872 = vmatprep.subr.bf16.mxu1 %v5856_v1 }
 0x11e   :  { %1461 = vmatpush1.bf16.msra.mxu0 %v4877_v57  ;;  %v5040_v39 = vpop.f32.mrb[0].mxu1 }
 0x11f   :  { %3873 = vmatpush3.bf16.msra.mxu1 %v4874_v56  ;;  %1462 = vmatprep.subr.bf16.mxu0 %v4883_v58  ;;  %5919 = vst [vmem:[#allocation23_spill] sm:$0xff] %v5040_v39  ;;  %v3778_v40 = vpop.f32.mrb[1].mxu1 }
 0x120   :  { %3874 = vmatprep.subr.bf16.mxu1 %v5856_v1  ;;  %v291_v42 = vpop.f32.mrb[2].mxu1 }
 0x121   :  { %v3779_v44 = vpop.f32.mrb[3].mxu1 }
 0x122   :  { %1463 = vmatpush1.bf16.msra.mxu0 %v4888_v61 }
 0x123   :  { %3875 = vmatpush3.bf16.msra.mxu1 %v4894_v2  ;;  %1464 = vmatprep.subr.bf16.mxu0 %v4892_v63 }
 0x124   :  { %3876 = vmatprep.subr.bf16.mxu1 %v5856_v1 }
 0x126   :  { %1465 = vmatpush1.bf16.msra.mxu0 %v4898_v4 }
 0x127   :  { %3877 = vmatpush3.bf16.msra.mxu1 %v4905_v7  ;;  %1466 = vmatprep.subr.bf16.mxu0 %v4902_v6 }
 0x128   :  { %3878 = vmatprep.subr.bf16.mxu1 %v5856_v1 }
 0x12a   :  { %1467 = vmatpush1.bf16.msra.mxu0 %v4911_v8 }
 0x12b   :  { %3879 = vmatpush3.bf16.msra.mxu1 %v4917_v10  ;;  %1468 = vmatprep.subr.bf16.mxu0 %v4914_v9 }
 0x12c   :  { %3880 = vmatprep.subr.bf16.mxu1 %v5856_v1 }
 0x12e   :  { %1469 = vmatpush1.bf16.msra.mxu0 %v4921_v11 }
 0x12f   :  { %3881 = vmatpush3.bf16.msra.mxu1 %v4927_v13  ;;  %1570 = vmatprep.subr.bf16.mxu0 %v4924_v12 }
 0x130   :  { %3882 = vmatprep.subr.bf16.mxu1 %v5856_v1 }
 0x133   :  { %3883 = vmatpush3.bf16.msra.mxu1 %v4937_v16 }
 0x134   :  { %3888 = vmatprep.subr.bf16.mxu1 %v5856_v1 }
 0x184   :  { %v5060_v45 = vpop.f32.mrb[4].mxu0  ;;  %v5062_v49 = vpop.f32.mrb[4].mxu1 }
 0x185   :  { %5920 = vst [vmem:[#allocation24_spill] sm:$0xff] %v5060_v45  ;;  %5921 = vst [vmem:[#allocation25_spill] sm:$0xff] %v5062_v49  ;;  %v5064_v51 = vpop.f32.mrb[5].mxu0  ;;  %v3798_v54 = vpop.f32.mrb[5].mxu1 }
 0x186   :  { %5922 = vst [vmem:[#allocation26_spill] sm:$0xff] %v5064_v51  ;;  %v547_v55 = vpop.f32.mrb[6].mxu0  ;;  %v587_v59 = vpop.f32.mrb[6].mxu1 }
 0x187   :  { %v548_v3 = vpop.f32.mrb[7].mxu0  ;;  %v3799_v40 = vpop.f32.mrb[7].mxu1 }
 0x1a4   :  { %v799_v42 = vpop.f32.mrb[8].mxu0  ;;  %v5066_v44 = vpop.f32.mrb[8].mxu1 }
 0x1a5   :  { %v801_v5 = vpop.f32.mrb[9].mxu0  ;;  %v3818_v60 = vpop.f32.mrb[9].mxu1 }
 0x1a6   :  { %v5068_v0 = vpop.f32.mrb[10].mxu0  ;;  %v5070_v62 = vpop.f32.mrb[10].mxu1 }
 0x1a7   :  { %5923 = vst [vmem:[#allocation27_spill] sm:$0xff] %v5068_v0  ;;  %5924 = vst [vmem:[#allocation28_spill] sm:$0xff] %v5070_v62  ;;  %v5072_v1 = vpop.f32.mrb[11].mxu0  ;;  %v3819_v39 = vpop.f32.mrb[11].mxu1 }
 0x1a8   :  { %5925 = vst [vmem:[#allocation29_spill] sm:$0xff] %v5072_v1 }
 0x1ac   :  { %v5074_v12 = vpop.f32.mrb[12].mxu0  ;;  %v5076_v16 = vpop.f32.mrb[12].mxu1 }
 0x1ad   :  { %5926 = vst [vmem:[#allocation30_spill] sm:$0xff] %v5074_v12  ;;  %5927 = vst [vmem:[#allocation31_spill] sm:$0xff] %v5076_v16  ;;  %v5078_v54 = vpop.f32.mrb[13].mxu0  ;;  %v3822_v55 = vpop.f32.mrb[13].mxu1 }
 0x1ae   :  { %5928 = vst [vmem:[#allocation32_spill] sm:$0xff] %v5078_v54  ;;  %v5080_v59 = vpop.f32.mrb[14].mxu0  ;;  %v5082_v3 = vpop.f32.mrb[14].mxu1 }
 0x1af   :  { %5929 = vst [vmem:[#allocation33_spill] sm:$0xff] %v5080_v59  ;;  %5930 = vst [vmem:[#allocation34_spill] sm:$0xff] %v5082_v3  ;;  %v5084_v40 = vpop.f32.mrb[15].mxu0  ;;  %v3823_v60 = vpop.f32.mrb[15].mxu1 }
 0x1b0   :  { %5931 = vst [vmem:[#allocation35_spill] sm:$0xff] %v5084_v40 }
 0x1b4   :  { %v5086_v0 = vpop.f32.mrb[16].mxu0  ;;  %v5088_v62 = vpop.f32.mrb[16].mxu1 }
 0x1b5   :  { %5932 = vst [vmem:[#allocation36_spill] sm:$0xff] %v5086_v0  ;;  %5933 = vst [vmem:[#allocation37_spill] sm:$0xff] %v5088_v62  ;;  %v5090_v1 = vpop.f32.mrb[17].mxu0  ;;  %v3826_v39 = vpop.f32.mrb[17].mxu1 }
 0x1b6   :  { %5934 = vst [vmem:[#allocation38_spill] sm:$0xff] %v5090_v1  ;;  %v5092_v12 = vpop.f32.mrb[18].mxu0  ;;  %v5094_v16 = vpop.f32.mrb[18].mxu1 }
 0x1b7   :  { %5935 = vst [vmem:[#allocation39_spill] sm:$0xff] %v5092_v12  ;;  %5936 = vst [vmem:[#allocation40_spill] sm:$0xff] %v5094_v16  ;;  %v5096_v54 = vpop.f32.mrb[19].mxu0  ;;  %v3827_v55 = vpop.f32.mrb[19].mxu1 }
 0x1b8   :  { %5937 = vst [vmem:[#allocation41_spill] sm:$0xff] %v5096_v54 }
 0x1c4   :  { %v1153_v59 = vpop.f32.mrb[20].mxu0 }
 0x1c5   :  { %v1200_v3 = vadd.f32 %v1153_v59, %v5060_v45  ;;  %v1155_v11 = vpop.f32.mrb[21].mxu0  ;;  %v5103_v59 = vld [vmem:[%s5847_s4] ss:$0 sm:$0xff] }
 0x1c6   :  { %v1207_v60 = vadd.f32 %v1155_v11, %v5064_v51  ;;  %v1157_v40 = vpop.f32.mrb[22].mxu0  ;;  %5938 = vst [vmem:[#allocation42_spill] sm:$0xff] %v5103_v59 }
 0x1c7   :  { %v3463_v0 = vmul.f32 -1.442695, %v1200_v3  ;;  %v1158_v9 = vpop.f32.mrb[23].mxu0 }
 0x1c8   :  { %v3464_v13 = vmul.f32 -1.442695, %v1207_v60 }
 0x1c9   :  { %4414 = vpow2.f32 %v3463_v0  ;;  %v1194_v62 = vpop.f32.mrb[20].mxu1 }
 0x1ca   :  { %v3846_v1 = vpop.f32.mrb[21].mxu1  ;;  %4416 = vpow2.f32 %v3464_v13  ;;  %v1214_v3 = vadd.f32 %v1194_v62, %v5103_v59 }
 0x1cb   :  { %v1197_v39 = vpop.f32.mrb[22].mxu1 }
 0x1cc   :  { %v3847_v12 = vpop.f32.mrb[23].mxu1 }
 0x1d3   :  { %v4415_v16 = vpop.eup %4414 }
 0x1d4   :  { %v1204_v8 = vadd.f32 1.0, %v4415_v16  ;;  %v4417_v55 = vpop.eup %4416 }
 0x1d5   :  { %v1211_v11 = vadd.f32 1.0, %v4417_v55 }
 0x1d6   :  { %4418 = vrcp.f32 %v1204_v8 }
 0x1d7   :  { %4420 = vrcp.f32 %v1211_v11 }
 0x1e0   :  { %v4419_v9 = vpop.eup %4418 }
 0x1e1   :  { %v1215_v0 = vmul.f32 %v4419_v9, %v1214_v3  ;;  %v4421_v45 = vpop.eup %4420 }
 0x1e2   :  { %v1218_v59 = vsub.f32 1.0, %v4421_v45  ;;  %v1220_v9 = vmul.f32 0.0, %v4421_v45 }
 0x1e3   :  { %v1216_v1 = vadd.f32 %v1215_v0, %v5062_v49 }
 0x1e4   :  { %v1384_v40 = vpop.f32.mrb[24].mxu0 }
 0x1e5   :  { %4422 = vtanh.f32 %v1216_v1  ;;  %v1431_v12 = vadd.f32 %v1384_v40, %v799_v42  ;;  %v1386_v13 = vpop.f32.mrb[25].mxu0 }
 0x1e6   :  { %v1438_v16 = vadd.f32 %v1386_v13, %v801_v5  ;;  %v1388_v8 = vpop.f32.mrb[26].mxu0 }
 0x1e7   :  { %v3489_v60 = vmul.f32 -1.442695, %v1431_v12  ;;  %v1389_v39 = vpop.f32.mrb[27].mxu0 }
 0x1e8   :  { %v3490_v6 = vmul.f32 -1.442695, %v1438_v16 }
 0x1e9   :  { %4424 = vpow2.f32 %v3489_v60  ;;  %v1425_v54 = vpop.f32.mrb[24].mxu1 }
 0x1ea   :  { %v3866_v51 = vpop.f32.mrb[25].mxu1  ;;  %4426 = vpow2.f32 %v3490_v6  ;;  %v5940_v6 = vmov 0  }
 0x1eb   :  { %v1428_v55 = vpop.f32.mrb[26].mxu1  ;;  %v5939_v51 = vmov 0.0  }
 0x1ec   :  { %v3867_v62 = vpop.f32.mrb[27].mxu1 }
 0x1ef   :  { %v4423_v11 = vpop.eup %4422 }
 0x1f0   :  { %v1219_v3 = vmul.f32 %v4423_v11, %v1218_v59  ;;  %v5121_v59 = vld [vmem:[%s5847_s4 + $0x8] ss:$0 sm:$0xff] }
 0x1f1   :  { %v1445_v12 = vadd.f32 %v1425_v54, %v5121_v59 }
 0x1f2   :  { %v5107_v0 = vadd.f32 %v1220_v9, %v1219_v3  ;;  %v5941_v3 = vld [vmem:[#allocation14_spill] sm:$0xff]  ;;  %v5942_v9 = vld [vmem:[#allocation16_spill] sm:$0xff] }
 0x1f3   :  { %v4425_v42 = vpop.eup %4424 }
 0x1f4   :  { %v1435_v1 = vadd.f32 1.0, %v4425_v42  ;;  %v1453_v5 = vpack.c.bf16 %v5107_v0, %v5107_v0  ;;  %v4427_v45 = vpop.eup %4426  ;;  %v5943_v42 = vld [vmem:[#allocation21_spill] sm:$0xff] }
 0x1f5   :  { %v1442_v40 = vadd.f32 1.0, %v4427_v45  ;;  %v5946_v45 = vld [vmem:[#allocation22_spill] sm:$0xff] }
 0x1f6   :  { %4428 = vrcp.f32 %v1435_v1  ;;  %1487 = vmatmul.mubr.bf16.vlgmr.msra.gmra.mrb[28].mxu0 %v1453_v5  ;;  %3885 = vmatmul.mubr.bf16.vlgmr.msra.gmra.mrb[28].mxu1 %v1453_v5  ;;  %v5944_v1 = vld [vmem:[#allocation17_spill] sm:$0xff]  ;;  %v5945_v5 = vld [vmem:[#allocation19_spill] sm:$0xff] }
 0x1f7   :  { %1571 = vmatpush1.bf16.msra.mxu0 %v4931_v14  ;;  %3889 = vmatpush3.bf16.msra.mxu1 %v4949_v19  ;;  %4430 = vrcp.f32 %v1442_v40  ;;  %v5947_v40 = vld [vmem:[#allocation20_spill] sm:$0xff] }
 0x1f8   :  { %1572 = vmatprep.subr.bf16.mxu0 %v4934_v15  ;;  %3890 = vmatprep.subr.bf16.mxu1 %v5939_v51 }
 0x1f9   :  { %1602 = vmatprep.mubr.bf16.mxu0 %v5940_v6  ;;  %3904 = vmatprep.mubr.msk.bf16.mxu1 %vm4697_vm0, %v5939_v51 }
 0x1fb   :  { %1573 = vmatpush1.bf16.msra.mxu0 %v4942_v17  ;;  %3891 = vmatpush3.bf16.msra.mxu1 %v4960_v22 }
 0x1fc   :  { %1574 = vmatprep.subr.bf16.mxu0 %v4946_v18  ;;  %3892 = vmatprep.subr.bf16.mxu1 %v5939_v51 }
 0x1ff   :  { %1575 = vmatpush1.bf16.msra.mxu0 %v4953_v20  ;;  %3893 = vmatpush3.bf16.msra.mxu1 %v4972_v25 }
 0x200   :  { %v4429_v13 = vpop.eup %4428  ;;  %1576 = vmatprep.subr.bf16.mxu0 %v4957_v21  ;;  %3894 = vmatprep.subr.bf16.mxu1 %v5939_v51 }
 0x201   :  { %v1446_v16 = vmul.f32 %v4429_v13, %v1445_v12  ;;  %v4431_v54 = vpop.eup %4430 }
 0x202   :  { %v1451_v55 = vmul.f32 0.0, %v4431_v54 }
 0x203   :  { %v1447_v8 = vadd.f32 %v1446_v16, %v5066_v44  ;;  %1577 = vmatpush1.bf16.msra.mxu0 %v4966_v23  ;;  %3895 = vmatpush3.bf16.msra.mxu1 %v4982_v28  ;;  %v1449_v44 = vsub.f32 1.0, %v4431_v54 }
 0x204   :  { %1578 = vmatprep.subr.bf16.mxu0 %v4969_v24  ;;  %3896 = vmatprep.subr.bf16.mxu1 %v5939_v51 }
 0x205   :  { %4432 = vtanh.f32 %v1447_v8 }
 0x207   :  { %1579 = vmatpush1.bf16.msra.mxu0 %v4976_v26  ;;  %3897 = vmatpush3.bf16.msra.mxu1 %v4992_v31 }
 0x208   :  { %1580 = vmatprep.subr.bf16.mxu0 %v4979_v27  ;;  %3898 = vmatprep.subr.bf16.mxu1 %v5939_v51 }
 0x20b   :  { %1581 = vmatpush1.bf16.msra.mxu0 %v4986_v29  ;;  %3899 = vmatpush3.bf16.msra.mxu1 %v5002_v34 }
 0x20c   :  { %1582 = vmatprep.subr.bf16.mxu0 %v4989_v30  ;;  %3900 = vmatprep.subr.bf16.mxu1 %v5939_v51 }
 0x20f   :  { %v4433_v60 = vpop.eup %4432  ;;  %1583 = vmatpush1.bf16.msra.mxu0 %v4996_v32  ;;  %3901 = vmatpush3.bf16.msra.mxu1 %v5010_v37 }
 0x210   :  { %1584 = vmatprep.subr.bf16.mxu0 %v4999_v33  ;;  %3902 = vmatprep.subr.bf16.mxu1 %v5939_v51  ;;  %v1450_v39 = vmul.f32 %v4433_v60, %v1449_v44 }
 0x212   :  { %v5149_v62 = vadd.f32 %v1451_v55, %v1450_v39  ;;  %v5948_v55 = vld [vmem:[#allocation24_spill] sm:$0xff] }
 0x213   :  { %1585 = vmatpush1.bf16.msra.mxu0 %v5006_v35  ;;  %3903 = vmatpush3.bf16.msra.mxu1 %v5015_v38 }
 0x214   :  { %v1569_v11 = vpack.c.bf16 %v5149_v62, %v5149_v62  ;;  %1678 = vmatprep.subr.bf16.mxu0 %v4838_v36  ;;  %3908 = vmatprep.subr.bf16.mxu1 %v5939_v51 }
 0x216   :  { %1603 = vmatmul.mubr.bf16.vlgmr.msra.gmra.mrb[32].mxu0 %v1569_v11  ;;  %3905 = vmatmul.mubr.bf16.vlgmr.msra.gmra.mrb[32].mxu1 %v1569_v11 }
 0x217   :  { %1679 = vmatpush1.bf16.msra.mxu0 %v4842_v41  ;;  %3909 = vmatpush3.bf16.msra.mxu1 %v4849_v46 }
 0x218   :  { %1680 = vmatprep.subr.bf16.mxu0 %v4845_v43  ;;  %3910 = vmatprep.subr.bf16.mxu1 %v5939_v51 }
 0x219   :  { %1710 = vmatprep.mubr.bf16.mxu0 %v5940_v6  ;;  %3924 = vmatprep.mubr.msk.bf16.mxu1 %vm4697_vm0, %v5939_v51 }
 0x21b   :  { %1681 = vmatpush1.bf16.msra.mxu0 %v4853_v47  ;;  %3911 = vmatpush3.bf16.msra.mxu1 %v4862_v50 }
 0x21c   :  { %1682 = vmatprep.subr.bf16.mxu0 %v4859_v48  ;;  %3912 = vmatprep.subr.bf16.mxu1 %v5939_v51 }
 0x21f   :  { %1683 = vmatpush1.bf16.msra.mxu0 %v4867_v52  ;;  %3913 = vmatpush3.bf16.msra.mxu1 %v4874_v56 }
 0x220   :  { %1684 = vmatprep.subr.bf16.mxu0 %v4870_v53  ;;  %3914 = vmatprep.subr.bf16.mxu1 %v5939_v51 }
 0x223   :  { %1685 = vmatpush1.bf16.msra.mxu0 %v4877_v57  ;;  %3915 = vmatpush3.bf16.msra.mxu1 %v4894_v2 }
 0x224   :  { %1686 = vmatprep.subr.bf16.mxu0 %v4883_v58  ;;  %3916 = vmatprep.subr.bf16.mxu1 %v5939_v51 }
 0x227   :  { %1687 = vmatpush1.bf16.msra.mxu0 %v4888_v61  ;;  %3917 = vmatpush3.bf16.msra.mxu1 %v4905_v7 }
 0x228   :  { %1688 = vmatprep.subr.bf16.mxu0 %v4892_v63  ;;  %3918 = vmatprep.subr.bf16.mxu1 %v5939_v51 }
 0x22b   :  { %1689 = vmatpush1.bf16.msra.mxu0 %v4898_v4  ;;  %3919 = vmatpush3.bf16.msra.mxu1 %v4917_v10 }
 0x22c   :  { %1690 = vmatprep.subr.bf16.mxu0 %v5941_v3  ;;  %3920 = vmatprep.subr.bf16.mxu1 %v5939_v51 }
 0x22f   :  { %1691 = vmatpush1.bf16.msra.mxu0 %v5942_v9  ;;  %3921 = vmatpush3.bf16.msra.mxu1 %v5943_v42  ;;  %v5949_v9 = vld [vmem:[#allocation26_spill] sm:$0xff] }
 0x230   :  { %1692 = vmatprep.subr.bf16.mxu0 %v5944_v1  ;;  %3922 = vmatprep.subr.bf16.mxu1 %v5939_v51 }
 0x233   :  { %1693 = vmatpush1.bf16.msra.mxu0 %v5945_v5  ;;  %3923 = vmatpush3.bf16.msra.mxu1 %v5946_v45 }
 0x234   :  { %1794 = vmatprep.subr.bf16.mxu0 %v5947_v40  ;;  %3928 = vmatprep.subr.bf16.mxu1 %v5939_v51 }
 0x2c9   :  { %v1488_v12 = vpop.f32.mrb[28].mxu0  ;;  %v1529_v13 = vpop.f32.mrb[28].mxu1 }
 0x2ca   :  { %v1536_v16 = vrot.slane %v1488_v12, 7  ;;  %v1490_v8 = vpop.f32.mrb[29].mxu0  ;;  %v3886_v54 = vpop.f32.mrb[29].mxu1  ;;  %v5950_v12 = vld [vmem:[#allocation42_spill] sm:$0xff] }
 0x2cb   :  { %v1546_v44 = vrot.slane %v1490_v8, 7  ;;  %v1492_v60 = vpop.f32.mrb[30].mxu0  ;;  %v1532_v39 = vpop.f32.mrb[30].mxu1  ;;  %v1555_v8 = vadd.f32 %v1529_v13, %v5950_v12 }
 0x2cc   :  { %v1538_v11 = vadd.f32 %v1536_v16, %v5948_v55  ;;  %v1493_v1 = vpop.f32.mrb[31].mxu0  ;;  %v3887_v42 = vpop.f32.mrb[31].mxu1  ;;  %v1565_v16 = vrot.slane %v5107_v0, 7 }
 0x2cd   :  { %v1548_v5 = vadd.f32 %v1546_v44, %v5949_v9  ;;  %v1557_v54 = vrot.slane %v1555_v8, 7 }
 0x2ce   :  { %v3491_v3 = vmul.f32 -1.442695, %v1538_v11 }
 0x2cf   :  { %v3492_v45 = vmul.f32 -1.442695, %v1548_v5  ;;  %v5951_v5 = vld [vmem:[#allocation27_spill] sm:$0xff] }
 0x2d0   :  { %4434 = vpow2.f32 %v3491_v3 }
 0x2d1   :  { %4436 = vpow2.f32 %v3492_v45 }
 0x2da   :  { %v4435_v40 = vpop.eup %4434 }
 0x2db   :  { %v4437_v10 = vpop.eup %4436  ;;  %v1542_v4 = vadd.f32 1.0, %v4435_v40 }
 0x2dc   :  { %v1552_v63 = vadd.f32 1.0, %v4437_v10  ;;  %v5952_v10 = vld [vmem:[#allocation29_spill] sm:$0xff] }
 0x2dd   :  { %4438 = vrcp.f32 %v1542_v4 }
 0x2de   :  { %4440 = vrcp.f32 %v1552_v63 }
 0x2e7   :  { %v4439_v60 = vpop.eup %4438 }
 0x2e8   :  { %v4441_v1 = vpop.eup %4440  ;;  %v1559_v42 = vmul.f32 %v4439_v60, %v1557_v54 }
 0x2e9   :  { %v1604_v39 = vpop.f32.mrb[32].mxu0  ;;  %v1645_v44 = vpop.f32.mrb[32].mxu1  ;;  %v1567_v11 = vmul.f32 %v4441_v1, %v1565_v16  ;;  %v1562_v54 = vsub.f32 1.0, %v4441_v1 }
 0x2ea   :  { %v1560_v3 = vadd.f32 %v1559_v42, %v5062_v49  ;;  %v1651_v45 = vadd.f32 %v1604_v39, %v5951_v5  ;;  %v1606_v9 = vpop.f32.mrb[33].mxu0  ;;  %v3906_v40 = vpop.f32.mrb[33].mxu1 }
 0x2eb   :  { %v1658_v4 = vadd.f32 %v1606_v9, %v5952_v10  ;;  %v1608_v63 = vpop.f32.mrb[34].mxu0  ;;  %v1648_v55 = vpop.f32.mrb[34].mxu1 }
 0x2ec   :  { %4442 = vtanh.f32 %v1560_v3  ;;  %v3493_v13 = vmul.f32 -1.442695, %v1651_v45  ;;  %v1609_v8 = vpop.f32.mrb[35].mxu0  ;;  %v3907_v12 = vpop.f32.mrb[35].mxu1  ;;  %v5953_v3 = vld [vmem:[#allocation28_spill] sm:$0xff] }
 0x2ed   :  { %v3494_v0 = vmul.f32 -1.442695, %v1658_v4 }
 0x2ee   :  { %4444 = vpow2.f32 %v3493_v13 }
 0x2ef   :  { %4446 = vpow2.f32 %v3494_v0 }
 0x2f6   :  { %v4443_v60 = vpop.eup %4442 }
 0x2f7   :  { %v1563_v16 = vmul.f32 %v4443_v60, %v1562_v54 }
 0x2f8   :  { %v4445_v7 = vpop.eup %4444 }
 0x2f9   :  { %v1655_v42 = vadd.f32 1.0, %v4445_v7  ;;  %v5199_v49 = vadd.f32 %v1567_v11, %v1563_v16  ;;  %v4447_v55 = vpop.eup %4446  ;;  %v1665_v7 = vadd.f32 %v1645_v44, %v5121_v59  ;;  %v5965_v16 = vld [vmem:[#allocation24_spill] sm:$0xff] }
 0x2fa   :  { %v1662_v12 = vadd.f32 1.0, %v4447_v55  ;;  %v5966_v55 = vld [vmem:[#allocation26_spill] sm:$0xff] }
 0x2fb   :  { %4448 = vrcp.f32 %v1655_v42  ;;  %v1673_v9 = vpack.c.bf16 %v5199_v49, %v5199_v49 }
 0x2fc   :  { %4450 = vrcp.f32 %v1662_v12 }
 0x2fd   :  { %v1675_v39 = vshrl.u32 %v1673_v9, 16 }
 0x2ff   :  { %1711 = vmatmul.mubr.bf16.vlgmr.msra.gmra.mrb[36].mxu0 %v1675_v39  ;;  %3925 = vmatmul.mubr.bf16.vlgmr.msra.gmra.mrb[36].mxu1 %v1675_v39 }
 0x300   :  { %1795 = vmatpush1.bf16.msra.mxu0 %v4931_v14  ;;  %3929 = vmatpush3.bf16.msra.mxu1 %v4949_v19 }
 0x301   :  { %1796 = vmatprep.subr.bf16.mxu0 %v4934_v15  ;;  %3930 = vmatprep.subr.bf16.mxu1 %v5939_v51 }
 0x302   :  { %1826 = vmatprep.mubr.bf16.mxu0 %v5940_v6  ;;  %3944 = vmatprep.mubr.msk.bf16.mxu1 %vm4697_vm0, %v5939_v51 }
 0x304   :  { %1797 = vmatpush1.bf16.msra.mxu0 %v4942_v17  ;;  %3931 = vmatpush3.bf16.msra.mxu1 %v4960_v22 }
 0x305   :  { %v4449_v1 = vpop.eup %4448  ;;  %1798 = vmatprep.subr.bf16.mxu0 %v4946_v18  ;;  %3932 = vmatprep.subr.bf16.mxu1 %v5939_v51 }
 0x306   :  { %v1666_v11 = vmul.f32 %v4449_v1, %v1665_v7  ;;  %v4451_v44 = vpop.eup %4450 }
 0x307   :  { %v1669_v45 = vsub.f32 1.0, %v4451_v44  ;;  %v1671_v4 = vmul.f32 %v4451_v44, %v5149_v62 }
 0x308   :  { %v1667_v5 = vadd.f32 %v1666_v11, %v5953_v3  ;;  %1799 = vmatpush1.bf16.msra.mxu0 %v4953_v20  ;;  %3933 = vmatpush3.bf16.msra.mxu1 %v4972_v25 }
 0x309   :  { %1800 = vmatprep.subr.bf16.mxu0 %v4957_v21  ;;  %3934 = vmatprep.subr.bf16.mxu1 %v5939_v51 }
 0x30a   :  { %4452 = vtanh.f32 %v1667_v5 }
 0x30c   :  { %1801 = vmatpush1.bf16.msra.mxu0 %v4966_v23  ;;  %3935 = vmatpush3.bf16.msra.mxu1 %v4982_v28 }
 0x30d   :  { %1802 = vmatprep.subr.bf16.mxu0 %v4969_v24  ;;  %3936 = vmatprep.subr.bf16.mxu1 %v5939_v51 }
 0x310   :  { %1803 = vmatpush1.bf16.msra.mxu0 %v4976_v26  ;;  %3937 = vmatpush3.bf16.msra.mxu1 %v4992_v31 }
 0x311   :  { %1804 = vmatprep.subr.bf16.mxu0 %v4979_v27  ;;  %3938 = vmatprep.subr.bf16.mxu1 %v5939_v51 }
 0x314   :  { %v4453_v40 = vpop.eup %4452  ;;  %1805 = vmatpush1.bf16.msra.mxu0 %v4986_v29  ;;  %3939 = vmatpush3.bf16.msra.mxu1 %v5002_v34 }
 0x315   :  { %1806 = vmatprep.subr.bf16.mxu0 %v4989_v30  ;;  %3940 = vmatprep.subr.bf16.mxu1 %v5939_v51  ;;  %v1670_v10 = vmul.f32 %v4453_v40, %v1669_v45  ;;  %v5967_v45 = vld [vmem:[#allocation42_spill] sm:$0xff] }
 0x317   :  { %v5233_v63 = vadd.f32 %v1671_v4, %v1670_v10 }
 0x318   :  { %1807 = vmatpush1.bf16.msra.mxu0 %v4996_v32  ;;  %3941 = vmatpush3.bf16.msra.mxu1 %v5010_v37 }
 0x319   :  { %1808 = vmatprep.subr.bf16.mxu0 %v4999_v33  ;;  %3942 = vmatprep.subr.bf16.mxu1 %v5939_v51  ;;  %v1793_v13 = vpack.c.bf16 %v5233_v63, %v5233_v63 }
 0x31c   :  { %1809 = vmatpush1.bf16.msra.mxu0 %v5006_v35  ;;  %3943 = vmatpush3.bf16.msra.mxu1 %v5015_v38 }
 0x31d   :  { %1901 = vmatprep.subr.bf16.mxu0 %v4838_v36  ;;  %3948 = vmatprep.subr.bf16.mxu1 %v5939_v51  ;;  %v5954_v36 = vld [vmem:[#allocation15_spill] sm:$0xff] }
 0x31f   :  { %1827 = vmatmul.mubr.bf16.vlgmr.msra.gmra.mrb[40].mxu0 %v1793_v13  ;;  %3945 = vmatmul.mubr.bf16.vlgmr.msra.gmra.mrb[40].mxu1 %v1793_v13  ;;  %v1789_v13 = vrot.slane %v5199_v49, 7 }
 0x320   :  { %1902 = vmatpush1.bf16.msra.mxu0 %v4842_v41  ;;  %3949 = vmatpush3.bf16.msra.mxu1 %v4849_v46  ;;  %v5955_v41 = vld [vmem:[#allocation12_spill] sm:$0xff]  ;;  %v5957_v46 = vld [vmem:[#allocation18_spill] sm:$0xff] }
 0x321   :  { %1903 = vmatprep.subr.bf16.mxu0 %v4845_v43  ;;  %3950 = vmatprep.subr.bf16.mxu1 %v5939_v51  ;;  %v5956_v43 = vld [vmem:[#allocation13_spill] sm:$0xff] }
 0x322   :  { %1933 = vmatprep.mubr.bf16.mxu0 %v5940_v6  ;;  %3964 = vmatprep.mubr.msk.bf16.mxu1 %vm4697_vm0, %v5939_v51 }
 0x324   :  { %1904 = vmatpush1.bf16.msra.mxu0 %v4853_v47  ;;  %3951 = vmatpush3.bf16.msra.mxu1 %v4862_v50  ;;  %v5958_v47 = vld [vmem:[#allocation14_spill] sm:$0xff]  ;;  %v5960_v50 = vld [vmem:[#allocation21_spill] sm:$0xff] }
 0x325   :  { %1905 = vmatprep.subr.bf16.mxu0 %v4859_v48  ;;  %3952 = vmatprep.subr.bf16.mxu1 %v5939_v51  ;;  %v5959_v48 = vld [vmem:[#allocation16_spill] sm:$0xff] }
 0x328   :  { %1906 = vmatpush1.bf16.msra.mxu0 %v4867_v52  ;;  %3953 = vmatpush3.bf16.msra.mxu1 %v4874_v56  ;;  %v5961_v52 = vld [vmem:[#allocation17_spill] sm:$0xff]  ;;  %v5963_v56 = vld [vmem:[#allocation22_spill] sm:$0xff] }
 0x329   :  { %1907 = vmatprep.subr.bf16.mxu0 %v4870_v53  ;;  %3954 = vmatprep.subr.bf16.mxu1 %v5939_v51  ;;  %v5962_v53 = vld [vmem:[#allocation19_spill] sm:$0xff] }
 0x32c   :  { %1908 = vmatpush1.bf16.msra.mxu0 %v4877_v57  ;;  %3955 = vmatpush3.bf16.msra.mxu1 %v4894_v2  ;;  %v5964_v57 = vld [vmem:[#allocation20_spill] sm:$0xff] }
 0x32d   :  { %1909 = vmatprep.subr.bf16.mxu0 %v4883_v58  ;;  %3956 = vmatprep.subr.bf16.mxu1 %v5939_v51 }
 0x330   :  { %1910 = vmatpush1.bf16.msra.mxu0 %v4888_v61  ;;  %3957 = vmatpush3.bf16.msra.mxu1 %v5954_v36 }
 0x331   :  { %1911 = vmatprep.subr.bf16.mxu0 %v5955_v41  ;;  %3958 = vmatprep.subr.bf16.mxu1 %v5939_v51 }
 0x334   :  { %1912 = vmatpush1.bf16.msra.mxu0 %v5956_v43  ;;  %3959 = vmatpush3.bf16.msra.mxu1 %v5957_v46 }
 0x335   :  { %1913 = vmatprep.subr.bf16.mxu0 %v5958_v47  ;;  %3960 = vmatprep.subr.bf16.mxu1 %v5939_v51 }
 0x338   :  { %1914 = vmatpush1.bf16.msra.mxu0 %v5959_v48  ;;  %3961 = vmatpush3.bf16.msra.mxu1 %v5960_v50  ;;  %v5968_v48 = vld [vmem:[#allocation25_spill] sm:$0xff] }
 0x339   :  { %1915 = vmatprep.subr.bf16.mxu0 %v5961_v52  ;;  %3962 = vmatprep.subr.bf16.mxu1 %v5939_v51  ;;  %v5969_v52 = vld [vmem:[#allocation30_spill] sm:$0xff] }
 0x33c   :  { %1916 = vmatpush1.bf16.msra.mxu0 %v5962_v53  ;;  %3963 = vmatpush3.bf16.msra.mxu1 %v5963_v56 }
 0x33d   :  { %2017 = vmatprep.subr.bf16.mxu0 %v5964_v57  ;;  %3968 = vmatprep.subr.bf16.mxu1 %v5939_v51 }
 0x3d2   :  { %v1712_v58 = vpop.f32.mrb[36].mxu0  ;;  %v1753_v61 = vpop.f32.mrb[36].mxu1 }
 0x3d3   :  { %v1760_v2 = vrot.slane %v1712_v58, 6  ;;  %v1714_v62 = vpop.f32.mrb[37].mxu0  ;;  %v3926_v8 = vpop.f32.mrb[37].mxu1  ;;  %v1779_v40 = vadd.f32 %v1753_v61, %v5967_v45  ;;  %v5970_v58 = vld [vmem:[#allocation32_spill] sm:$0xff] }
 0x3d4   :  { %v1770_v0 = vrot.slane %v1714_v62, 6  ;;  %v1716_v54 = vpop.f32.mrb[38].mxu0  ;;  %v1756_v60 = vpop.f32.mrb[38].mxu1 }
 0x3d5   :  { %v1762_v42 = vadd.f32 %v1760_v2, %v5965_v16  ;;  %v1717_v9 = vpop.f32.mrb[39].mxu0  ;;  %v3927_v39 = vpop.f32.mrb[39].mxu1  ;;  %v1781_v10 = vrot.slane %v1779_v40, 6 }
 0x3d6   :  { %v1772_v12 = vadd.f32 %v1770_v0, %v5966_v55 }
 0x3d7   :  { %v3495_v7 = vmul.f32 -1.442695, %v1762_v42 }
 0x3d8   :  { %v3496_v1 = vmul.f32 -1.442695, %v1772_v12 }
 0x3d9   :  { %4454 = vpow2.f32 %v3495_v7 }
 0x3da   :  { %4456 = vpow2.f32 %v3496_v1 }
 0x3e3   :  { %v4455_v11 = vpop.eup %4454 }
 0x3e4   :  { %v4457_v3 = vpop.eup %4456  ;;  %v1766_v5 = vadd.f32 1.0, %v4455_v11 }
 0x3e5   :  { %v1776_v44 = vadd.f32 1.0, %v4457_v3 }
 0x3e6   :  { %4458 = vrcp.f32 %v1766_v5 }
 0x3e7   :  { %4460 = vrcp.f32 %v1776_v44 }
 0x3f0   :  { %v4459_v4 = vpop.eup %4458 }
 0x3f1   :  { %v4461_v36 = vpop.eup %4460  ;;  %v1783_v41 = vmul.f32 %v4459_v4, %v1781_v10  ;;  %v5381_v10 = vld [vmem:[#allocation5 + $0x68] ss:$12 sps:$4 sm:$0xff]  }
 0x3f2   :  { %v1828_v43 = vpop.f32.mrb[40].mxu0  ;;  %v1869_v46 = vpop.f32.mrb[40].mxu1  ;;  %v1791_v47 = vmul.f32 %v4461_v36, %v1789_v13  ;;  %v1786_v60 = vsub.f32 1.0, %v4461_v36  ;;  %v5384_v4 = vld [vmem:[#allocation5 + $0x7c] ss:$12 sps:$4 sm:$0xff]  }
 0x3f3   :  { %v1784_v50 = vadd.f32 %v1783_v41, %v5968_v48  ;;  %v1875_v53 = vadd.f32 %v1828_v43, %v5969_v52  ;;  %v1830_v56 = vpop.f32.mrb[41].mxu0  ;;  %v3946_v57 = vpop.f32.mrb[41].mxu1  ;;  %v1889_v44 = vadd.f32 %v1869_v46, %v5121_v59  ;;  %5972 = vst [vmem:[#allocation27_spill] sm:$0xff] %v5384_v4  ;;  %v5388_v13 = vld [vmem:[#allocation5 + $0x78] ss:$12 sps:$4 sm:$0xff]  }
 0x3f4   :  { %v1882_v2 = vadd.f32 %v1830_v56, %v5970_v58  ;;  %v1832_v62 = vpop.f32.mrb[42].mxu0  ;;  %v1872_v8 = vpop.f32.mrb[42].mxu1  ;;  %5973 = vst [vmem:[#allocation29_spill] sm:$0xff] %v5388_v13  ;;  %v5391_v36 = vld [vmem:[#allocation5 + $0x80] ss:$12 sps:$4 sm:$0xff]  }
 0x3f5   :  { %4462 = vtanh.f32 %v1784_v50  ;;  %v3497_v61 = vmul.f32 -1.442695, %v1875_v53  ;;  %v1833_v0 = vpop.f32.mrb[43].mxu0  ;;  %v3947_v54 = vpop.f32.mrb[43].mxu1  ;;  %5974 = vst [vmem:[#allocation28_spill] sm:$0xff] %v5391_v36 }
 0x3f6   :  { %v3498_v49 = vmul.f32 -1.442695, %v1882_v2  ;;  %v5394_v41 = vld [vmem:[#allocation5 + $0x94] ss:$12 sps:$4 sm:$0xff]   ;;  %v5398_v43 = vld [vmem:[#allocation5 + $0x90] ss:$12 sps:$4 sm:$0xff]  }
 0x3f7   :  { %4464 = vpow2.f32 %v3497_v61  ;;  %5975 = vst [vmem:[#allocation15_spill] sm:$0xff] %v5394_v41  ;;  %5976 = vst [vmem:[#allocation12_spill] sm:$0xff] %v5398_v43  ;;  %v5401_v46 = vld [vmem:[#allocation5 + $0x98] ss:$12 sps:$4 sm:$0xff]   ;;  %v5408_v50 = vld [vmem:[#allocation5 + $0xa8] ss:$12 sps:$4 sm:$0xff]  }
 0x3f8   :  { %4466 = vpow2.f32 %v3498_v49  ;;  %5977 = vst [vmem:[#allocation13_spill] sm:$0xff] %v5401_v46  ;;  %5979 = vst [vmem:[#allocation14_spill] sm:$0xff] %v5408_v50  ;;  %v5411_v52 = vld [vmem:[#allocation5 + $0xb0] ss:$12 sps:$4 sm:$0xff]  }
 0x3f9   :  { %5980 = vst [vmem:[#allocation16_spill] sm:$0xff] %v5411_v52  ;;  %v5414_v53 = vld [vmem:[#allocation5 + $0xc4] ss:$12 sps:$4 sm:$0xff]  }
 0x3ff   :  { %v4463_v42 = vpop.eup %4462 }
 0x400   :  { %v1787_v9 = vmul.f32 %v4463_v42, %v1786_v60 }
 0x401   :  { %v4465_v39 = vpop.eup %4464 }
 0x402   :  { %v1879_v12 = vadd.f32 1.0, %v4465_v39  ;;  %v5287_v7 = vadd.f32 %v1791_v47, %v1787_v9  ;;  %v4467_v3 = vpop.eup %4466  ;;  %v5404_v47 = vld [vmem:[#allocation5 + $0xac] ss:$12 sps:$4 sm:$0xff]  }
 0x403   :  { %v1886_v5 = vadd.f32 1.0, %v4467_v3  ;;  %5978 = vst [vmem:[#allocation18_spill] sm:$0xff] %v5404_v47 }
 0x404   :  { %4468 = vrcp.f32 %v1879_v12  ;;  %v1897_v1 = vpack.c.bf16 %v5287_v7, %v5287_v7 }
 0x405   :  { %4470 = vrcp.f32 %v1886_v5 }
 0x406   :  { %v1899_v11 = vrot.slane %v1897_v1, 1 }
 0x408   :  { %1934 = vmatmul.mubr.bf16.vlgmr.msra.gmra.mrb[44].mxu0 %v1899_v11  ;;  %3965 = vmatmul.mubr.bf16.vlgmr.msra.gmra.mrb[44].mxu1 %v1899_v11 }
 0x409   :  { %2018 = vmatpush1.bf16.msra.mxu0 %v4931_v14  ;;  %3969 = vmatpush3.bf16.msra.mxu1 %v4949_v19 }
 0x40a   :  { %2019 = vmatprep.subr.bf16.mxu0 %v4934_v15  ;;  %3970 = vmatprep.subr.bf16.mxu1 %v5939_v51  ;;  %v5971_v15 = vld [vmem:[#allocation31_spill] sm:$0xff] }
 0x40b   :  { %2049 = vmatprep.mubr.bf16.mxu0 %v5940_v6  ;;  %3984 = vmatprep.mubr.msk.bf16.mxu1 %vm4697_vm0, %v5939_v51 }
 0x40d   :  { %2020 = vmatpush1.bf16.msra.mxu0 %v4942_v17  ;;  %3971 = vmatpush3.bf16.msra.mxu1 %v4960_v22 }
 0x40e   :  { %v4469_v40 = vpop.eup %4468  ;;  %2021 = vmatprep.subr.bf16.mxu0 %v4946_v18  ;;  %3972 = vmatprep.subr.bf16.mxu1 %v5939_v51 }
 0x40f   :  { %v1890_v14 = vmul.f32 %v4469_v40, %v1889_v44  ;;  %v4471_v17 = vpop.eup %4470 }
 0x410   :  { %v1893_v18 = vsub.f32 1.0, %v4471_v17  ;;  %v1895_v22 = vmul.f32 %v4471_v17, %v5233_v63  ;;  %v5378_v63 = vld [vmem:[#allocation5 + $0x60] ss:$12 sps:$4 sm:$0xff]  }
 0x411   :  { %v1891_v19 = vadd.f32 %v1890_v14, %v5971_v15  ;;  %2022 = vmatpush1.bf16.msra.mxu0 %v4953_v20  ;;  %3973 = vmatpush3.bf16.msra.mxu1 %v4972_v25  ;;  %v5331_v25 = vld [vmem:[#allocation5 + $0x4] ss:$12 sps:$4 sm:$0xff]   ;;  %v2012_v14 = vrot.slane %v5287_v7, 7 }
 0x412   :  { %2023 = vmatprep.subr.bf16.mxu0 %v4957_v21  ;;  %3974 = vmatprep.subr.bf16.mxu1 %v5939_v51 }
 0x413   :  { %4472 = vtanh.f32 %v1891_v19 }
 0x415   :  { %2024 = vmatpush1.bf16.msra.mxu0 %v4966_v23  ;;  %3975 = vmatpush3.bf16.msra.mxu1 %v4982_v28  ;;  %v5341_v28 = vld [vmem:[#allocation5 + $0x1c] ss:$12 sps:$4 sm:$0xff]  }
 0x416   :  { %2025 = vmatprep.subr.bf16.mxu0 %v4969_v24  ;;  %3976 = vmatprep.subr.bf16.mxu1 %v5939_v51 }
 0x419   :  { %2026 = vmatpush1.bf16.msra.mxu0 %v4976_v26  ;;  %3977 = vmatpush3.bf16.msra.mxu1 %v4992_v31  ;;  %v5335_v26 = vld [vmem:[#allocation5] ss:$12 sps:$4 sm:$0xff]  }
 0x41a   :  { %2027 = vmatprep.subr.bf16.mxu0 %v4979_v27  ;;  %3978 = vmatprep.subr.bf16.mxu1 %v5939_v51  ;;  %v5338_v27 = vld [vmem:[#allocation5 + $0x8] ss:$12 sps:$4 sm:$0xff]  }
 0x41b   :  { %v5354_v31 = vld [vmem:[#allocation5 + $0x34] ss:$12 sps:$4 sm:$0xff]  }
 0x41d   :  { %v4473_v20 = vpop.eup %4472  ;;  %2028 = vmatpush1.bf16.msra.mxu0 %v4986_v29  ;;  %3979 = vmatpush3.bf16.msra.mxu1 %v5002_v34  ;;  %v5348_v29 = vld [vmem:[#allocation5 + $0x18] ss:$12 sps:$4 sm:$0xff]  }
 0x41e   :  { %2029 = vmatprep.subr.bf16.mxu0 %v4989_v30  ;;  %3980 = vmatprep.subr.bf16.mxu1 %v5939_v51  ;;  %v1894_v21 = vmul.f32 %v4473_v20, %v1893_v18  ;;  %v5351_v30 = vld [vmem:[#allocation5 + $0x20] ss:$12 sps:$4 sm:$0xff]  }
 0x41f   :  { %v5364_v34 = vld [vmem:[#allocation5 + $0x4c] ss:$12 sps:$4 sm:$0xff]  }
 0x420   :  { %v5321_v23 = vadd.f32 %v1895_v22, %v1894_v21  ;;  %v5981_v22 = vld [vmem:[#allocation33_spill] sm:$0xff] }
 0x421   :  { %2030 = vmatpush1.bf16.msra.mxu0 %v4996_v32  ;;  %3981 = vmatpush3.bf16.msra.mxu1 %v5010_v37  ;;  %v5358_v32 = vld [vmem:[#allocation5 + $0x30] ss:$12 sps:$4 sm:$0xff]  }
 0x422   :  { %2031 = vmatprep.subr.bf16.mxu0 %v4999_v33  ;;  %3982 = vmatprep.subr.bf16.mxu1 %v5939_v51  ;;  %v2016_v24 = vpack.c.bf16 %v5321_v23, %v5321_v23  ;;  %v5361_v33 = vld [vmem:[#allocation5 + $0x38] ss:$12 sps:$4 sm:$0xff]   ;;  %v5371_v37 = vld [vmem:[#allocation5 + $0x50] ss:$12 sps:$4 sm:$0xff]  }
 0x425   :  { %2032 = vmatpush1.bf16.msra.mxu0 %v5006_v35  ;;  %3983 = vmatpush3.bf16.msra.mxu1 %v5015_v38  ;;  %v5368_v35 = vld [vmem:[#allocation5 + $0x48] ss:$12 sps:$4 sm:$0xff]   ;;  %v5374_v38 = vld [vmem:[#allocation5 + $0x64] ss:$12 sps:$4 sm:$0xff]  }
 0x426   :  { %2126 = vmatprep.subr.bf16.mxu0 %v5331_v25  ;;  %3988 = vmatprep.subr.bf16.mxu1 %v5939_v51 }
 0x428   :  { %2050 = vmatmul.mubr.bf16.vlgmr.msra.gmra.mrb[48].mxu0 %v2016_v24  ;;  %3985 = vmatmul.mubr.bf16.vlgmr.msra.gmra.mrb[48].mxu1 %v2016_v24 }
 0x429   :  { %2127 = vmatpush1.bf16.msra.mxu0 %v5335_v26  ;;  %3989 = vmatpush3.bf16.msra.mxu1 %v5338_v27 }
 0x42a   :  { %2128 = vmatprep.subr.bf16.mxu0 %v5341_v28  ;;  %3990 = vmatprep.subr.bf16.mxu1 %v5939_v51 }
 0x42b   :  { %2158 = vmatprep.mubr.bf16.mxu0 %v5940_v6  ;;  %4004 = vmatprep.mubr.msk.bf16.mxu1 %vm4697_vm0, %v5939_v51 }
 0x42d   :  { %2129 = vmatpush1.bf16.msra.mxu0 %v5348_v29  ;;  %3991 = vmatpush3.bf16.msra.mxu1 %v5351_v30 }
 0x42e   :  { %2130 = vmatprep.subr.bf16.mxu0 %v5354_v31  ;;  %3992 = vmatprep.subr.bf16.mxu1 %v5939_v51 }
 0x431   :  { %2131 = vmatpush1.bf16.msra.mxu0 %v5358_v32  ;;  %3993 = vmatpush3.bf16.msra.mxu1 %v5361_v33 }
 0x432   :  { %2132 = vmatprep.subr.bf16.mxu0 %v5364_v34  ;;  %3994 = vmatprep.subr.bf16.mxu1 %v5939_v51 }
 0x435   :  { %2133 = vmatpush1.bf16.msra.mxu0 %v5368_v35  ;;  %3995 = vmatpush3.bf16.msra.mxu1 %v5371_v37 }
 0x436   :  { %2134 = vmatprep.subr.bf16.mxu0 %v5374_v38  ;;  %3996 = vmatprep.subr.bf16.mxu1 %v5939_v51 }
 0x439   :  { %2135 = vmatpush1.bf16.msra.mxu0 %v5378_v63  ;;  %3997 = vmatpush3.bf16.msra.mxu1 %v5381_v10 }
 0x43a   :  { %2136 = vmatprep.subr.bf16.mxu0 %v5384_v4  ;;  %3998 = vmatprep.subr.bf16.mxu1 %v5939_v51 }
 0x43d   :  { %2137 = vmatpush1.bf16.msra.mxu0 %v5388_v13  ;;  %3999 = vmatpush3.bf16.msra.mxu1 %v5391_v36 }
 0x43e   :  { %2138 = vmatprep.subr.bf16.mxu0 %v5394_v41  ;;  %4000 = vmatprep.subr.bf16.mxu1 %v5939_v51 }
 0x441   :  { %2139 = vmatpush1.bf16.msra.mxu0 %v5398_v43  ;;  %4001 = vmatpush3.bf16.msra.mxu1 %v5401_v46 }
 0x442   :  { %2140 = vmatprep.subr.bf16.mxu0 %v5404_v47  ;;  %4002 = vmatprep.subr.bf16.mxu1 %v5939_v51 }
 0x445   :  { %2141 = vmatpush1.bf16.msra.mxu0 %v5408_v50  ;;  %4003 = vmatpush3.bf16.msra.mxu1 %v5411_v52 }
 0x446   :  { %2242 = vmatprep.subr.bf16.mxu0 %v5414_v53  ;;  %4008 = vmatprep.subr.bf16.mxu1 %v5939_v51 }
 0x4db   :  { %v1935_v56 = vpop.f32.mrb[44].mxu0  ;;  %v1976_v57 = vpop.f32.mrb[44].mxu1 }
 0x4dc   :  { %v1983_v58 = vrot.slane %v1935_v56, 5  ;;  %v1937_v2 = vpop.f32.mrb[45].mxu0  ;;  %v3966_v62 = vpop.f32.mrb[45].mxu1  ;;  %v2002_v5 = vadd.f32 %v1976_v57, %v5967_v45 }
 0x4dd   :  { %v1993_v8 = vrot.slane %v1937_v2, 5  ;;  %v1939_v61 = vpop.f32.mrb[46].mxu0  ;;  %v1979_v0 = vpop.f32.mrb[46].mxu1  ;;  %v5982_v2 = vld [vmem:[#allocation35_spill] sm:$0xff] }
 0x4de   :  { %v1985_v54 = vadd.f32 %v1983_v58, %v5965_v16  ;;  %v1940_v49 = vpop.f32.mrb[47].mxu0  ;;  %v3967_v60 = vpop.f32.mrb[47].mxu1  ;;  %v2004_v44 = vrot.slane %v2002_v5, 5 }
 0x4df   :  { %v1995_v42 = vadd.f32 %v1993_v8, %v5966_v55 }
 0x4e0   :  { %v3499_v9 = vmul.f32 -1.442695, %v1985_v54 }
 0x4e1   :  { %v3500_v39 = vmul.f32 -1.442695, %v1995_v42 }
 0x4e2   :  { %4474 = vpow2.f32 %v3499_v9 }
 0x4e3   :  { %4476 = vpow2.f32 %v3500_v39 }
 0x4ec   :  { %v4475_v12 = vpop.eup %4474 }
 0x4ed   :  { %v4477_v1 = vpop.eup %4476  ;;  %v1989_v11 = vadd.f32 1.0, %v4475_v12 }
 0x4ee   :  { %v1999_v3 = vadd.f32 1.0, %v4477_v1 }
 0x4ef   :  { %4478 = vrcp.f32 %v1989_v11 }
 0x4f0   :  { %4480 = vrcp.f32 %v1999_v3 }
 0x4f9   :  { %v4479_v40 = vpop.eup %4478 }
 0x4fa   :  { %v4481_v15 = vpop.eup %4480  ;;  %v2006_v19 = vmul.f32 %v4479_v40, %v2004_v44  ;;  %v5429_v44 = vld [vmem:[#allocation5 + $0xc0] ss:$12 sps:$4 sm:$0xff]   ;;  %v5432_v40 = vld [vmem:[#allocation5 + $0xc8] ss:$12 sps:$4 sm:$0xff]  }
 0x4fb   :  { %v2051_v17 = vpop.f32.mrb[48].mxu0  ;;  %v2092_v18 = vpop.f32.mrb[48].mxu1  ;;  %v2014_v20 = vmul.f32 %v4481_v15, %v2012_v14  ;;  %v2009_v54 = vsub.f32 1.0, %v4481_v15  ;;  %v5435_v14 = vld [vmem:[#allocation5 + $0xdc] ss:$12 sps:$4 sm:$0xff]  }
 0x4fc   :  { %v2007_v21 = vadd.f32 %v2006_v19, %v5968_v48  ;;  %v2098_v24 = vadd.f32 %v2051_v17, %v5981_v22  ;;  %v2053_v56 = vpop.f32.mrb[49].mxu0  ;;  %v3986_v58 = vpop.f32.mrb[49].mxu1  ;;  %v2112_v15 = vadd.f32 %v2092_v18, %v5121_v59  ;;  %v5449_v22 = vld [vmem:[#allocation5 + $0xf4] ss:$12 sps:$4 sm:$0xff]  }
 0x4fd   :  { %v2105_v62 = vadd.f32 %v2053_v56, %v5982_v2  ;;  %v2055_v8 = vpop.f32.mrb[50].mxu0  ;;  %v2095_v61 = vpop.f32.mrb[50].mxu1  ;;  %v5983_v59 = vld [vmem:[#allocation34_spill] sm:$0xff]  ;;  %v5460_v58 = vld [vmem:[#allocation5 + $0x10c] ss:$12 sps:$4 sm:$0xff]  }
 0x4fe   :  { %4482 = vtanh.f32 %v2007_v21  ;;  %v3501_v45 = vmul.f32 -1.442695, %v2098_v24  ;;  %v2056_v57 = vpop.f32.mrb[51].mxu0  ;;  %v3987_v0 = vpop.f32.mrb[51].mxu1  ;;  %v5446_v21 = vld [vmem:[#allocation5 + $0xe0] ss:$12 sps:$4 sm:$0xff]  }
 0x4ff   :  { %v3502_v7 = vmul.f32 -1.442695, %v2105_v62  ;;  %v5454_v24 = vld [vmem:[#allocation5 + $0xf0] ss:$12 sps:$4 sm:$0xff]   ;;  %v5457_v56 = vld [vmem:[#allocation5 + $0xf8] ss:$12 sps:$4 sm:$0xff]  }
 0x500   :  { %4484 = vpow2.f32 %v3501_v45  ;;  %v5464_v2 = vld [vmem:[#allocation5 + $0x108] ss:$12 sps:$4 sm:$0xff]   ;;  %v5467_v62 = vld [vmem:[#allocation5 + $0x110] ss:$12 sps:$4 sm:$0xff]   ;;  %v5474_v45 = vld [vmem:[#allocation5 + $0x120] ss:$12 sps:$4 sm:$0xff]  }
 0x501   :  { %4486 = vpow2.f32 %v3502_v7  ;;  %v5470_v8 = vld [vmem:[#allocation5 + $0x124] ss:$12 sps:$4 sm:$0xff]   ;;  %v5477_v57 = vld [vmem:[#allocation5 + $0x128] ss:$12 sps:$4 sm:$0xff]  }
 0x502   :  { %v5480_v0 = vld [vmem:[#allocation5 + $0x13c] ss:$12 sps:$4 sm:$0xff]  }
 0x508   :  { %v4483_v49 = vpop.eup %4482 }
 0x509   :  { %v2010_v60 = vmul.f32 %v4483_v49, %v2009_v54 }
 0x50a   :  { %v4485_v42 = vpop.eup %4484 }
 0x50b   :  { %v2102_v9 = vadd.f32 1.0, %v4485_v42  ;;  %v5425_v39 = vadd.f32 %v2014_v20, %v2010_v60  ;;  %v4487_v11 = vpop.eup %4486  ;;  %v5443_v20 = vld [vmem:[#allocation5 + $0xd8] ss:$12 sps:$4 sm:$0xff]  }
 0x50c   :  { %v2109_v5 = vadd.f32 1.0, %v4487_v11  ;;  %v5485_v42 = vld [vmem:[#allocation5 + $0x138] ss:$12 sps:$4 sm:$0xff]   ;;  %v5497_v11 = vld [vmem:[#allocation5 + $0x150] ss:$12 sps:$4 sm:$0xff]  }
 0x50d   :  { %4488 = vrcp.f32 %v2102_v9  ;;  %v2120_v12 = vpack.c.bf16 %v5425_v39, %v5425_v39  ;;  %v5488_v9 = vld [vmem:[#allocation5 + $0x140] ss:$12 sps:$4 sm:$0xff]  }
 0x50e   :  { %4490 = vrcp.f32 %v2109_v5  ;;  %v5507_v5 = vld [vmem:[#allocation5 + $0x168] ss:$12 sps:$4 sm:$0xff]  }
 0x50f   :  { %v2122_v1 = vshrl.u32 %v2120_v12, 16  ;;  %v5491_v12 = vld [vmem:[#allocation5 + $0x154] ss:$12 sps:$4 sm:$0xff]  }
 0x511   :  { %v2124_v3 = vrot.slane %v2122_v1, 1 }
 0x513   :  { %2159 = vmatmul.mubr.bf16.vlgmr.msra.gmra.mrb[52].mxu0 %v2124_v3  ;;  %4005 = vmatmul.mubr.bf16.vlgmr.msra.gmra.mrb[52].mxu1 %v2124_v3  ;;  %v5503_v3 = vld [vmem:[#allocation5 + $0x16c] ss:$12 sps:$4 sm:$0xff]  }
 0x514   :  { %2243 = vmatpush1.bf16.msra.mxu0 %v5429_v44  ;;  %4009 = vmatpush3.bf16.msra.mxu1 %v5432_v40 }
 0x515   :  { %2244 = vmatprep.subr.bf16.mxu0 %v5435_v14  ;;  %4010 = vmatprep.subr.bf16.mxu1 %v5939_v51 }
 0x516   :  { %2274 = vmatprep.mubr.bf16.mxu0 %v5940_v6  ;;  %4024 = vmatprep.mubr.msk.bf16.mxu1 %vm4697_vm0, %v5939_v51 }
 0x517   :  { %v4489_v19 = vpop.eup %4488 }
 0x518   :  { %v2113_v17 = vmul.f32 %v4489_v19, %v2112_v15  ;;  %2245 = vmatpush1.bf16.msra.mxu0 %v5443_v20  ;;  %4011 = vmatpush3.bf16.msra.mxu1 %v5446_v21  ;;  %v4491_v61 = vpop.eup %4490  ;;  %v5510_v15 = vld [vmem:[#allocation5 + $0x170] ss:$12 sps:$4 sm:$0xff]  }
 0x519   :  { %2246 = vmatprep.subr.bf16.mxu0 %v5449_v22  ;;  %4012 = vmatprep.subr.bf16.mxu1 %v5939_v51  ;;  %v2116_v7 = vsub.f32 1.0, %v4491_v61  ;;  %v2118_v60 = vmul.f32 %v4491_v61, %v5321_v23  ;;  %v5500_v23 = vld [vmem:[#allocation5 + $0x158] ss:$12 sps:$4 sm:$0xff]  }
 0x51a   :  { %v2114_v18 = vadd.f32 %v2113_v17, %v5983_v59 }
 0x51c   :  { %4492 = vtanh.f32 %v2114_v18  ;;  %2247 = vmatpush1.bf16.msra.mxu0 %v5454_v24  ;;  %4013 = vmatpush3.bf16.msra.mxu1 %v5457_v56 }
 0x51d   :  { %2248 = vmatprep.subr.bf16.mxu0 %v5460_v58  ;;  %4014 = vmatprep.subr.bf16.mxu1 %v5939_v51 }
 0x520   :  { %2249 = vmatpush1.bf16.msra.mxu0 %v5464_v2  ;;  %4015 = vmatpush3.bf16.msra.mxu1 %v5467_v62 }
 0x521   :  { %2250 = vmatprep.subr.bf16.mxu0 %v5470_v8  ;;  %4016 = vmatprep.subr.bf16.mxu1 %v5939_v51 }
 0x524   :  { %2251 = vmatpush1.bf16.msra.mxu0 %v5474_v45  ;;  %4017 = vmatpush3.bf16.msra.mxu1 %v5477_v57 }
 0x525   :  { %2252 = vmatprep.subr.bf16.mxu0 %v5480_v0  ;;  %4018 = vmatprep.subr.bf16.mxu1 %v5939_v51 }
 0x526   :  { %v4493_v54 = vpop.eup %4492 }
 0x527   :  { %v2117_v49 = vmul.f32 %v4493_v54, %v2116_v7 }
 0x528   :  { %2253 = vmatpush1.bf16.msra.mxu0 %v5485_v42  ;;  %4019 = vmatpush3.bf16.msra.mxu1 %v5488_v9 }
 0x529   :  { %2254 = vmatprep.subr.bf16.mxu0 %v5491_v12  ;;  %4020 = vmatprep.subr.bf16.mxu1 %v5939_v51  ;;  %v5495_v1 = vadd.f32 %v2118_v60, %v2117_v49 }
 0x52b   :  { %v2241_v19 = vpack.c.bf16 %v5495_v1, %v5495_v1 }
 0x52c   :  { %2255 = vmatpush1.bf16.msra.mxu0 %v5497_v11  ;;  %4021 = vmatpush3.bf16.msra.mxu1 %v5500_v23 }
 0x52d   :  { %2256 = vmatprep.subr.bf16.mxu0 %v5503_v3  ;;  %4022 = vmatprep.subr.bf16.mxu1 %v5939_v51 }
 0x530   :  { %2257 = vmatpush1.bf16.msra.mxu0 %v5507_v5  ;;  %4023 = vmatpush3.bf16.msra.mxu1 %v5510_v15 }
 0x531   :  { %2349 = vmatprep.subr.bf16.mxu0 %v5331_v25  ;;  %4028 = vmatprep.subr.bf16.mxu1 %v5939_v51 }
 0x533   :  { %2275 = vmatmul.mubr.bf16.vlgmr.msra.gmra.mrb[56].mxu0 %v2241_v19  ;;  %4025 = vmatmul.mubr.bf16.vlgmr.msra.gmra.mrb[56].mxu1 %v2241_v19 }
 0x534   :  { %2350 = vmatpush1.bf16.msra.mxu0 %v5335_v26  ;;  %4029 = vmatpush3.bf16.msra.mxu1 %v5338_v27 }
 0x535   :  { %2351 = vmatprep.subr.bf16.mxu0 %v5341_v28  ;;  %4030 = vmatprep.subr.bf16.mxu1 %v5939_v51 }
 0x536   :  { %2381 = vmatprep.mubr.bf16.mxu0 %v5940_v6  ;;  %4044 = vmatprep.mubr.msk.bf16.mxu1 %vm4697_vm0, %v5939_v51 }
 0x538   :  { %2352 = vmatpush1.bf16.msra.mxu0 %v5348_v29  ;;  %4031 = vmatpush3.bf16.msra.mxu1 %v5351_v30 }
 0x539   :  { %2353 = vmatprep.subr.bf16.mxu0 %v5354_v31  ;;  %4032 = vmatprep.subr.bf16.mxu1 %v5939_v51 }
 0x53c   :  { %2354 = vmatpush1.bf16.msra.mxu0 %v5358_v32  ;;  %4033 = vmatpush3.bf16.msra.mxu1 %v5361_v33 }
 0x53d   :  { %2355 = vmatprep.subr.bf16.mxu0 %v5364_v34  ;;  %4034 = vmatprep.subr.bf16.mxu1 %v5939_v51 }
 0x540   :  { %2356 = vmatpush1.bf16.msra.mxu0 %v5368_v35  ;;  %4035 = vmatpush3.bf16.msra.mxu1 %v5371_v37 }
 0x541   :  { %2357 = vmatprep.subr.bf16.mxu0 %v5374_v38  ;;  %4036 = vmatprep.subr.bf16.mxu1 %v5939_v51 }
 0x544   :  { %2358 = vmatpush1.bf16.msra.mxu0 %v5378_v63  ;;  %4037 = vmatpush3.bf16.msra.mxu1 %v5381_v10 }
 0x545   :  { %2359 = vmatprep.subr.bf16.mxu0 %v5384_v4  ;;  %4038 = vmatprep.subr.bf16.mxu1 %v5939_v51 }
 0x548   :  { %2360 = vmatpush1.bf16.msra.mxu0 %v5388_v13  ;;  %4039 = vmatpush3.bf16.msra.mxu1 %v5391_v36 }
 0x549   :  { %2361 = vmatprep.subr.bf16.mxu0 %v5394_v41  ;;  %4040 = vmatprep.subr.bf16.mxu1 %v5939_v51 }
 0x54c   :  { %2362 = vmatpush1.bf16.msra.mxu0 %v5398_v43  ;;  %4041 = vmatpush3.bf16.msra.mxu1 %v5401_v46 }
 0x54d   :  { %2363 = vmatprep.subr.bf16.mxu0 %v5404_v47  ;;  %4042 = vmatprep.subr.bf16.mxu1 %v5939_v51 }
 0x550   :  { %2364 = vmatpush1.bf16.msra.mxu0 %v5408_v50  ;;  %4043 = vmatpush3.bf16.msra.mxu1 %v5411_v52 }
 0x551   :  { %2465 = vmatprep.subr.bf16.mxu0 %v5414_v53  ;;  %4048 = vmatprep.subr.bf16.mxu1 %v5939_v51 }
 0x5e6   :  { %v2160_v17 = vpop.f32.mrb[52].mxu0  ;;  %v2201_v59 = vpop.f32.mrb[52].mxu1 }
 0x5e7   :  { %v2208_v18 = vrot.slane %v2160_v17, 4  ;;  %v2162_v61 = vpop.f32.mrb[53].mxu0  ;;  %v4006_v7 = vpop.f32.mrb[53].mxu1  ;;  %v5557_v17 = vld [vmem:[%s5847_s4] ss:$0 sm:$0xff] }
 0x5e8   :  { %v2218_v54 = vrot.slane %v2162_v61, 4  ;;  %v2164_v49 = vpop.f32.mrb[54].mxu0  ;;  %v2204_v60 = vpop.f32.mrb[54].mxu1  ;;  %5984 = vst [vmem:[#allocation21_spill] sm:$0xff] %v5557_v17  ;;  %v2237_v61 = vrot.slane %v5425_v39, 7 }
 0x5e9   :  { %v2210_v19 = vadd.f32 %v2208_v18, %v5965_v16  ;;  %v2165_v47 = vpop.f32.mrb[55].mxu0  ;;  %v4007_v46 = vpop.f32.mrb[55].mxu1 }
 0x5ea   :  { %v2220_v50 = vadd.f32 %v2218_v54, %v5966_v55  ;;  %v2227_v47 = vadd.f32 %v5557_v17, %v2201_v59 }
 0x5eb   :  { %v3503_v43 = vmul.f32 -1.442695, %v2210_v19  ;;  %v5986_v19 = vld [vmem:[#allocation38_spill] sm:$0xff] }
 0x5ec   :  { %v3504_v52 = vmul.f32 -1.442695, %v2220_v50  ;;  %v2229_v46 = vrot.slane %v2227_v47, 4 }
 0x5ed   :  { %4494 = vpow2.f32 %v3503_v43 }
 0x5ee   :  { %4496 = vpow2.f32 %v3504_v52 }
 0x5f7   :  { %v4495_v53 = vpop.eup %4494 }
 0x5f8   :  { %v4497_v41 = vpop.eup %4496  ;;  %v2214_v36 = vadd.f32 1.0, %v4495_v53 }
 0x5f9   :  { %v2224_v13 = vadd.f32 1.0, %v4497_v41 }
 0x5fa   :  { %4498 = vrcp.f32 %v2214_v36  ;;  %v5985_v36 = vld [vmem:[#allocation36_spill] sm:$0xff] }
 0x5fb   :  { %4500 = vrcp.f32 %v2224_v13 }
 0x604   :  { %v4499_v18 = vpop.eup %4498 }
 0x605   :  { %v4501_v50 = vpop.eup %4500  ;;  %v2231_v43 = vmul.f32 %v4499_v18, %v2229_v46 }
 0x606   :  { %v2276_v52 = vpop.f32.mrb[56].mxu0  ;;  %v2317_v7 = vpop.f32.mrb[56].mxu1  ;;  %v2239_v54 = vmul.f32 %v4501_v50, %v2237_v61  ;;  %v2234_v46 = vsub.f32 1.0, %v4501_v50 }
 0x607   :  { %v2232_v41 = vadd.f32 %v2231_v43, %v5968_v48  ;;  %v2323_v13 = vadd.f32 %v2276_v52, %v5985_v36  ;;  %v2278_v49 = vpop.f32.mrb[57].mxu0  ;;  %v4026_v60 = vpop.f32.mrb[57].mxu1 }
 0x608   :  { %v2330_v53 = vadd.f32 %v2278_v49, %v5986_v19  ;;  %v2280_v55 = vpop.f32.mrb[58].mxu0  ;;  %v2320_v16 = vpop.f32.mrb[58].mxu1 }
 0x609   :  { %4502 = vtanh.f32 %v2232_v41  ;;  %v3505_v59 = vmul.f32 -1.442695, %v2323_v13  ;;  %v2281_v47 = vpop.f32.mrb[59].mxu0  ;;  %v4027_v17 = vpop.f32.mrb[59].mxu1  ;;  %v5997_v13 = vld [vmem:[#allocation24_spill] sm:$0xff] }
 0x60a   :  { %v3506_v39 = vmul.f32 -1.442695, %v2330_v53  ;;  %v5998_v53 = vld [vmem:[#allocation26_spill] sm:$0xff] }
 0x60b   :  { %4504 = vpow2.f32 %v3505_v59 }
 0x60c   :  { %4506 = vpow2.f32 %v3506_v39 }
 0x613   :  { %v4503_v18 = vpop.eup %4502 }
 0x614   :  { %v2235_v61 = vmul.f32 %v4503_v18, %v2234_v46 }
 0x615   :  { %v4505_v4 = vpop.eup %4504 }
 0x616   :  { %v2327_v43 = vadd.f32 1.0, %v4505_v4  ;;  %v5564_v48 = vadd.f32 %v2239_v54, %v2235_v61  ;;  %v4507_v16 = vpop.eup %4506  ;;  %v5578_v4 = vld [vmem:[%s5847_s4 + $0x8] ss:$0 sm:$0xff] }
 0x617   :  { %v2334_v17 = vadd.f32 1.0, %v4507_v16  ;;  %v2337_v50 = vadd.f32 %v5578_v4, %v2317_v7 }
 0x618   :  { %4508 = vrcp.f32 %v2327_v43  ;;  %v2345_v52 = vpack.c.bf16 %v5564_v48, %v5564_v48  ;;  %v5999_v43 = vld [vmem:[#allocation21_spill] sm:$0xff] }
 0x619   :  { %4510 = vrcp.f32 %v2334_v17  ;;  %v2460_v17 = vrot.slane %v5564_v48, 7 }
 0x61a   :  { %v2347_v55 = vrot.slane %v2345_v52, 2 }
 0x61c   :  { %2382 = vmatmul.mubr.bf16.vlgmr.msra.gmra.mrb[60].mxu0 %v2347_v55  ;;  %4045 = vmatmul.mubr.bf16.vlgmr.msra.gmra.mrb[60].mxu1 %v2347_v55 }
 0x61d   :  { %2466 = vmatpush1.bf16.msra.mxu0 %v5429_v44  ;;  %4049 = vmatpush3.bf16.msra.mxu1 %v5432_v40 }
 0x61e   :  { %2467 = vmatprep.subr.bf16.mxu0 %v5435_v14  ;;  %4050 = vmatprep.subr.bf16.mxu1 %v5939_v51  ;;  %v5987_v14 = vld [vmem:[#allocation37_spill] sm:$0xff] }
 0x61f   :  { %2497 = vmatprep.mubr.bf16.mxu0 %v5940_v6  ;;  %4064 = vmatprep.mubr.msk.bf16.mxu1 %vm4697_vm0, %v5939_v51 }
 0x621   :  { %2468 = vmatpush1.bf16.msra.mxu0 %v5443_v20  ;;  %4051 = vmatpush3.bf16.msra.mxu1 %v5446_v21 }
 0x622   :  { %v4509_v44 = vpop.eup %4508  ;;  %2469 = vmatprep.subr.bf16.mxu0 %v5449_v22  ;;  %4052 = vmatprep.subr.bf16.mxu1 %v5939_v51 }
 0x623   :  { %v2338_v40 = vmul.f32 %v4509_v44, %v2337_v50  ;;  %v4511_v20 = vpop.eup %4510 }
 0x624   :  { %v2341_v21 = vsub.f32 1.0, %v4511_v20 }
 0x625   :  { %v2339_v54 = vadd.f32 %v2338_v40, %v5987_v14  ;;  %2470 = vmatpush1.bf16.msra.mxu0 %v5454_v24  ;;  %4053 = vmatpush3.bf16.msra.mxu1 %v5457_v56  ;;  %v2343_v56 = vmul.f32 %v4511_v20, %v5495_v1  ;;  %v5996_v1 = vld [vmem:[#allocation16_spill] sm:$0xff]  ;;  %v6000_v20 = vld [vmem:[#allocation25_spill] sm:$0xff] }
 0x626   :  { %2471 = vmatprep.subr.bf16.mxu0 %v5460_v58  ;;  %4054 = vmatprep.subr.bf16.mxu1 %v5939_v51 }
 0x627   :  { %4512 = vtanh.f32 %v2339_v54 }
 0x629   :  { %2472 = vmatpush1.bf16.msra.mxu0 %v5464_v2  ;;  %4055 = vmatpush3.bf16.msra.mxu1 %v5467_v62  ;;  %v5988_v62 = vld [vmem:[#allocation27_spill] sm:$0xff] }
 0x62a   :  { %2473 = vmatprep.subr.bf16.mxu0 %v5470_v8  ;;  %4056 = vmatprep.subr.bf16.mxu1 %v5939_v51  ;;  %v5989_v8 = vld [vmem:[#allocation29_spill] sm:$0xff] }
 0x62d   :  { %2474 = vmatpush1.bf16.msra.mxu0 %v5474_v45  ;;  %4057 = vmatpush3.bf16.msra.mxu1 %v5477_v57  ;;  %v5990_v45 = vld [vmem:[#allocation28_spill] sm:$0xff]  ;;  %v5991_v57 = vld [vmem:[#allocation15_spill] sm:$0xff] }
 0x62e   :  { %2475 = vmatprep.subr.bf16.mxu0 %v5480_v0  ;;  %4058 = vmatprep.subr.bf16.mxu1 %v5939_v51  ;;  %v5992_v0 = vld [vmem:[#allocation12_spill] sm:$0xff] }
 0x631   :  { %v4513_v22 = vpop.eup %4512  ;;  %2476 = vmatpush1.bf16.msra.mxu0 %v5485_v42  ;;  %4059 = vmatpush3.bf16.msra.mxu1 %v5488_v9  ;;  %v5993_v42 = vld [vmem:[#allocation13_spill] sm:$0xff]  ;;  %v5994_v9 = vld [vmem:[#allocation18_spill] sm:$0xff] }
 0x632   :  { %2477 = vmatprep.subr.bf16.mxu0 %v5491_v12  ;;  %4060 = vmatprep.subr.bf16.mxu1 %v5939_v51  ;;  %v2342_v24 = vmul.f32 %v4513_v22, %v2341_v21  ;;  %v5995_v12 = vld [vmem:[#allocation14_spill] sm:$0xff]  ;;  %v6001_v22 = vld [vmem:[#allocation39_spill] sm:$0xff] }
 0x634   :  { %v5603_v58 = vadd.f32 %v2343_v56, %v2342_v24 }
 0x635   :  { %2478 = vmatpush1.bf16.msra.mxu0 %v5497_v11  ;;  %4061 = vmatpush3.bf16.msra.mxu1 %v5500_v23 }
 0x636   :  { %2479 = vmatprep.subr.bf16.mxu0 %v5503_v3  ;;  %4062 = vmatprep.subr.bf16.mxu1 %v5939_v51  ;;  %v2464_v2 = vpack.c.bf16 %v5603_v58, %v5603_v58 }
 0x639   :  { %2480 = vmatpush1.bf16.msra.mxu0 %v5507_v5  ;;  %4063 = vmatpush3.bf16.msra.mxu1 %v5510_v15 }
 0x63a   :  { %2576 = vmatprep.subr.bf16.mxu0 %v5331_v25  ;;  %4068 = vmatprep.subr.bf16.mxu1 %v5939_v51 }
 0x63c   :  { %2498 = vmatmul.mubr.bf16.vlgmr.msra.gmra.mrb[64].mxu0 %v2464_v2  ;;  %4065 = vmatmul.mubr.bf16.vlgmr.msra.gmra.mrb[64].mxu1 %v2464_v2 }
 0x63d   :  { %2577 = vmatpush1.bf16.msra.mxu0 %v5335_v26  ;;  %4069 = vmatpush3.bf16.msra.mxu1 %v5338_v27 }
 0x63e   :  { %2578 = vmatprep.subr.bf16.mxu0 %v5341_v28  ;;  %4070 = vmatprep.subr.bf16.mxu1 %v5939_v51 }
 0x63f   :  { %2608 = vmatprep.mubr.bf16.mxu0 %v5940_v6  ;;  %4084 = vmatprep.mubr.msk.bf16.mxu1 %vm4697_vm0, %v5939_v51 }
 0x641   :  { %2579 = vmatpush1.bf16.msra.mxu0 %v5348_v29  ;;  %4071 = vmatpush3.bf16.msra.mxu1 %v5351_v30 }
 0x642   :  { %2580 = vmatprep.subr.bf16.mxu0 %v5354_v31  ;;  %4072 = vmatprep.subr.bf16.mxu1 %v5939_v51 }
 0x645   :  { %2581 = vmatpush1.bf16.msra.mxu0 %v5358_v32  ;;  %4073 = vmatpush3.bf16.msra.mxu1 %v5361_v33 }
 0x646   :  { %2582 = vmatprep.subr.bf16.mxu0 %v5364_v34  ;;  %4074 = vmatprep.subr.bf16.mxu1 %v5939_v51 }
 0x649   :  { %2583 = vmatpush1.bf16.msra.mxu0 %v5368_v35  ;;  %4075 = vmatpush3.bf16.msra.mxu1 %v5371_v37 }
 0x64a   :  { %2584 = vmatprep.subr.bf16.mxu0 %v5374_v38  ;;  %4076 = vmatprep.subr.bf16.mxu1 %v5939_v51 }
 0x64d   :  { %2585 = vmatpush1.bf16.msra.mxu0 %v5378_v63  ;;  %4077 = vmatpush3.bf16.msra.mxu1 %v5381_v10 }
 0x64e   :  { %2586 = vmatprep.subr.bf16.mxu0 %v5988_v62  ;;  %4078 = vmatprep.subr.bf16.mxu1 %v5939_v51 }
 0x651   :  { %2587 = vmatpush1.bf16.msra.mxu0 %v5989_v8  ;;  %4079 = vmatpush3.bf16.msra.mxu1 %v5990_v45 }
 0x652   :  { %2588 = vmatprep.subr.bf16.mxu0 %v5991_v57  ;;  %4080 = vmatprep.subr.bf16.mxu1 %v5939_v51 }
 0x655   :  { %2589 = vmatpush1.bf16.msra.mxu0 %v5992_v0  ;;  %4081 = vmatpush3.bf16.msra.mxu1 %v5993_v42 }
 0x656   :  { %2590 = vmatprep.subr.bf16.mxu0 %v5994_v9  ;;  %4082 = vmatprep.subr.bf16.mxu1 %v5939_v51 }
 0x659   :  { %2591 = vmatpush1.bf16.msra.mxu0 %v5995_v12  ;;  %4083 = vmatpush3.bf16.msra.mxu1 %v5996_v1 }
 0x65a   :  { %2695 = vmatprep.subr.bf16.mxu0 %v5331_v25  ;;  %4088 = vmatprep.subr.bf16.mxu1 %v5939_v51 }
 0x6ef   :  { %v2383_v11 = vpop.f32.mrb[60].mxu0  ;;  %v2424_v23 = vpop.f32.mrb[60].mxu1 }
 0x6f0   :  { %v2431_v3 = vrot.slane %v2383_v11, 3  ;;  %v2385_v5 = vpop.f32.mrb[61].mxu0  ;;  %v4046_v15 = vpop.f32.mrb[61].mxu1  ;;  %v2450_v52 = vadd.f32 %v5999_v43, %v2424_v23  ;;  %v6002_v11 = vld [vmem:[#allocation41_spill] sm:$0xff] }
 0x6f1   :  { %v2441_v7 = vrot.slane %v2385_v5, 3  ;;  %v2387_v41 = vpop.f32.mrb[62].mxu0  ;;  %v2427_v36 = vpop.f32.mrb[62].mxu1 }
 0x6f2   :  { %v2433_v49 = vadd.f32 %v2431_v3, %v5997_v13  ;;  %v2388_v60 = vpop.f32.mrb[63].mxu0  ;;  %v4047_v19 = vpop.f32.mrb[63].mxu1  ;;  %v2452_v55 = vrot.slane %v2450_v52, 3 }
 0x6f3   :  { %v2443_v59 = vadd.f32 %v2441_v7, %v5998_v53 }
 0x6f4   :  { %v3507_v47 = vmul.f32 -1.442695, %v2433_v49 }
 0x6f5   :  { %v3508_v39 = vmul.f32 -1.442695, %v2443_v59 }
 0x6f6   :  { %4514 = vpow2.f32 %v3507_v47 }
 0x6f7   :  { %4516 = vpow2.f32 %v3508_v39 }
 0x700   :  { %v4515_v25 = vpop.eup %4514 }
 0x701   :  { %v4517_v46 = vpop.eup %4516  ;;  %v2437_v18 = vadd.f32 1.0, %v4515_v25 }
 0x702   :  { %v2447_v61 = vadd.f32 1.0, %v4517_v46 }
 0x703   :  { %4518 = vrcp.f32 %v2437_v18 }
 0x704   :  { %4520 = vrcp.f32 %v2447_v61 }
 0x70d   :  { %v4519_v16 = vpop.eup %4518 }
 0x70e   :  { %v4521_v50 = vpop.eup %4520  ;;  %v2454_v44 = vmul.f32 %v4519_v16, %v2452_v55 }
 0x70f   :  { %v2499_v40 = vpop.f32.mrb[64].mxu0  ;;  %v2540_v14 = vpop.f32.mrb[64].mxu1  ;;  %v2462_v54 = vmul.f32 %v4521_v50, %v2460_v17  ;;  %v2457_v36 = vsub.f32 1.0, %v4521_v50 }
 0x710   :  { %v2455_v21 = vadd.f32 %v2454_v44, %v6000_v20  ;;  %v2546_v24 = vadd.f32 %v2499_v40, %v6001_v22  ;;  %v2501_v56 = vpop.f32.mrb[65].mxu0  ;;  %v4066_v2 = vpop.f32.mrb[65].mxu1  ;;  %v2560_v52 = vadd.f32 %v5578_v4, %v2540_v14 }
 0x711   :  { %v2553_v3 = vadd.f32 %v2501_v56, %v6002_v11  ;;  %v2503_v5 = vpop.f32.mrb[66].mxu0  ;;  %v2543_v15 = vpop.f32.mrb[66].mxu1 }
 0x712   :  { %4522 = vtanh.f32 %v2455_v21  ;;  %v3509_v23 = vmul.f32 -1.442695, %v2546_v24  ;;  %v2504_v7 = vpop.f32.mrb[67].mxu0  ;;  %v4067_v41 = vpop.f32.mrb[67].mxu1 }
 0x713   :  { %v3510_v48 = vmul.f32 -1.442695, %v2553_v3  ;;  %v4382_v7 = vld [vmem:[#allocation5 + $0x240] ss:$12 sps:$4 sm:$0xff]   ;;  %v4385_v41 = vld [vmem:[#allocation5 + $0x248] ss:$12 sps:$4 sm:$0xff]  }
 0x714   :  { %4524 = vpow2.f32 %v3509_v23  ;;  %v4384_v23 = vld [vmem:[#allocation5 + $0x244] ss:$12 sps:$4 sm:$0xff]  }
 0x715   :  { %4526 = vpow2.f32 %v3510_v48  ;;  %v4388_v48 = vld [vmem:[#allocation5 + $0x25c] ss:$12 sps:$4 sm:$0xff]  }
 0x71c   :  { %v4523_v49 = vpop.eup %4522 }
 0x71d   :  { %v2458_v60 = vmul.f32 %v4523_v49, %v2457_v36  ;;  %v4386_v36 = vld [vmem:[#allocation5 + $0x258] ss:$12 sps:$4 sm:$0xff]   ;;  %v4389_v49 = vld [vmem:[#allocation5 + $0x260] ss:$12 sps:$4 sm:$0xff]  }
 0x71e   :  { %v4525_v19 = vpop.eup %4524 }
 0x71f   :  { %v2550_v59 = vadd.f32 1.0, %v4525_v19  ;;  %v5657_v47 = vadd.f32 %v2462_v54, %v2458_v60  ;;  %v4527_v46 = vpop.eup %4526  ;;  %v4392_v60 = vld [vmem:[#allocation5 + $0x274] ss:$12 sps:$4 sm:$0xff]   ;;  %v4390_v19 = vld [vmem:[#allocation5 + $0x270] ss:$12 sps:$4 sm:$0xff]  }
 0x720   :  { %v2557_v61 = vadd.f32 1.0, %v4527_v46  ;;  %v4400_v46 = vld [vmem:[#allocation5 + $0x2a4] ss:$12 sps:$4 sm:$0xff]  }
 0x721   :  { %4528 = vrcp.f32 %v2550_v59  ;;  %v2570_v39 = vpack.c.bf16 %v5657_v47, %v5657_v47  ;;  %v2687_v14 = vrot.slane %v5657_v47, 7  ;;  %v4393_v59 = vld [vmem:[#allocation5 + $0x278] ss:$12 sps:$4 sm:$0xff]   ;;  %v4394_v47 = vld [vmem:[#allocation5 + $0x288] ss:$12 sps:$4 sm:$0xff]  }
 0x722   :  { %4530 = vrcp.f32 %v2557_v61  ;;  %v4401_v61 = vld [vmem:[#allocation5 + $0x2a8] ss:$12 sps:$4 sm:$0xff]  }
 0x723   :  { %v2572_v25 = vshrl.u32 %v2570_v39, 16  ;;  %v4396_v39 = vld [vmem:[#allocation5 + $0x28c] ss:$12 sps:$4 sm:$0xff]  }
 0x725   :  { %v2574_v18 = vrot.slane %v2572_v25, 2  ;;  %v4397_v25 = vld [vmem:[#allocation5 + $0x290] ss:$12 sps:$4 sm:$0xff]  }
 0x727   :  { %2609 = vmatmul.mubr.bf16.vlgmr.msra.gmra.mrb[68].mxu0 %v2574_v18  ;;  %4085 = vmatmul.mubr.bf16.vlgmr.msra.gmra.mrb[68].mxu1 %v2574_v18  ;;  %v4398_v18 = vld [vmem:[#allocation5 + $0x2a0] ss:$12 sps:$4 sm:$0xff]  }
 0x728   :  { %2696 = vmatpush1.bf16.msra.mxu0 %v5335_v26  ;;  %4089 = vmatpush3.bf16.msra.mxu1 %v5338_v27  ;;  %v6003_v26 = vld [vmem:[#allocation40_spill] sm:$0xff] }
 0x729   :  { %2697 = vmatprep.subr.bf16.mxu0 %v5341_v28  ;;  %4090 = vmatprep.subr.bf16.mxu1 %v5939_v51 }
 0x72a   :  { %2727 = vmatprep.mubr.bf16.mxu0 %v5940_v6  ;;  %4104 = vmatprep.mubr.msk.bf16.mxu1 %vm4697_vm0, %v5939_v51 }
 0x72b   :  { %v4529_v55 = vpop.eup %4528 }
 0x72c   :  { %v2561_v16 = vmul.f32 %v4529_v55, %v2560_v52  ;;  %2698 = vmatpush1.bf16.msra.mxu0 %v5348_v29  ;;  %4091 = vmatpush3.bf16.msra.mxu1 %v5351_v30  ;;  %v4531_v28 = vpop.eup %4530  ;;  %v4404_v52 = vld [vmem:[#allocation5 + $0x2bc] ss:$12 sps:$4 sm:$0xff]   ;;  %v4402_v55 = vld [vmem:[#allocation5 + $0x2b8] ss:$12 sps:$4 sm:$0xff]  }
 0x72d   :  { %2699 = vmatprep.subr.bf16.mxu0 %v5354_v31  ;;  %4092 = vmatprep.subr.bf16.mxu1 %v5939_v51  ;;  %v2564_v29 = vsub.f32 1.0, %v4531_v28 }
 0x72e   :  { %v2562_v27 = vadd.f32 %v2561_v16, %v6003_v26  ;;  %v4405_v16 = vld [vmem:[#allocation5 + $0x2c0] ss:$12 sps:$4 sm:$0xff]  }
 0x72f   :  { %v4408_v26 = vld [vmem:[#allocation5 + $0x2d4] ss:$12 sps:$4 sm:$0xff]  }
 0x730   :  { %4532 = vtanh.f32 %v2562_v27  ;;  %2700 = vmatpush1.bf16.msra.mxu0 %v5358_v32  ;;  %4093 = vmatpush3.bf16.msra.mxu1 %v5361_v33  ;;  %v2566_v32 = vmul.f32 %v4531_v28, %v5603_v58  ;;  %v4406_v27 = vld [vmem:[#allocation5 + $0x2d0] ss:$12 sps:$4 sm:$0xff]   ;;  %v4409_v28 = vld [vmem:[#allocation5 + $0x2d8] ss:$12 sps:$4 sm:$0xff]  }
 0x731   :  { %2701 = vmatprep.subr.bf16.mxu0 %v5364_v34  ;;  %4094 = vmatprep.subr.bf16.mxu1 %v5939_v51 }
 0x734   :  { %2702 = vmatpush1.bf16.msra.mxu0 %v5368_v35  ;;  %4095 = vmatpush3.bf16.msra.mxu1 %v5371_v37 }
 0x735   :  { %2703 = vmatprep.subr.bf16.mxu0 %v5374_v38  ;;  %4096 = vmatprep.subr.bf16.mxu1 %v5939_v51 }
 0x738   :  { %2704 = vmatpush1.bf16.msra.mxu0 %v5378_v63  ;;  %4097 = vmatpush3.bf16.msra.mxu1 %v5381_v10 }
 0x739   :  { %2705 = vmatprep.subr.bf16.mxu0 %v5988_v62  ;;  %4098 = vmatprep.subr.bf16.mxu1 %v5939_v51 }
 0x73a   :  { %v4533_v30 = vpop.eup %4532 }
 0x73b   :  { %v2565_v31 = vmul.f32 %v4533_v30, %v2564_v29  ;;  %v4412_v29 = vld [vmem:[#allocation5 + $0x2ec] ss:$12 sps:$4 sm:$0xff]   ;;  %v4410_v30 = vld [vmem:[#allocation5 + $0x2e8] ss:$12 sps:$4 sm:$0xff]  }
 0x73c   :  { %2706 = vmatpush1.bf16.msra.mxu0 %v5989_v8  ;;  %4099 = vmatpush3.bf16.msra.mxu1 %v5990_v45 }
 0x73d   :  { %2707 = vmatprep.subr.bf16.mxu0 %v5991_v57  ;;  %4100 = vmatprep.subr.bf16.mxu1 %v5939_v51  ;;  %v5691_v33 = vadd.f32 %v2566_v32, %v2565_v31  ;;  %v4413_v31 = vld [vmem:[#allocation5 + $0x2f0] ss:$12 sps:$4 sm:$0xff]  }
 0x740   :  { %2708 = vmatpush1.bf16.msra.mxu0 %v5992_v0  ;;  %4101 = vmatpush3.bf16.msra.mxu1 %v5993_v42 }
 0x741   :  { %2709 = vmatprep.subr.bf16.mxu0 %v5994_v9  ;;  %4102 = vmatprep.subr.bf16.mxu1 %v5939_v51 }
 0x744   :  { %2710 = vmatpush1.bf16.msra.mxu0 %v5995_v12  ;;  %4103 = vmatpush3.bf16.msra.mxu1 %v5996_v1 }
 0x745   :  { %4108 = vmatprep.subr.bf16.mxu1 %v5939_v51  ;;  %2960 = vmatprep.subr.bf16.mxu0 %v4384_v23 }
 0x7fa   :  { %v2610_v34 = vpop.f32.mrb[68].mxu0  ;;  %v2651_v35 = vpop.f32.mrb[68].mxu1 }
 0x7fb   :  { %v2658_v37 = vrot.slane %v2610_v34, 2  ;;  %v2612_v38 = vpop.f32.mrb[69].mxu0  ;;  %v4086_v63 = vpop.f32.mrb[69].mxu1  ;;  %v2677_v50 = vadd.f32 %v5999_v43, %v2651_v35 }
 0x7fc   :  { %v2668_v10 = vrot.slane %v2612_v38, 2  ;;  %v2614_v4 = vpop.f32.mrb[70].mxu0  ;;  %v2654_v58 = vpop.f32.mrb[70].mxu1 }
 0x7fd   :  { %v2660_v62 = vadd.f32 %v2658_v37, %v5997_v13  ;;  %v2615_v8 = vpop.f32.mrb[71].mxu0  ;;  %v4087_v45 = vpop.f32.mrb[71].mxu1  ;;  %v2679_v44 = vrot.slane %v2677_v50, 2 }
 0x7fe   :  { %v2670_v57 = vadd.f32 %v2668_v10, %v5998_v53 }
 0x7ff   :  { %v3511_v0 = vmul.f32 -1.442695, %v2660_v62 }
 0x800   :  { %v3512_v42 = vmul.f32 -1.442695, %v2670_v57 }
 0x801   :  { %4534 = vpow2.f32 %v3511_v0 }
 0x802   :  { %4536 = vpow2.f32 %v3512_v42 }
 0x80b   :  { %v4535_v9 = vpop.eup %4534 }
 0x80c   :  { %v4537_v12 = vpop.eup %4536  ;;  %v2664_v1 = vadd.f32 1.0, %v4535_v9 }
 0x80d   :  { %v2674_v17 = vadd.f32 1.0, %v4537_v12 }
 0x80e   :  { %4538 = vrcp.f32 %v2664_v1 }
 0x80f   :  { %4540 = vrcp.f32 %v2674_v17 }
 0x818   :  { %v4539_v40 = vpop.eup %4538 }
 0x819   :  { %v4541_v54 = vpop.eup %4540  ;;  %v2681_v21 = vmul.f32 %v4539_v40, %v2679_v44 }
 0x81a   :  { %v2689_v22 = vmul.f32 %v4541_v54, %v2687_v14  ;;  %v2684_v56 = vsub.f32 1.0, %v4541_v54 }
 0x81b   :  { %v2682_v24 = vadd.f32 %v2681_v21, %v6000_v20 }
 0x81d   :  { %4542 = vtanh.f32 %v2682_v24 }
 0x827   :  { %v4543_v2 = vpop.eup %4542 }
 0x828   :  { %v2685_v11 = vmul.f32 %v4543_v2, %v2684_v56 }
 0x82a   :  { %v5705_v3 = vadd.f32 %v2689_v22, %v2685_v11 }
 0x82c   :  { %v2691_v5 = vpack.c.bf16 %v5705_v3, %v5705_v3 }
 0x82e   :  { %v2693_v15 = vrot.slane %v2691_v5, 3 }
 0x830   :  { %2728 = vmatmul.mubr.bf16.vlgmr.msra.gmra.mrb[72].mxu0 %v2693_v15  ;;  %4105 = vmatmul.mubr.bf16.vlgmr.msra.gmra.mrb[72].mxu1 %v2693_v15 }
 0x831   :  { %2992 = vmatprep.mubr.bf16.mxu0 %v5940_v6  ;;  %4124 = vmatprep.mubr.msk.bf16.mxu1 %vm4697_vm0, %v5939_v51 }
 0x832   :  { %2961 = vmatpush1.bf16.msra.mxu0 %v4382_v7  ;;  %4109 = vmatpush3.bf16.msra.mxu1 %v4385_v41  ;;  %v6004_v41 = vlaneseq }
 0x833   :  { %4110 = vmatprep.subr.bf16.mxu1 %v5939_v51  ;;  %2962 = vmatprep.subr.bf16.mxu0 %v4388_v48 }
 0x834   :  { %v5734_v48 = vshrl.u32 %v6004_v41, 7 }
 0x836   :  { %2963 = vmatpush1.bf16.msra.mxu0 %v4386_v36  ;;  %4111 = vmatpush3.bf16.msra.mxu1 %v4389_v49  ;;  %v2947_v36 = vsub.s32 0, %v5734_v48  ;;  %v3438_v49 = vld [vmem:[%s5847_s4 + $0x5] ss:$8 sm:$0x7]  ;;  %v3179_v41 = vadd.s32 56, %v5734_v48 }
 0x837   :  { %4112 = vmatprep.subr.bf16.mxu1 %v5939_v51  ;;  %2964 = vmatprep.subr.bf16.mxu0 %v4392_v60  ;;  %v2951_v60 = vsub.s32 1, %v5734_v48 }
 0x83a   :  { %2965 = vmatpush1.bf16.msra.mxu0 %v4390_v19  ;;  %4113 = vmatpush3.bf16.msra.mxu1 %v4393_v59  ;;  %v2948_v19 = vrot.slane %v3438_v49, %v2947_v36 }
 0x83b   :  { %4114 = vmatprep.subr.bf16.mxu1 %v5939_v51  ;;  %2966 = vmatprep.subr.bf16.mxu0 %v4396_v39  ;;  %v2952_v39 = vrot.slane %v3438_v49, %v2951_v60 }
 0x83e   :  { %2967 = vmatpush1.bf16.msra.mxu0 %v4394_v47  ;;  %4115 = vmatpush3.bf16.msra.mxu1 %v4397_v25 }
 0x83f   :  { %2968 = vmatprep.subr.bf16.mxu0 %v4400_v46  ;;  %4116 = vmatprep.subr.bf16.mxu1 %v5939_v51 }
 0x842   :  { %2969 = vmatpush1.bf16.msra.mxu0 %v4398_v18  ;;  %4117 = vmatpush3.bf16.msra.mxu1 %v4401_v61 }
 0x843   :  { %2970 = vmatprep.subr.bf16.mxu0 %v4404_v52  ;;  %4118 = vmatprep.subr.bf16.mxu1 %v5939_v51 }
 0x846   :  { %2971 = vmatpush1.bf16.msra.mxu0 %v4402_v55  ;;  %4119 = vmatpush3.bf16.msra.mxu1 %v4405_v16 }
 0x847   :  { %2972 = vmatprep.subr.bf16.mxu0 %v4408_v26  ;;  %4120 = vmatprep.subr.bf16.mxu1 %v5939_v51 }
 0x84a   :  { %2973 = vmatpush1.bf16.msra.mxu0 %v4406_v27  ;;  %4121 = vmatpush3.bf16.msra.mxu1 %v4409_v28 }
 0x84b   :  { %2974 = vmatprep.subr.bf16.mxu0 %v4412_v29  ;;  %4122 = vmatprep.subr.bf16.mxu1 %v5939_v51 }
 0x84e   :  { %2975 = vmatpush1.bf16.msra.mxu0 %v4410_v30  ;;  %4123 = vmatpush3.bf16.msra.mxu1 %v4413_v31  ;;  %v2955_v31 = vsub.s32 2, %v5734_v48 }
 0x84f   :  { %4128 = vmatprep.subr.bf16.mxu1 %v5939_v51 }
 0x903   :  { %v2729_v32 = vpop.f32.mrb[72].mxu0  ;;  %v2770_v34 = vpop.f32.mrb[72].mxu1 }
 0x904   :  { %v2777_v35 = vrot.slane %v2729_v32, 1  ;;  %v2731_v37 = vpop.f32.mrb[73].mxu0  ;;  %v4106_v38 = vpop.f32.mrb[73].mxu1  ;;  %v2796_v17 = vadd.f32 %v5999_v43, %v2770_v34  ;;  %v986_v43 = vld [vmem:[%s5847_s4] sm:$0x6] }
 0x905   :  { %v2787_v63 = vrot.slane %v2731_v37, 1  ;;  %v2733_v10 = vpop.f32.mrb[74].mxu0  ;;  %v2773_v4 = vpop.f32.mrb[74].mxu1  ;;  %v983_v34 = vld [vmem:[%s5847_s4 + $0x10] ss:$0 sm:$0xff]  ;;  %v6005_v38 = vld [vmem:[#allocation23_spill] sm:$0xff] }
 0x906   :  { %v2779_v58 = vadd.f32 %v2777_v35, %v5997_v13  ;;  %v2734_v62 = vpop.f32.mrb[75].mxu0  ;;  %v4107_v8 = vpop.f32.mrb[75].mxu1  ;;  %v2798_v50 = vrot.slane %v2796_v17, 1  ;;  %v2806_v13 = vrot.slane %v5705_v3, 7  ;;  %v2956_v35 = vrot.slane %v3438_v49, %v2955_v31 }
 0x907   :  { %v2789_v45 = vadd.f32 %v2787_v63, %v5998_v53  ;;  %v3055_v63 = vadd.f32 %v983_v34, %v6005_v38  ;;  %v2568_v17 = vpack.c.bf16 %v5939_v51, %v5691_v33 }
 0x908   :  { %v3513_v57 = vmul.f32 -1.442695, %v2779_v58 }
 0x909   :  { %v3514_v0 = vmul.f32 -1.442695, %v2789_v45 }
 0x90a   :  { %4544 = vpow2.f32 %v3513_v57 }
 0x90b   :  { %4546 = vpow2.f32 %v3514_v0 }
 0x914   :  { %v4545_v42 = vpop.eup %4544 }
 0x915   :  { %v4547_v9 = vpop.eup %4546  ;;  %v2783_v12 = vadd.f32 1.0, %v4545_v42  ;;  %v4616_v42 = vld [vmem:[%s5844_s1] sm:$0x1] }
 0x916   :  { %v2793_v1 = vadd.f32 1.0, %v4547_v9 }
 0x917   :  { %4548 = vrcp.f32 %v2783_v12 }
 0x918   :  { %4550 = vrcp.f32 %v2793_v1 }
 0x921   :  { %v4549_v44 = vpop.eup %4548 }
 0x922   :  { %v4551_v40 = vpop.eup %4550  ;;  %v2800_v14 = vmul.f32 %v4549_v44, %v2798_v50  ;;  %v988_v50 = vld [vmem:[%s5847_s4 + $0x3] ss:$0 sm:$0xff] }
 0x923   :  { %v2808_v54 = vmul.f32 %v4551_v40, %v2806_v13  ;;  %v2803_v21 = vsub.f32 1.0, %v4551_v40  ;;  %v989_v44 = vpack.c.bf16 %v988_v50, %v988_v50  ;;  %v4699_v13 = vmov 1   ;;  %v990_v40 = vld [vmem:[%s5847_s4 + $0x4] ss:$0 sm:$0xff] }
 0x924   :  { %v2801_v53 = vadd.f32 %v2800_v14, %v6000_v20  ;;  %v987_v20 = vpack.c.bf16 %v986_v43, %v986_v43  ;;  %4220 = vset.pattern.permute.xlu1 %v4699_v13  ;;  %v4700_v43 = vmov 0.0|0.0  }
 0x925   :  { %4175 = vmatprep.subr.bf16.mxu0 %v4700_v43 }
 0x926   :  { %4552 = vtanh.f32 %v2801_v53  ;;  %v3065_v3 = vshrl.u32 %v987_v20, 16  ;;  %v3067_v15 = vshll.u32 %v987_v20, 16  ;;  %v3175_v20 = vadd.s32 24, %v5734_v48 }
 0x928   :  { %v3069_v23 = vrot.slane %v3067_v15, 1  ;;  %v3177_v15 = vadd.s32 40, %v5734_v48 }
 0x92a   :  { %v3070_v7 = vor.u32 %v3069_v23, %v3065_v3  ;;  %v6007_v23 = vmov 1.0|1.0  }
 0x930   :  { %v4553_v22 = vpop.eup %4552 }
 0x931   :  { %v2804_v24 = vmul.f32 %v4553_v22, %v2803_v21 }
 0x933   :  { %v2809_v56 = vadd.f32 %v2808_v54, %v2804_v24 }
 0x935   :  { %v2810_v2 = vpack.c.bf16 %v2809_v56, %v2809_v56  ;;  %v3173_v56 = vadd.s32 8, %v5734_v48 }
 0x937   :  { %v2812_v11 = vshrl.u32 %v2810_v2, 16  ;;  %v6006_v2 = vld [vmem:[#allocation11_spill] sm:$0xff] }
 0x938   :  { %vm3188_vm10 = vcmp.le.s32.totalorder %v5734_v48, %v6006_v2  ;;  %vm3189_vm11 = vcmp.le.s32.totalorder %v3173_v56, %v6006_v2  ;;  %vm3191_vm14 = vcmp.le.s32.totalorder %v3175_v20, %v6006_v2  ;;  %vm3193_vm1 = vcmp.le.s32.totalorder %v3177_v15, %v6006_v2 }
 0x939   :  { %v2814_v5 = vrot.slane %v2812_v11, 3  ;;  %v3174_v11 = vadd.s32 16, %v5734_v48  ;;  %vm4176_vm13 = vmpackc.low %vm3189_vm11, %vm3188_vm10  ;;  %vm3195_vm4 = vcmp.le.s32.totalorder %v3179_v41, %v6006_v2  ;;  %vm3112_vm6 = vcmp.lt.s32.totalorder %v6006_v2, 8 }
 0x93b   :  { %2993 = vmatmul.mubr.bf16.vlgmr.msra.gmra.mrb[0].mxu0 %v2814_v5  ;;  %4125 = vmatmul.mubr.bf16.vlgmr.msra.gmra.mrb[76].mxu1 %v2814_v5  ;;  %vm3190_vm12 = vcmp.le.s32.totalorder %v3174_v11, %v6006_v2 }
 0x93c   :  { %4130 = vmatprep.mubr.msk.bf16.mxu1 %vm4697_vm0, %v5939_v51  ;;  %4172 = vmatprep.mubr.msk.f32.mxu0 %vm4697_vm0, %v5939_v51  ;;  %vm4179_vm15 = vmpackc.low %vm3191_vm14, %vm3190_vm12 }
 0x93d   :  { %4129 = vmatpush3.bf16.xpose.msra.mxu1 %v3070_v7  ;;  %4177 = vmatpush3.bf16.msk.msra.mxu0 %vm4176_vm13, %v6007_v23  ;;  %v3178_v7 = vadd.s32 48, %v5734_v48 }
 0x93e   :  { %4134 = vmatprep.subr.bf16.mxu1 %v5939_v51  ;;  %4178 = vmatprep.subr.bf16.mxu0 %v4700_v43 }
 0x93f   :  { %vm3194_vm3 = vcmp.le.s32.totalorder %v3178_v7, %v6006_v2 }
 0x940   :  { %vm4185_vm5 = vmpackc.low %vm3195_vm4, %vm3194_vm3 }
 0x941   :  { %4180 = vmatpush3.bf16.msk.msra.mxu0 %vm4179_vm15, %v6007_v23 }
 0x942   :  { %4181 = vmatprep.subr.bf16.mxu0 %v4700_v43 }
 0xa0e   :  { %v2994_v59 = vpop.f32.mrb[0].mxu0  ;;  %v3035_v47 = vpop.f32.mrb[76].mxu1 }
 0xa0f   :  { %v2995_v25 = vadd.f32 %v2994_v59, %v2948_v19  ;;  %v2996_v46 = vpop.f32.mrb[1].mxu0  ;;  %v4126_v18 = vpop.f32.mrb[77].mxu1  ;;  %v3036_v4 = vadd.f32 %v3035_v47, %v2956_v35  ;;  %v3180_v47 = vadd.s32 64, %v5734_v48 }
 0xa10   :  { %v2998_v61 = vpop.f32.mrb[2].mxu0  ;;  %v3038_v52 = vpop.f32.mrb[78].mxu1  ;;  %v2997_v27 = vadd.f32 %v2996_v46, %v2952_v39  ;;  %v3181_v39 = vadd.s32 72, %v5734_v48  ;;  %v3183_v46 = vadd.s32 88, %v5734_v48  ;;  %v3184_v18 = vadd.s32 96, %v5734_v48 }
 0xa11   :  { %v3539_v55 = vmul.f32 -1.442695, %v2995_v25  ;;  %v2999_v16 = vpop.f32.mrb[3].mxu0  ;;  %v4127_v26 = vpop.f32.mrb[79].mxu1  ;;  %vm3196_vm8 = vcmp.le.s32.totalorder %v3180_v47, %v6006_v2  ;;  %v3182_v25 = vadd.s32 80, %v5734_v48  ;;  %v3185_v61 = vadd.s32 104, %v5734_v48 }
 0xa12   :  { %v3540_v28 = vmul.f32 -1.442695, %v2997_v27  ;;  %vm3197_vm9 = vcmp.le.s32.totalorder %v3181_v39, %v6006_v2  ;;  %vm3199_vm12 = vcmp.le.s32.totalorder %v3183_v46, %v6006_v2  ;;  %v3186_v52 = vadd.s32 112, %v5734_v48 }
 0xa13   :  { %4554 = vpow2.f32 %v3539_v55  ;;  %vm4188_vm10 = vmpackc.low %vm3197_vm9, %vm3196_vm8  ;;  %vm3198_vm11 = vcmp.le.s32.totalorder %v3182_v25, %v6006_v2  ;;  %v3187_v55 = vadd.s32 120, %v5734_v48  ;;  %vm3200_vm14 = vcmp.le.s32.totalorder %v3184_v18, %v6006_v2 }
 0xa14   :  { %4556 = vpow2.f32 %v3540_v28  ;;  %vm4191_vm13 = vmpackc.low %vm3199_vm12, %vm3198_vm11  ;;  %vm3201_vm15 = vcmp.le.s32.totalorder %v3185_v61, %v6006_v2  ;;  %vm3334_vm8 = vcmask 1041408   ;;  %vm3336_vm9 = vcmask 1042432  }
 0xa1d   :  { %v4555_v29 = vpop.eup %4554 }
 0xa1e   :  { %v3045_v30 = vadd.f32 1.0, %v4555_v29  ;;  %v4557_v32 = vpop.eup %4556 }
 0xa1f   :  { %v3052_v37 = vadd.f32 1.0, %v4557_v32 }
 0xa20   :  { %4558 = vrcp.f32 %v3045_v30  ;;  %v51_v30 = vld [vmem:[%s5844_s1 + $0x1] sm:$0x1]  ;;  %s4701_s1 = smov [#allocation7]  }
 0xa21   :  { %4560 = vrcp.f32 %v3052_v37  ;;  %s3345_s28 = sshll.u32 %s4701_s1, 4  ;;  %s3346_s28 = int_to_ptr.vmem [resolvable:$true] %s3345_s28 }
 0xa22   :  { %s4661_s29 = scalar_lea.vmem %s3346_s28, 128  ;;  %p4666_p3 = scmp.lt.s32.totalorder %s3346_s28, %s3346_s28 }
 0xa23   :  { %p4662_p2 = scmp.ne.s32.totalorder %s3346_s28, %s4661_s29  ;;  %p4667_p4 = scmp.lt.s32.totalorder %s4661_s29, %s4661_s29 }
 0xa25   :  { %p4668_p5 = por %p4667_p4, %p4666_p3 }
 0xa27   :  { %p4669_p6 = pnand %p4668_p5, %p4662_p2 }
 0xa2a   :  { %v4559_v10 = vpop.eup %4558 }
 0xa2b   :  { %v3056_v58 = vmul.f32 %v4559_v10, %v3055_v63  ;;  %v4561_v8 = vpop.eup %4560 }
 0xa2c   :  { %v3059_v45 = vsub.f32 1.0, %v4561_v8  ;;  %v3061_v9 = vmul.f32 %v4616_v42, %v4561_v8 }
 0xa2d   :  { %v3057_v62 = vadd.f32 %v3056_v58, %v3036_v4 }
 0xa2f   :  { %4562 = vtanh.f32 %v3057_v62 }
 0xa39   :  { %v4563_v57 = vpop.eup %4562 }
 0xa3a   :  { %v3060_v0 = vmul.f32 %v4563_v57, %v3059_v45 }
 0xa3c   :  { %v5749_v12 = vadd.f32 %v3061_v9, %v3060_v0 }
 0xa3e   :  { %v3063_v1 = vpack.c.bf16 %v5749_v12, %v5749_v12 }
 0xa40   :  { %4131 = vmatmul.mubr.bf16.vlgmr.msra.gmra.mrb[80].mxu1 %v3063_v1 }
 0xa41   :  { %4135 = vmatpush3.bf16.xpose.msra.mxu1 %v2568_v17  ;;  %4136 = vmatprep.mubr.msk.bf16.mxu1 %vm4697_vm0, %v5939_v51 }
 0xa48   :  { %4137 = vmatmul.mubr.bf16.vlgmr.msra.gmra.mrb[84].mxu1 %v989_v44 }
 0xb13   :  { %v3106_v14 = vpop.f32.mrb[80].mxu1 }
 0xb14   :  { %v5763_v54 = vadd.f32 %v3106_v14, %v990_v40  ;;  %v4132_v33 = vpop.f32.mrb[81].mxu1 }
 0xb15   :  { %v3109_v53 = vpop.f32.mrb[82].mxu1 }
 0xb16   :  { %3115 = vperm.xlu1 %4220, %v5763_v54   ;;  %v4133_v21 = vpop.f32.mrb[83].mxu1 }
 0xb1a   :  { %4221 = vset.pattern.permute.xlu1 %v5940_v6  ;;  %v3176_v6 = vadd.s32 32, %v5734_v48 }
 0xb1b   :  { %v3152_v22 = vpop.f32.mrb[84].mxu1 }
 0xb1c   :  { %v4138_v24 = vpop.f32.mrb[85].mxu1  ;;  %vm3192_vm0 = vcmp.le.s32.totalorder %v3176_v6, %v6006_v2 }
 0xb1d   :  { %v3155_v5 = vpop.f32.mrb[86].mxu1  ;;  %vm4182_vm2 = vmpackc.low %vm3193_vm1, %vm3192_vm0  ;;  %vm3202_vm1 = vcmp.le.s32.totalorder %v3186_v52, %v6006_v2 }
 0xb1e   :  { %v4139_v3 = vpop.f32.mrb[87].mxu1  ;;  %4183 = vmatpush3.bf16.msk.msra.mxu0 %vm4182_vm2, %v6007_v23  ;;  %vm4194_vm0 = vmpackc.low %vm3201_vm15, %vm3200_vm14  ;;  %vm3203_vm2 = vcmp.le.s32.totalorder %v3187_v55, %v6006_v2 }
 0xb1f   :  { %4184 = vmatprep.subr.bf16.mxu0 %v4700_v43  ;;  %vm4197_vm3 = vmpackc.low %vm3203_vm2, %vm3202_vm1 }
 0xb22   :  { %4186 = vmatpush3.bf16.msk.msra.mxu0 %vm4185_vm5, %v6007_v23  ;;  %vm3320_vm5 = vcmp.eq.s32.totalorder %v6006_v2, 1 }
 0xb23   :  { %4187 = vmatprep.subr.bf16.mxu0 %v4700_v43 }
 0xb26   :  { %4189 = vmatpush3.bf16.msk.msra.mxu0 %vm4188_vm10, %v6007_v23 }
 0xb27   :  { %4190 = vmatprep.subr.bf16.mxu0 %v4700_v43 }
 0xb2a   :  { %4192 = vmatpush3.bf16.msk.msra.mxu0 %vm4191_vm13, %v6007_v23 }
 0xb2b   :  { %4193 = vmatprep.subr.bf16.mxu0 %v4700_v43 }
 0xb2e   :  { %4195 = vmatpush3.bf16.msk.msra.mxu0 %vm4194_vm0, %v6007_v23 }
 0xb2f   :  { %4196 = vmatprep.subr.bf16.mxu0 %v4700_v43 }
 0xb32   :  { %4198 = vmatpush3.bf16.msk.msra.mxu0 %vm4197_vm3, %v6007_v23 }
 0xb95   :  { %v3116_v36 = vpop.permute.xlu1 %3115 }
 0xb96   :  { %v3153_v49 = vadd.f32 %v3152_v22, %v3116_v36 }
 0xb98   :  { %v3158_v60 = vmax.f32 %v3153_v49, 0.0 }
 0xb9a   :  { %v5790_v19 = vsel %vm3112_vm6, %v3158_v60, 0.0 }
 0xb9b   :  { %v3161_v59 = vsel %vm3160_vm7, %v5790_v19, -inf }
 0xb9c   :  { %3162 = vmax.xlane.f32.xlu0 %v3161_v59 }
 0xc29   :  { %v3163_v16 = vpop.xlane.xlu0 %3162 }
 0xc2a   :  { %v3164_v48 = vsub.f32 %v5790_v19, %v3163_v16 }
 0xc2c   :  { %v3165_v26 = vmul.f32 1.442695, %v3164_v48 }
 0xc2e   :  { %4564 = vpow2.f32 %v3165_v26 }
 0xc38   :  { %v4565_v27 = vpop.eup %4564 }
 0xc39   :  { %4173 = vmatmul.mubr.msk.f32.vlgmr.msra.gmra.mrb[76].mxu0 %vm3112_vm6, %v4565_v27  ;;  %v3167_v28 = vsel %vm3112_vm6, %v4565_v27, 0.0  ;;  %vm3319_vm6 = vcmp.eq.s32.totalorder %v6006_v2, 0 }
 0xc3a   :  { %v3168_v29 = vsel %vm3160_vm7, %v3167_v28, 0.0 }
 0xc3b   :  { %3169 = vadd.xlane.f32.xlu1 %v3168_v29 }
 0xcc8   :  { %v3170_v31 = vpop.xlane.xlu1 %3169 }
 0xcc9   :  { %v3306_v32 = vmul.f32 %v3170_v31, %v51_v30 }
 0xccb   :  { %3309 = vperm.xlu0 %4218, %v3306_v32  }
 0xd0c   :  { %v3302_v34 = vpop.f32.mrb[76].mxu0 }
 0xd0d   :  { %v4174_v35 = vpop.f32.mrb[77].mxu0 }
 0xd4a   :  { %v3310_v37 = vpop.permute.xlu0 %3309 }
 0xd4b   :  { %vm3312_vm4 = vcmp.le.f32.partialorder %v3302_v34, %v3310_v37 }
 0xd4c   :  { %v3574_v38 = vsel %vm3312_vm4, 1.0, %v5939_v51  ;;  %v3331_v51 = vrot.slane %v5749_v12, 6 }
 0xd4d   :  { %v3315_v63 = vsel %vm3160_vm7, %v3574_v38, 0.0 }
 0xd4e   :  { %3316 = vadd.xlane.f32.xlu1 %v3315_v63 }
 0xd5f   :  { %3323 = vperm.xlu1 %4221, %v5763_v54  }
 0xddb   :  { %v3317_v10 = vpop.xlane.xlu1 %3316 }
 0xddc   :  { %v3318_v4 = vmin.f32 %v3317_v10, 7.0 }
 0xdde   :  { %v3321_v58 = vsel %vm3320_vm5, %v3318_v4, 0.0 }
 0xddf   :  { %v3324_v62 = vpop.permute.xlu1 %3323 }
 0xde0   :  { %v3326_v8 = vsel %vm3319_vm6, %v3324_v62, %v3321_v58 }
 0xde1   :  { %v3328_v45 = vrot.slane %v3326_v8, 7 }
 0xde3   :  { %v3333_v57 = vsel %vm3160_vm7, %v5790_v19, %v3328_v45 }
 0xde4   :  { %v3335_v0 = vsel %vm3334_vm8, %v3333_v57, %v3331_v51 }
 0xde5   :  { %v3337_v42 = vsel %vm3336_vm9, %v3335_v0, 0.0 }
 0xde6   :  { %3338 = vst [vmem:[#allocation7] sm:$0xff] %v3337_v42 }
 0xde7   :  { %4672 = shalt.err (!%p4669_p6)
}
 0xde8   :  { %s4673_s7 = scalar_lea.hbm %s5848_s5, 128 }
 0xde9   :  { %p4674_p7 = scmp.ne.s32.totalorder %s5848_s5, %s4673_s7  ;;  %p4677_p8 = scmp.lt.u32.totalorder %s4673_s7, %s5848_s5 }
 0xdeb   :  { %p4679_p9 = pnand %p4677_p8, %p4674_p7 }
 0xded   :  { %4682 = shalt.err (!%p4679_p9)
}
 0xdee   :  { %3348 = dma.vmem_to_hbm [thread:$0]  %s3346_s28, 128, %s5848_s5, [#allocation4]  }
 0xdef   :  { %4687 = dma.done.wait [#allocation4], 128  }
 0xdf0   :  { %4688 = vsyncadd [#allocation4], 4294967168 }
 0xdf1   :  { %3352 = vsyncpa [#allocation3], 1 }
 0xdf2   :  { %3353 = vsyncpa [#allocation6], 1 }
 0xdf3   :  { %3354 = vsyncpa [#allocation4], 1 }

</bundles_post_ra>
